<compile_context>
chip_gen: v7x
topology: tpu7x:2x2x1
jax: 0.10.0
libtpu: 0.0.40
codegen_flags: <defaults>
</compile_context>

<pallas_src>
import jax
import jax.numpy as jnp
from jax import lax
from jax.experimental import pallas as pl
from jax.experimental.pallas import tpu as pltpu


def _silu(x):
    # x * sigmoid(x); exp goes to the EUP slot.
    return x * (1.0 / (1.0 + jnp.exp(-x)))


def _basic_block_kernel(xpad_ref, w1_ref, b1_ref, w2_ref, b2_ref, o_ref, ypad_ref):
    # xpad_ref : (1, H+2, W+2, Cin)   spatially zero-padded input (NHWC)
    # w1_ref   : (3, 3, Cin, Cm)      conv1 weights with BN1 scale folded in
    # b1_ref   : (1, Cm)              folded conv1+BN1 bias
    # w2_ref   : (3, 3, Cm, Cout)     conv2 weights with BN2 scale folded in
    # b2_ref   : (1, Cout)            folded conv2+BN2 bias
    # o_ref    : (1, H, W, Cout)
    # ypad_ref : VMEM scratch (H+2, W+2, Cm) f32 for the padded mid activation
    _, hp, wp, cin = xpad_ref.shape
    h, w = hp - 2, wp - 2
    cm = w1_ref.shape[3]
    cout = w2_ref.shape[3]

    w1 = w1_ref[...]          # (3, 3, Cin, Cm) — small, load once
    w2 = w2_ref[...]          # (3, 3, Cm, Cout)
    b1 = b1_ref[...]          # (1, Cm)
    b2 = b2_ref[...]          # (1, Cout)

    # ---- conv1 (3x3, pad=1) + BN1 (folded) + SiLU : 9 shifted MXU matmuls ----
    acc = jnp.zeros((h * w, cm), jnp.float32)
    for dy in range(3):
        for dx in range(3):
            patch = xpad_ref[0, dy:dy + h, dx:dx + w, :].reshape(h * w, cin)
            acc = acc + jnp.dot(patch, w1[dy, dx],
                                preferred_element_type=jnp.float32)
    y = _silu(acc + b1)                              # (H*W, Cm) f32

    # ---- zero-pad the mid activation into VMEM scratch for conv2 ----
    ypad_ref[...] = jnp.zeros_like(ypad_ref)
    ypad_ref[1:h + 1, 1:w + 1, :] = y.reshape(h, w, cm)

    # ---- conv2 (3x3, pad=1) + BN2 (folded) ----
    acc2 = jnp.zeros((h * w, cout), jnp.float32)
    for dy in range(3):
        for dx in range(3):
            patch = ypad_ref[dy:dy + h, dx:dx + w, :].reshape(h * w, cm)
            acc2 = acc2 + jnp.dot(patch, w2[dy, dx],
                                  preferred_element_type=jnp.float32)

    # ---- residual add (center of the padded input) + final SiLU ----
    residual = xpad_ref[0, 1:h + 1, 1:w + 1, :].reshape(h * w, cin)
    z = _silu(acc2 + b2 + residual.astype(jnp.float32))
    o_ref[0] = z.reshape(h, w, cout).astype(o_ref.dtype)


def _fold_bn(w_oihw, conv_bias, gamma, beta, mean, var, eps):
    """Fold inference BatchNorm into conv weights/bias; return HWIO weights."""
    scale = gamma / jnp.sqrt(var + eps)                      # (Cout,)
    w_hwio = jnp.transpose(w_oihw, (2, 3, 1, 0)) * scale[None, None, None, :]
    bias = (conv_bias - mean) * scale + beta
    return w_hwio.astype(jnp.float32), bias.reshape(1, -1).astype(jnp.float32)


def basic_block(x, params, eps=1e-5):
    """Pallas equivalent of BasicBlock.forward. x: (B, C, H, W) NCHW float32."""
    b, c1, h, w = x.shape
    w1f, b1f = _fold_bn(params["w1"], params["b1"], params["g1"],
                        params["beta1"], params["m1"], params["v1"], eps)
    w2f, b2f = _fold_bn(params["w2"], params["b2"], params["g2"],
                        params["beta2"], params["m2"], params["v2"], eps)
    cm = w1f.shape[3]
    c2 = w2f.shape[3]
    assert c2 == c1, "residual add requires c1 == c2"

    # NHWC (channels -> lane axis) + spatial zero-pad for the 3x3 halo.
    x_nhwc = jnp.transpose(x, (0, 2, 3, 1))
    x_pad = jnp.pad(x_nhwc, ((0, 0), (1, 1), (1, 1), (0, 0)))

    flops = int(2 * b * h * w * 9 * (c1 * cm + cm * c2) + 6 * b * h * w * (cm + c2))
    transcendentals = int(b * h * w * (cm + c2))
    bytes_accessed = int(4 * (x_pad.size + b * h * w * c2 + w1f.size + w2f.size
                              + b1f.size + b2f.size))

    out_nhwc = pl.pallas_call(
        _basic_block_kernel,
        out_shape=jax.ShapeDtypeStruct((b, h, w, c2), x.dtype),
        grid=(b,),
        in_specs=[
            pl.BlockSpec((1, h + 2, w + 2, c1), lambda i: (i, 0, 0, 0)),
            pl.BlockSpec((3, 3, c1, cm), lambda i: (0, 0, 0, 0)),
            pl.BlockSpec((1, cm), lambda i: (0, 0)),
            pl.BlockSpec((3, 3, cm, c2), lambda i: (0, 0, 0, 0)),
            pl.BlockSpec((1, c2), lambda i: (0, 0)),
        ],
        out_specs=pl.BlockSpec((1, h, w, c2), lambda i: (i, 0, 0, 0)),
        scratch_shapes=[pltpu.VMEM((h + 2, w + 2, cm), jnp.float32)],
        compiler_params=pltpu.CompilerParams(
            dimension_semantics=("parallel",),
            vmem_limit_bytes=32 * 1024 * 1024,
        ),
        cost_estimate=pl.CostEstimate(
            flops=flops,
            transcendentals=transcendentals,
            bytes_accessed=bytes_accessed,
        ),
    )(x_pad, w1f, b1f, w2f, b2f)

    return jnp.transpose(out_nhwc, (0, 3, 1, 2))   # back to NCHW


def _reference(x, params, eps=1e-5):
    """Pure-JAX reference matching the PyTorch forward (inference-mode BN)."""
    def conv(x, w, bias):
        y = lax.conv_general_dilated(
            x, w, window_strides=(1, 1), padding="SAME",
            dimension_numbers=("NCHW", "OIHW", "NCHW"),
            precision=lax.Precision.HIGHEST)
        return y + bias[None, :, None, None]

    def bn(x, gamma, beta, mean, var):
        inv = gamma / jnp.sqrt(var + eps)
        return (x - mean[None, :, None, None]) * inv[None, :, None, None] \
               + beta[None, :, None, None]

    def silu(v):
        return v * jax.nn.sigmoid(v)

    residual = x
    y = conv(x, params["w1"], params["b1"])
    y = bn(y, params["g1"], params["beta1"], params["m1"], params["v1"])
    y = silu(y)
    y = conv(y, params["w2"], params["b2"])
    y = bn(y, params["g2"], params["beta2"], params["m2"], params["v2"])
    y = y + residual
    return silu(y)


if __name__ == "__main__":
    key = jax.random.PRNGKey(0)
    ks = jax.random.split(key, 13)

    b, c, h, w = 2, 16, 16, 16      # c1 == c2 == 16 (residual requires equality)
    x = jax.random.normal(ks[0], (b, c, h, w), dtype=jnp.float32)
    params = {
        "w1": 0.1 * jax.random.normal(ks[1], (c, c, 3, 3), jnp.float32),
        "b1": 0.1 * jax.random.normal(ks[2], (c,), jnp.float32),
        "g1": 1.0 + 0.1 * jax.random.normal(ks[3], (c,), jnp.float32),
        "beta1": 0.1 * jax.random.normal(ks[4], (c,), jnp.float32),
        "m1": 0.1 * jax.random.normal(ks[5], (c,), jnp.float32),
        "v1": 1.0 + 0.1 * jax.random.uniform(ks[6], (c,), jnp.float32),
        "w2": 0.1 * jax.random.normal(ks[7], (c, c, 3, 3), jnp.float32),
        "b2": 0.1 * jax.random.normal(ks[8], (c,), jnp.float32),
        "g2": 1.0 + 0.1 * jax.random.normal(ks[9], (c,), jnp.float32),
        "beta2": 0.1 * jax.random.normal(ks[10], (c,), jnp.float32),
        "m2": 0.1 * jax.random.normal(ks[11], (c,), jnp.float32),
        "v2": 1.0 + 0.1 * jax.random.uniform(ks[12], (c,), jnp.float32),
    }

    out = jax.jit(basic_block)(x, params)
    out = jax.block_until_ready(out)

    ref = _reference(x, params)
    assert out.shape == ref.shape, (out.shape, ref.shape)
    assert out.dtype == ref.dtype, (out.dtype, ref.dtype)
    max_err = float(jnp.max(jnp.abs(out - ref)))
    assert bool(jnp.allclose(out, ref, atol=3e-2, rtol=3e-2)), \
        f"Pallas BasicBlock mismatch vs reference, max abs err = {max_err}"

    print("KERNEL_OK")
</pallas_src>

<mosaic_0001>
module attributes {stable_mosaic.version = 11 : i64} {
  func.func @_basic_block_kernel(%arg0: i32, %arg1: memref<1x18x18x16xf32, #tpu.memory_space<vmem>>, %arg2: memref<3x3x16x16xf32, #tpu.memory_space<vmem>>, %arg3: memref<1x16xf32, #tpu.memory_space<vmem>>, %arg4: memref<3x3x16x16xf32, #tpu.memory_space<vmem>>, %arg5: memref<1x16xf32, #tpu.memory_space<vmem>>, %arg6: memref<1x16x16x16xf32, #tpu.memory_space<vmem>>, %arg7: memref<18x18x16xf32, #tpu.memory_space<vmem>>) attributes {dimension_semantics = [#tpu.dimension_semantics<parallel>], iteration_bounds = array<i64: 2>, scalar_prefetch = 0 : i64, scratch_operands = 1 : i64, tpu.core_type = #tpu.core_type<tc>, window_params = [{transform_indices = @transform_0, window_bounds = array<i64: 1, 18, 18, 16>}, {pipeline_mode = #tpu.pipeline_mode<synchronous>, transform_indices = @transform_1, window_bounds = array<i64: 3, 3, 16, 16>}, {pipeline_mode = #tpu.pipeline_mode<synchronous>, transform_indices = @transform_2, window_bounds = array<i64: 1, 16>}, {pipeline_mode = #tpu.pipeline_mode<synchronous>, transform_indices = @transform_3, window_bounds = array<i64: 3, 3, 16, 16>}, {pipeline_mode = #tpu.pipeline_mode<synchronous>, transform_indices = @transform_4, window_bounds = array<i64: 1, 16>}, {transform_indices = @transform_5, window_bounds = array<i64: 1, 16, 16, 16>}]} {
    %c0 = arith.constant 0 : index
    %c0_0 = arith.constant 0 : index
    %c0_1 = arith.constant 0 : index
    %c0_2 = arith.constant 0 : index
    %0 = vector.load %arg2[%c0, %c0_0, %c0_1, %c0_2] : memref<3x3x16x16xf32, #tpu.memory_space<vmem>>, vector<3x3x16x16xf32>
    %c0_3 = arith.constant 0 : index
    %c0_4 = arith.constant 0 : index
    %c0_5 = arith.constant 0 : index
    %c0_6 = arith.constant 0 : index
    %1 = vector.load %arg4[%c0_3, %c0_4, %c0_5, %c0_6] : memref<3x3x16x16xf32, #tpu.memory_space<vmem>>, vector<3x3x16x16xf32>
    %c0_7 = arith.constant 0 : index
    %c0_8 = arith.constant 0 : index
    %2 = vector.load %arg3[%c0_7, %c0_8] : memref<1x16xf32, #tpu.memory_space<vmem>>, vector<1x16xf32>
    %c0_9 = arith.constant 0 : index
    %c0_10 = arith.constant 0 : index
    %3 = vector.load %arg5[%c0_9, %c0_10] : memref<1x16xf32, #tpu.memory_space<vmem>>, vector<1x16xf32>
    %cst = arith.constant 0.000000e+00 : f32
    %4 = vector.broadcast %cst : f32 to vector<256x16xf32>
    %c0_11 = arith.constant 0 : index
    %c0_12 = arith.constant 0 : index
    %c0_13 = arith.constant 0 : index
    %c0_14 = arith.constant 0 : index
    %5 = vector.load %arg1[%c0_11, %c0_12, %c0_13, %c0_14] : memref<1x18x18x16xf32, #tpu.memory_space<vmem>>, vector<1x16x16x16xf32>
    %6 = vector.shape_cast %5 : vector<1x16x16x16xf32> to vector<16x16x16xf32>
    %7 = vector.shape_cast %6 : vector<16x16x16xf32> to vector<256x16xf32>
    %8 = vector.extract_strided_slice %0 {offsets = [0, 0, 0, 0], sizes = [1, 1, 16, 16], strides = [1, 1, 1, 1]} : vector<3x3x16x16xf32> to vector<1x1x16x16xf32>
    %9 = vector.shape_cast %8 : vector<1x1x16x16xf32> to vector<16x16xf32>
    %cst_15 = arith.constant dense<0.000000e+00> : vector<256x16xf32>
    %10 = tpu.matmul %7, %9, %cst_15 {dimension_numbers = #tpu.dot_dimension_numbers<[1], [0], [0], [1], [0, 0, 1, 1], [], []>} : vector<256x16xf32>, vector<16x16xf32>, vector<256x16xf32> -> vector<256x16xf32>
    %11 = arith.addf %4, %10 : vector<256x16xf32>
    %c0_16 = arith.constant 0 : index
    %c0_17 = arith.constant 0 : index
    %c1 = arith.constant 1 : index
    %c0_18 = arith.constant 0 : index
    %12 = vector.load %arg1[%c0_16, %c0_17, %c1, %c0_18] : memref<1x18x18x16xf32, #tpu.memory_space<vmem>>, vector<1x16x16x16xf32>
    %13 = vector.shape_cast %12 : vector<1x16x16x16xf32> to vector<16x16x16xf32>
    %14 = vector.shape_cast %13 : vector<16x16x16xf32> to vector<256x16xf32>
    %15 = vector.extract_strided_slice %0 {offsets = [0, 1, 0, 0], sizes = [1, 1, 16, 16], strides = [1, 1, 1, 1]} : vector<3x3x16x16xf32> to vector<1x1x16x16xf32>
    %16 = vector.shape_cast %15 : vector<1x1x16x16xf32> to vector<16x16xf32>
    %cst_19 = arith.constant dense<0.000000e+00> : vector<256x16xf32>
    %17 = tpu.matmul %14, %16, %cst_19 {dimension_numbers = #tpu.dot_dimension_numbers<[1], [0], [0], [1], [0, 0, 1, 1], [], []>} : vector<256x16xf32>, vector<16x16xf32>, vector<256x16xf32> -> vector<256x16xf32>
    %18 = arith.addf %11, %17 : vector<256x16xf32>
    %c0_20 = arith.constant 0 : index
    %c0_21 = arith.constant 0 : index
    %c2 = arith.constant 2 : index
    %c0_22 = arith.constant 0 : index
    %19 = vector.load %arg1[%c0_20, %c0_21, %c2, %c0_22] : memref<1x18x18x16xf32, #tpu.memory_space<vmem>>, vector<1x16x16x16xf32>
    %20 = vector.shape_cast %19 : vector<1x16x16x16xf32> to vector<16x16x16xf32>
    %21 = vector.shape_cast %20 : vector<16x16x16xf32> to vector<256x16xf32>
    %22 = vector.extract_strided_slice %0 {offsets = [0, 2, 0, 0], sizes = [1, 1, 16, 16], strides = [1, 1, 1, 1]} : vector<3x3x16x16xf32> to vector<1x1x16x16xf32>
    %23 = vector.shape_cast %22 : vector<1x1x16x16xf32> to vector<16x16xf32>
    %cst_23 = arith.constant dense<0.000000e+00> : vector<256x16xf32>
    %24 = tpu.matmul %21, %23, %cst_23 {dimension_numbers = #tpu.dot_dimension_numbers<[1], [0], [0], [1], [0, 0, 1, 1], [], []>} : vector<256x16xf32>, vector<16x16xf32>, vector<256x16xf32> -> vector<256x16xf32>
    %25 = arith.addf %18, %24 : vector<256x16xf32>
    %c0_24 = arith.constant 0 : index
    %c1_25 = arith.constant 1 : index
    %c0_26 = arith.constant 0 : index
    %c0_27 = arith.constant 0 : index
    %26 = vector.load %arg1[%c0_24, %c1_25, %c0_26, %c0_27] : memref<1x18x18x16xf32, #tpu.memory_space<vmem>>, vector<1x16x16x16xf32>
    %27 = vector.shape_cast %26 : vector<1x16x16x16xf32> to vector<16x16x16xf32>
    %28 = vector.shape_cast %27 : vector<16x16x16xf32> to vector<256x16xf32>
    %29 = vector.extract_strided_slice %0 {offsets = [1, 0, 0, 0], sizes = [1, 1, 16, 16], strides = [1, 1, 1, 1]} : vector<3x3x16x16xf32> to vector<1x1x16x16xf32>
    %30 = vector.shape_cast %29 : vector<1x1x16x16xf32> to vector<16x16xf32>
    %cst_28 = arith.constant dense<0.000000e+00> : vector<256x16xf32>
    %31 = tpu.matmul %28, %30, %cst_28 {dimension_numbers = #tpu.dot_dimension_numbers<[1], [0], [0], [1], [0, 0, 1, 1], [], []>} : vector<256x16xf32>, vector<16x16xf32>, vector<256x16xf32> -> vector<256x16xf32>
    %32 = arith.addf %25, %31 : vector<256x16xf32>
    %c0_29 = arith.constant 0 : index
    %c1_30 = arith.constant 1 : index
    %c1_31 = arith.constant 1 : index
    %c0_32 = arith.constant 0 : index
    %33 = vector.load %arg1[%c0_29, %c1_30, %c1_31, %c0_32] : memref<1x18x18x16xf32, #tpu.memory_space<vmem>>, vector<1x16x16x16xf32>
    %34 = vector.shape_cast %33 : vector<1x16x16x16xf32> to vector<16x16x16xf32>
    %35 = vector.shape_cast %34 : vector<16x16x16xf32> to vector<256x16xf32>
    %36 = vector.extract_strided_slice %0 {offsets = [1, 1, 0, 0], sizes = [1, 1, 16, 16], strides = [1, 1, 1, 1]} : vector<3x3x16x16xf32> to vector<1x1x16x16xf32>
    %37 = vector.shape_cast %36 : vector<1x1x16x16xf32> to vector<16x16xf32>
    %cst_33 = arith.constant dense<0.000000e+00> : vector<256x16xf32>
    %38 = tpu.matmul %35, %37, %cst_33 {dimension_numbers = #tpu.dot_dimension_numbers<[1], [0], [0], [1], [0, 0, 1, 1], [], []>} : vector<256x16xf32>, vector<16x16xf32>, vector<256x16xf32> -> vector<256x16xf32>
    %39 = arith.addf %32, %38 : vector<256x16xf32>
    %c0_34 = arith.constant 0 : index
    %c1_35 = arith.constant 1 : index
    %c2_36 = arith.constant 2 : index
    %c0_37 = arith.constant 0 : index
    %40 = vector.load %arg1[%c0_34, %c1_35, %c2_36, %c0_37] : memref<1x18x18x16xf32, #tpu.memory_space<vmem>>, vector<1x16x16x16xf32>
    %41 = vector.shape_cast %40 : vector<1x16x16x16xf32> to vector<16x16x16xf32>
    %42 = vector.shape_cast %41 : vector<16x16x16xf32> to vector<256x16xf32>
    %43 = vector.extract_strided_slice %0 {offsets = [1, 2, 0, 0], sizes = [1, 1, 16, 16], strides = [1, 1, 1, 1]} : vector<3x3x16x16xf32> to vector<1x1x16x16xf32>
    %44 = vector.shape_cast %43 : vector<1x1x16x16xf32> to vector<16x16xf32>
    %cst_38 = arith.constant dense<0.000000e+00> : vector<256x16xf32>
    %45 = tpu.matmul %42, %44, %cst_38 {dimension_numbers = #tpu.dot_dimension_numbers<[1], [0], [0], [1], [0, 0, 1, 1], [], []>} : vector<256x16xf32>, vector<16x16xf32>, vector<256x16xf32> -> vector<256x16xf32>
    %46 = arith.addf %39, %45 : vector<256x16xf32>
    %c0_39 = arith.constant 0 : index
    %c2_40 = arith.constant 2 : index
    %c0_41 = arith.constant 0 : index
    %c0_42 = arith.constant 0 : index
    %47 = vector.load %arg1[%c0_39, %c2_40, %c0_41, %c0_42] : memref<1x18x18x16xf32, #tpu.memory_space<vmem>>, vector<1x16x16x16xf32>
    %48 = vector.shape_cast %47 : vector<1x16x16x16xf32> to vector<16x16x16xf32>
    %49 = vector.shape_cast %48 : vector<16x16x16xf32> to vector<256x16xf32>
    %50 = vector.extract_strided_slice %0 {offsets = [2, 0, 0, 0], sizes = [1, 1, 16, 16], strides = [1, 1, 1, 1]} : vector<3x3x16x16xf32> to vector<1x1x16x16xf32>
    %51 = vector.shape_cast %50 : vector<1x1x16x16xf32> to vector<16x16xf32>
    %cst_43 = arith.constant dense<0.000000e+00> : vector<256x16xf32>
    %52 = tpu.matmul %49, %51, %cst_43 {dimension_numbers = #tpu.dot_dimension_numbers<[1], [0], [0], [1], [0, 0, 1, 1], [], []>} : vector<256x16xf32>, vector<16x16xf32>, vector<256x16xf32> -> vector<256x16xf32>
    %53 = arith.addf %46, %52 : vector<256x16xf32>
    %c0_44 = arith.constant 0 : index
    %c2_45 = arith.constant 2 : index
    %c1_46 = arith.constant 1 : index
    %c0_47 = arith.constant 0 : index
    %54 = vector.load %arg1[%c0_44, %c2_45, %c1_46, %c0_47] : memref<1x18x18x16xf32, #tpu.memory_space<vmem>>, vector<1x16x16x16xf32>
    %55 = vector.shape_cast %54 : vector<1x16x16x16xf32> to vector<16x16x16xf32>
    %56 = vector.shape_cast %55 : vector<16x16x16xf32> to vector<256x16xf32>
    %57 = vector.extract_strided_slice %0 {offsets = [2, 1, 0, 0], sizes = [1, 1, 16, 16], strides = [1, 1, 1, 1]} : vector<3x3x16x16xf32> to vector<1x1x16x16xf32>
    %58 = vector.shape_cast %57 : vector<1x1x16x16xf32> to vector<16x16xf32>
    %cst_48 = arith.constant dense<0.000000e+00> : vector<256x16xf32>
    %59 = tpu.matmul %56, %58, %cst_48 {dimension_numbers = #tpu.dot_dimension_numbers<[1], [0], [0], [1], [0, 0, 1, 1], [], []>} : vector<256x16xf32>, vector<16x16xf32>, vector<256x16xf32> -> vector<256x16xf32>
    %60 = arith.addf %53, %59 : vector<256x16xf32>
    %c0_49 = arith.constant 0 : index
    %c2_50 = arith.constant 2 : index
    %c2_51 = arith.constant 2 : index
    %c0_52 = arith.constant 0 : index
    %61 = vector.load %arg1[%c0_49, %c2_50, %c2_51, %c0_52] : memref<1x18x18x16xf32, #tpu.memory_space<vmem>>, vector<1x16x16x16xf32>
    %62 = vector.shape_cast %61 : vector<1x16x16x16xf32> to vector<16x16x16xf32>
    %63 = vector.shape_cast %62 : vector<16x16x16xf32> to vector<256x16xf32>
    %64 = vector.extract_strided_slice %0 {offsets = [2, 2, 0, 0], sizes = [1, 1, 16, 16], strides = [1, 1, 1, 1]} : vector<3x3x16x16xf32> to vector<1x1x16x16xf32>
    %65 = vector.shape_cast %64 : vector<1x1x16x16xf32> to vector<16x16xf32>
    %cst_53 = arith.constant dense<0.000000e+00> : vector<256x16xf32>
    %66 = tpu.matmul %63, %65, %cst_53 {dimension_numbers = #tpu.dot_dimension_numbers<[1], [0], [0], [1], [0, 0, 1, 1], [], []>} : vector<256x16xf32>, vector<16x16xf32>, vector<256x16xf32> -> vector<256x16xf32>
    %67 = arith.addf %60, %66 : vector<256x16xf32>
    %68 = vector.broadcast %2 : vector<1x16xf32> to vector<256x16xf32>
    %69 = arith.addf %67, %68 : vector<256x16xf32>
    %cst_54 = arith.constant 0.000000e+00 : f32
    %70 = vector.broadcast %cst_54 : f32 to vector<256x16xf32>
    %71 = arith.subf %70, %69 : vector<256x16xf32>
    %72 = math.exp %71 : vector<256x16xf32>
    %cst_55 = arith.constant 1.000000e+00 : f32
    %73 = vector.broadcast %cst_55 : f32 to vector<256x16xf32>
    %74 = arith.addf %73, %72 : vector<256x16xf32>
    %cst_56 = arith.constant 1.000000e+00 : f32
    %75 = vector.broadcast %cst_56 : f32 to vector<256x16xf32>
    %76 = arith.divf %75, %74 : vector<256x16xf32>
    %77 = arith.mulf %69, %76 : vector<256x16xf32>
    %cst_57 = arith.constant 0.000000e+00 : f32
    %78 = vector.broadcast %cst_57 : f32 to vector<18x18x16xf32>
    %c0_58 = arith.constant 0 : index
    %c0_59 = arith.constant 0 : index
    %c0_60 = arith.constant 0 : index
    %79 = vector.load %arg7[%c0_58, %c0_59, %c0_60] : memref<18x18x16xf32, #tpu.memory_space<vmem>>, vector<18x18x16xf32>
    tpu.vector_store %arg7[%c0_58, %c0_59, %c0_60], %78 {strides = array<i32>} : memref<18x18x16xf32, #tpu.memory_space<vmem>>, vector<18x18x16xf32>,
    %80 = vector.shape_cast %77 : vector<256x16xf32> to vector<16x16x16xf32>
    %c1_61 = arith.constant 1 : index
    %c1_62 = arith.constant 1 : index
    %c0_63 = arith.constant 0 : index
    %81 = vector.load %arg7[%c1_61, %c1_62, %c0_63] : memref<18x18x16xf32, #tpu.memory_space<vmem>>, vector<16x16x16xf32>
    tpu.vector_store %arg7[%c1_61, %c1_62, %c0_63], %80 {strides = array<i32>} : memref<18x18x16xf32, #tpu.memory_space<vmem>>, vector<16x16x16xf32>,
    %cst_64 = arith.constant 0.000000e+00 : f32
    %82 = vector.broadcast %cst_64 : f32 to vector<256x16xf32>
    %c0_65 = arith.constant 0 : index
    %c0_66 = arith.constant 0 : index
    %c0_67 = arith.constant 0 : index
    %83 = vector.load %arg7[%c0_65, %c0_66, %c0_67] : memref<18x18x16xf32, #tpu.memory_space<vmem>>, vector<16x16x16xf32>
    %84 = vector.shape_cast %83 : vector<16x16x16xf32> to vector<256x16xf32>
    %85 = vector.extract_strided_slice %1 {offsets = [0, 0, 0, 0], sizes = [1, 1, 16, 16], strides = [1, 1, 1, 1]} : vector<3x3x16x16xf32> to vector<1x1x16x16xf32>
    %86 = vector.shape_cast %85 : vector<1x1x16x16xf32> to vector<16x16xf32>
    %cst_68 = arith.constant dense<0.000000e+00> : vector<256x16xf32>
    %87 = tpu.matmul %84, %86, %cst_68 {dimension_numbers = #tpu.dot_dimension_numbers<[1], [0], [0], [1], [0, 0, 1, 1], [], []>} : vector<256x16xf32>, vector<16x16xf32>, vector<256x16xf32> -> vector<256x16xf32>
    %88 = arith.addf %82, %87 : vector<256x16xf32>
    %c0_69 = arith.constant 0 : index
    %c1_70 = arith.constant 1 : index
    %c0_71 = arith.constant 0 : index
    %89 = vector.load %arg7[%c0_69, %c1_70, %c0_71] : memref<18x18x16xf32, #tpu.memory_space<vmem>>, vector<16x16x16xf32>
    %90 = vector.shape_cast %89 : vector<16x16x16xf32> to vector<256x16xf32>
    %91 = vector.extract_strided_slice %1 {offsets = [0, 1, 0, 0], sizes = [1, 1, 16, 16], strides = [1, 1, 1, 1]} : vector<3x3x16x16xf32> to vector<1x1x16x16xf32>
    %92 = vector.shape_cast %91 : vector<1x1x16x16xf32> to vector<16x16xf32>
    %cst_72 = arith.constant dense<0.000000e+00> : vector<256x16xf32>
    %93 = tpu.matmul %90, %92, %cst_72 {dimension_numbers = #tpu.dot_dimension_numbers<[1], [0], [0], [1], [0, 0, 1, 1], [], []>} : vector<256x16xf32>, vector<16x16xf32>, vector<256x16xf32> -> vector<256x16xf32>
    %94 = arith.addf %88, %93 : vector<256x16xf32>
    %c0_73 = arith.constant 0 : index
    %c2_74 = arith.constant 2 : index
    %c0_75 = arith.constant 0 : index
    %95 = vector.load %arg7[%c0_73, %c2_74, %c0_75] : memref<18x18x16xf32, #tpu.memory_space<vmem>>, vector<16x16x16xf32>
    %96 = vector.shape_cast %95 : vector<16x16x16xf32> to vector<256x16xf32>
    %97 = vector.extract_strided_slice %1 {offsets = [0, 2, 0, 0], sizes = [1, 1, 16, 16], strides = [1, 1, 1, 1]} : vector<3x3x16x16xf32> to vector<1x1x16x16xf32>
    %98 = vector.shape_cast %97 : vector<1x1x16x16xf32> to vector<16x16xf32>
    %cst_76 = arith.constant dense<0.000000e+00> : vector<256x16xf32>
    %99 = tpu.matmul %96, %98, %cst_76 {dimension_numbers = #tpu.dot_dimension_numbers<[1], [0], [0], [1], [0, 0, 1, 1], [], []>} : vector<256x16xf32>, vector<16x16xf32>, vector<256x16xf32> -> vector<256x16xf32>
    %100 = arith.addf %94, %99 : vector<256x16xf32>
    %c1_77 = arith.constant 1 : index
    %c0_78 = arith.constant 0 : index
    %c0_79 = arith.constant 0 : index
    %101 = vector.load %arg7[%c1_77, %c0_78, %c0_79] : memref<18x18x16xf32, #tpu.memory_space<vmem>>, vector<16x16x16xf32>
    %102 = vector.shape_cast %101 : vector<16x16x16xf32> to vector<256x16xf32>
    %103 = vector.extract_strided_slice %1 {offsets = [1, 0, 0, 0], sizes = [1, 1, 16, 16], strides = [1, 1, 1, 1]} : vector<3x3x16x16xf32> to vector<1x1x16x16xf32>
    %104 = vector.shape_cast %103 : vector<1x1x16x16xf32> to vector<16x16xf32>
    %cst_80 = arith.constant dense<0.000000e+00> : vector<256x16xf32>
    %105 = tpu.matmul %102, %104, %cst_80 {dimension_numbers = #tpu.dot_dimension_numbers<[1], [0], [0], [1], [0, 0, 1, 1], [], []>} : vector<256x16xf32>, vector<16x16xf32>, vector<256x16xf32> -> vector<256x16xf32>
    %106 = arith.addf %100, %105 : vector<256x16xf32>
    %c1_81 = arith.constant 1 : index
    %c1_82 = arith.constant 1 : index
    %c0_83 = arith.constant 0 : index
    %107 = vector.load %arg7[%c1_81, %c1_82, %c0_83] : memref<18x18x16xf32, #tpu.memory_space<vmem>>, vector<16x16x16xf32>
    %108 = vector.shape_cast %107 : vector<16x16x16xf32> to vector<256x16xf32>
    %109 = vector.extract_strided_slice %1 {offsets = [1, 1, 0, 0], sizes = [1, 1, 16, 16], strides = [1, 1, 1, 1]} : vector<3x3x16x16xf32> to vector<1x1x16x16xf32>
    %110 = vector.shape_cast %109 : vector<1x1x16x16xf32> to vector<16x16xf32>
    %cst_84 = arith.constant dense<0.000000e+00> : vector<256x16xf32>
    %111 = tpu.matmul %108, %110, %cst_84 {dimension_numbers = #tpu.dot_dimension_numbers<[1], [0], [0], [1], [0, 0, 1, 1], [], []>} : vector<256x16xf32>, vector<16x16xf32>, vector<256x16xf32> -> vector<256x16xf32>
    %112 = arith.addf %106, %111 : vector<256x16xf32>
    %c1_85 = arith.constant 1 : index
    %c2_86 = arith.constant 2 : index
    %c0_87 = arith.constant 0 : index
    %113 = vector.load %arg7[%c1_85, %c2_86, %c0_87] : memref<18x18x16xf32, #tpu.memory_space<vmem>>, vector<16x16x16xf32>
    %114 = vector.shape_cast %113 : vector<16x16x16xf32> to vector<256x16xf32>
    %115 = vector.extract_strided_slice %1 {offsets = [1, 2, 0, 0], sizes = [1, 1, 16, 16], strides = [1, 1, 1, 1]} : vector<3x3x16x16xf32> to vector<1x1x16x16xf32>
    %116 = vector.shape_cast %115 : vector<1x1x16x16xf32> to vector<16x16xf32>
    %cst_88 = arith.constant dense<0.000000e+00> : vector<256x16xf32>
    %117 = tpu.matmul %114, %116, %cst_88 {dimension_numbers = #tpu.dot_dimension_numbers<[1], [0], [0], [1], [0, 0, 1, 1], [], []>} : vector<256x16xf32>, vector<16x16xf32>, vector<256x16xf32> -> vector<256x16xf32>
    %118 = arith.addf %112, %117 : vector<256x16xf32>
    %c2_89 = arith.constant 2 : index
    %c0_90 = arith.constant 0 : index
    %c0_91 = arith.constant 0 : index
    %119 = vector.load %arg7[%c2_89, %c0_90, %c0_91] : memref<18x18x16xf32, #tpu.memory_space<vmem>>, vector<16x16x16xf32>
    %120 = vector.shape_cast %119 : vector<16x16x16xf32> to vector<256x16xf32>
    %121 = vector.extract_strided_slice %1 {offsets = [2, 0, 0, 0], sizes = [1, 1, 16, 16], strides = [1, 1, 1, 1]} : vector<3x3x16x16xf32> to vector<1x1x16x16xf32>
    %122 = vector.shape_cast %121 : vector<1x1x16x16xf32> to vector<16x16xf32>
    %cst_92 = arith.constant dense<0.000000e+00> : vector<256x16xf32>
    %123 = tpu.matmul %120, %122, %cst_92 {dimension_numbers = #tpu.dot_dimension_numbers<[1], [0], [0], [1], [0, 0, 1, 1], [], []>} : vector<256x16xf32>, vector<16x16xf32>, vector<256x16xf32> -> vector<256x16xf32>
    %124 = arith.addf %118, %123 : vector<256x16xf32>
    %c2_93 = arith.constant 2 : index
    %c1_94 = arith.constant 1 : index
    %c0_95 = arith.constant 0 : index
    %125 = vector.load %arg7[%c2_93, %c1_94, %c0_95] : memref<18x18x16xf32, #tpu.memory_space<vmem>>, vector<16x16x16xf32>
    %126 = vector.shape_cast %125 : vector<16x16x16xf32> to vector<256x16xf32>
    %127 = vector.extract_strided_slice %1 {offsets = [2, 1, 0, 0], sizes = [1, 1, 16, 16], strides = [1, 1, 1, 1]} : vector<3x3x16x16xf32> to vector<1x1x16x16xf32>
    %128 = vector.shape_cast %127 : vector<1x1x16x16xf32> to vector<16x16xf32>
    %cst_96 = arith.constant dense<0.000000e+00> : vector<256x16xf32>
    %129 = tpu.matmul %126, %128, %cst_96 {dimension_numbers = #tpu.dot_dimension_numbers<[1], [0], [0], [1], [0, 0, 1, 1], [], []>} : vector<256x16xf32>, vector<16x16xf32>, vector<256x16xf32> -> vector<256x16xf32>
    %130 = arith.addf %124, %129 : vector<256x16xf32>
    %c2_97 = arith.constant 2 : index
    %c2_98 = arith.constant 2 : index
    %c0_99 = arith.constant 0 : index
    %131 = vector.load %arg7[%c2_97, %c2_98, %c0_99] : memref<18x18x16xf32, #tpu.memory_space<vmem>>, vector<16x16x16xf32>
    %132 = vector.shape_cast %131 : vector<16x16x16xf32> to vector<256x16xf32>
    %133 = vector.extract_strided_slice %1 {offsets = [2, 2, 0, 0], sizes = [1, 1, 16, 16], strides = [1, 1, 1, 1]} : vector<3x3x16x16xf32> to vector<1x1x16x16xf32>
    %134 = vector.shape_cast %133 : vector<1x1x16x16xf32> to vector<16x16xf32>
    %cst_100 = arith.constant dense<0.000000e+00> : vector<256x16xf32>
    %135 = tpu.matmul %132, %134, %cst_100 {dimension_numbers = #tpu.dot_dimension_numbers<[1], [0], [0], [1], [0, 0, 1, 1], [], []>} : vector<256x16xf32>, vector<16x16xf32>, vector<256x16xf32> -> vector<256x16xf32>
    %136 = arith.addf %130, %135 : vector<256x16xf32>
    %c0_101 = arith.constant 0 : index
    %c1_102 = arith.constant 1 : index
    %c1_103 = arith.constant 1 : index
    %c0_104 = arith.constant 0 : index
    %137 = vector.load %arg1[%c0_101, %c1_102, %c1_103, %c0_104] : memref<1x18x18x16xf32, #tpu.memory_space<vmem>>, vector<1x16x16x16xf32>
    %138 = vector.shape_cast %137 : vector<1x16x16x16xf32> to vector<16x16x16xf32>
    %139 = vector.shape_cast %138 : vector<16x16x16xf32> to vector<256x16xf32>
    %140 = vector.broadcast %3 : vector<1x16xf32> to vector<256x16xf32>
    %141 = arith.addf %136, %140 : vector<256x16xf32>
    %142 = arith.addf %141, %139 : vector<256x16xf32>
    %cst_105 = arith.constant 0.000000e+00 : f32
    %143 = vector.broadcast %cst_105 : f32 to vector<256x16xf32>
    %144 = arith.subf %143, %142 : vector<256x16xf32>
    %145 = math.exp %144 : vector<256x16xf32>
    %cst_106 = arith.constant 1.000000e+00 : f32
    %146 = vector.broadcast %cst_106 : f32 to vector<256x16xf32>
    %147 = arith.addf %146, %145 : vector<256x16xf32>
    %cst_107 = arith.constant 1.000000e+00 : f32
    %148 = vector.broadcast %cst_107 : f32 to vector<256x16xf32>
    %149 = arith.divf %148, %147 : vector<256x16xf32>
    %150 = arith.mulf %142, %149 : vector<256x16xf32>
    %151 = vector.shape_cast %150 : vector<256x16xf32> to vector<16x16x16xf32>
    %c0_108 = arith.constant 0 : index
    %c0_109 = arith.constant 0 : index
    %c0_110 = arith.constant 0 : index
    %c0_111 = arith.constant 0 : index
    %152 = vector.load %arg6[%c0_108, %c0_109, %c0_110, %c0_111] : memref<1x16x16x16xf32, #tpu.memory_space<vmem>>, vector<1x16x16x16xf32>
    %153 = vector.shape_cast %152 : vector<1x16x16x16xf32> to vector<16x16x16xf32>
    %154 = vector.shape_cast %151 : vector<16x16x16xf32> to vector<1x16x16x16xf32>
    tpu.vector_store %arg6[%c0_108, %c0_109, %c0_110, %c0_111], %154 {strides = array<i32>} : memref<1x16x16x16xf32, #tpu.memory_space<vmem>>, vector<1x16x16x16xf32>,
    return
  }
  func.func @transform_0(%arg0: i32) -> (i32, i32, i32, i32) {
    %c0_i32 = arith.constant 0 : i32
    %c0_i32_0 = arith.constant 0 : i32
    %c0_i32_1 = arith.constant 0 : i32
    %c0_i32_2 = arith.constant 0 : i32
    return %arg0, %c0_i32, %c0_i32_0, %c0_i32_1 : i32, i32, i32, i32
  }
  func.func @transform_1(%arg0: i32) -> (i32, i32, i32, i32) {
    %c0_i32 = arith.constant 0 : i32
    %c0_i32_0 = arith.constant 0 : i32
    %c0_i32_1 = arith.constant 0 : i32
    %c0_i32_2 = arith.constant 0 : i32
    %c0_i32_3 = arith.constant 0 : i32
    return %c0_i32, %c0_i32_0, %c0_i32_1, %c0_i32_2 : i32, i32, i32, i32
  }
  func.func @transform_2(%arg0: i32) -> (i32, i32) {
    %c0_i32 = arith.constant 0 : i32
    %c0_i32_0 = arith.constant 0 : i32
    %c0_i32_1 = arith.constant 0 : i32
    return %c0_i32, %c0_i32_0 : i32, i32
  }
  func.func @transform_3(%arg0: i32) -> (i32, i32, i32, i32) {
    %c0_i32 = arith.constant 0 : i32
    %c0_i32_0 = arith.constant 0 : i32
    %c0_i32_1 = arith.constant 0 : i32
    %c0_i32_2 = arith.constant 0 : i32
    %c0_i32_3 = arith.constant 0 : i32
    return %c0_i32, %c0_i32_0, %c0_i32_1, %c0_i32_2 : i32, i32, i32, i32
  }
  func.func @transform_4(%arg0: i32) -> (i32, i32) {
    %c0_i32 = arith.constant 0 : i32
    %c0_i32_0 = arith.constant 0 : i32
    %c0_i32_1 = arith.constant 0 : i32
    return %c0_i32, %c0_i32_0 : i32, i32
  }
  func.func @transform_5(%arg0: i32) -> (i32, i32, i32, i32) {
    %c0_i32 = arith.constant 0 : i32
    %c0_i32_0 = arith.constant 0 : i32
    %c0_i32_1 = arith.constant 0 : i32
    %c0_i32_2 = arith.constant 0 : i32
    return %arg0, %c0_i32, %c0_i32_0, %c0_i32_1 : i32, i32, i32, i32
  }
}

</mosaic_0001>

<bundles_post_ra>
// kernel: basic_block.1
= control target key start
LH: loop header
LB: loop body
LE: loop exit
PB: predicated region body
PF: predicated region fallthrough
CT: control target
= control target key end

     0   :  { %s11082_s18 = smov 0   ;;  %s13367_s0 = inlined_call_operand.vmem [shape: f32[2,18,18,16], index: 0, kind: input, shape index: {}]   ;;  %s13368_s1 = inlined_call_operand.vmem [shape: f32[3,3,16,16], index: 1, kind: input, shape index: {}]   ;;  %s13369_s2 = inlined_call_operand.vmem [shape: f32[1,16], index: 2, kind: input, shape index: {}]   ;;  %s13370_s3 = inlined_call_operand.vmem [shape: f32[3,3,16,16], index: 3, kind: input, shape index: {}]   ;;  %s13371_s4 = inlined_call_operand.vmem [shape: f32[1,16], index: 4, kind: input, shape index: {}]   ;;  %s13372_s5 = inlined_call_operand.vmem [shape: f32[2,16,16,16], index: 5, kind: output, shape index: {}]  }
   0x1 LB: > { %s7832_s19 = sadd.s32 4294967295, %s11049_s18   ;;  %p7836_p0 = scmp.ge.s32.totalorder %s11049_s18, 1  ;;  %s11049_s18 = sphi %s11082_s18, %s15_s18  }
   0x2   : > { %p187_p1 = scmp.lt.s32.totalorder %s11049_s18, 3 }
   0x4   : > { %p188_p2 = pnand %p7836_p0, %p187_p1 }
   0x6   : > { %191 = sbr.rel (%p188_p2) target bundleno = 1609 (0x649), region = 40 }
   0xd   : > { %v227_v0 = vld [vmem:[%s13368_s1 + $0x10] sm:$0xff]  ;;  %v228_v1 = vld [vmem:[%s13368_s1 + $0x18] sm:$0xff]  ;;  %p215_p3 = scmp.lt.s32.totalorder %s7832_s19, 1  ;;  %v225_v2 = vld [vmem:[%s13368_s1] sm:$0xff]  ;;  %vm327_vm0 = vcmask 130048   ;;  %vm3931_vm1 = vcmask 123904  }
   0xe   : > { %v10193_v3 = vpack.c.bf16 %v228_v1, %v227_v0  ;;  %v226_v4 = vld [vmem:[%s13368_s1 + $0x8] sm:$0xff]  ;;  %v229_v6 = vld [vmem:[%s13368_s1 + $0x20] sm:$0xff]  ;;  %v231_v42 = vld [vmem:[%s13368_s1 + $0x30] sm:$0xff] }
   0xf   : > { %s13688_s19 = smov (!%p215_p3, %s7832_s19), 1  ;;  %v10197_v5 = vpack.c.bf16 %v226_v4, %v225_v2  ;;  %v230_v7 = vld [vmem:[%s13368_s1 + $0x28] sm:$0xff]  ;;  %v232_v43 = vld [vmem:[%s13368_s1 + $0x38] sm:$0xff] }
  0x10   : > { %10194 = vmatprep.subr.bf16.mxu0 %v10193_v3  ;;  %s10777_s28 = smul.u32 432, %s13688_s19  ;;  %v11121_v11 = vpack.c.bf16 %v230_v7, %v229_v6  ;;  %v11285_v46 = vpack.c.bf16 %v232_v43, %v231_v42  ;;  %v233_v43 = vld [vmem:[%s13368_s1 + $0x40] sm:$0xff]  ;;  %s8644_s8 = sshll.u32 %s13688_s19, 8 }
  0x11   : > { %10196 = vmatpush3.bf16.msra.mxu0 %v10193_v3  ;;  %s13182_s11 = scalar_lea.vmem %s13372_s5, %s8644_s8 }
  0x12   : > { %10198 = vmatprep.subr.bf16.mxu0 %v10197_v5  ;;  %s11114_s10 = scalar_lea.vmem %s13367_s0, %s10777_s28 }
  0x13   : > { %v295_v8 = vld [vmem:[%s11114_s10 + $0x1] sm:$0xff]  ;;  %v296_v9 = vld [vmem:[%s11114_s10 + $0x9] sm:$0xff]  ;;  %v11119_v10 = vld [vmem:[%s11114_s10 + $0x19] sm:$0xff] }
  0x14   : > { %9261 = vmatprep.mubr.msk.f32.mxu0 %vm327_vm0, %v295_v8  ;;  %v11128_v12 = vld [vmem:[%s11114_s10 + $0x21] sm:$0xff]  ;;  %v11131_v13 = vld [vmem:[%s11114_s10 + $0x31] sm:$0xff]  ;;  %v11139_v14 = vld [vmem:[%s11114_s10 + $0x39] sm:$0xff] }
  0x15   : > { %9262 = vmatmul.mubr.msk.f32.vlgmr.msra.gmra.mrb[0].mxu0 %vm327_vm0, %v296_v9  ;;  %v11142_v15 = vld [vmem:[%s11114_s10 + $0x49] sm:$0xff]  ;;  %v11149_v16 = vld [vmem:[%s11114_s10 + $0x51] sm:$0xff]  ;;  %v11152_v17 = vld [vmem:[%s11114_s10 + $0x61] sm:$0xff] }
  0x16   : > { %10200 = vmatpush3.bf16.msra.mxu0 %v10197_v5  ;;  %9264 = vmatprep.mubr.msk.f32.mxu0 %vm327_vm0, %v11119_v10  ;;  %v11159_v18 = vld [vmem:[%s11114_s10 + $0x69] sm:$0xff]  ;;  %v11162_v19 = vld [vmem:[%s11114_s10 + $0x79] sm:$0xff]  ;;  %v11169_v20 = vld [vmem:[%s11114_s10 + $0x81] sm:$0xff] }
  0x17   : > { %10202 = vmatprep.subr.bf16.mxu0 %v11121_v11  ;;  %v11172_v21 = vld [vmem:[%s11114_s10 + $0x91] sm:$0xff]  ;;  %v11179_v22 = vld [vmem:[%s11114_s10 + $0x99] sm:$0xff]  ;;  %v11182_v23 = vld [vmem:[%s11114_s10 + $0xa9] sm:$0xff] }
  0x18   : > { %v11189_v24 = vld [vmem:[%s11114_s10 + $0xb1] sm:$0xff]  ;;  %v11192_v25 = vld [vmem:[%s11114_s10 + $0xc1] sm:$0xff]  ;;  %v11199_v26 = vld [vmem:[%s11114_s10 + $0xc9] sm:$0xff] }
  0x19   : > { %9265 = vmatmul.mubr.msk.f32.gmra.mrb[2].mxu0 %vm327_vm0, %v11128_v12  ;;  %v11202_v27 = vld [vmem:[%s11114_s10 + $0xd9] sm:$0xff]  ;;  %v11209_v28 = vld [vmem:[%s11114_s10 + $0xe1] sm:$0xff]  ;;  %v11212_v29 = vld [vmem:[%s11114_s10 + $0xf1] sm:$0xff] }
  0x1a   : > { %9267 = vmatprep.mubr.msk.f32.mxu0 %vm327_vm0, %v11131_v13  ;;  %v11219_v30 = vld [vmem:[%s11114_s10 + $0xf9] sm:$0xff]  ;;  %v11222_v31 = vld [vmem:[%s11114_s10 + $0x109] sm:$0xff]  ;;  %v11229_v32 = vld [vmem:[%s11114_s10 + $0x111] sm:$0xff] }
  0x1b   : > { %v11232_v33 = vld [vmem:[%s11114_s10 + $0x121] sm:$0xff]  ;;  %v11239_v34 = vld [vmem:[%s11114_s10 + $0x129] sm:$0xff]  ;;  %v11242_v35 = vld [vmem:[%s11114_s10 + $0x139] sm:$0xff] }
  0x1c   : > { %13502 = vst [vmem:[#allocation3_spill] sm:$0xff] %v11232_v33  ;;  %13503 = vst [vmem:[#allocation4_spill] sm:$0xff] %v11239_v34  ;;  %v11249_v36 = vld [vmem:[%s11114_s10 + $0x141] sm:$0xff]  ;;  %v11252_v37 = vld [vmem:[%s11114_s10 + $0x151] sm:$0xff] }
  0x1d   : > { %9268 = vmatmul.mubr.msk.f32.gmra.mrb[4].mxu0 %vm327_vm0, %v11139_v14  ;;  %13504 = vst [vmem:[#allocation5_spill] sm:$0xff] %v11242_v35  ;;  %13505 = vst [vmem:[#allocation6_spill] sm:$0xff] %v11249_v36  ;;  %v11259_v38 = vld [vmem:[%s11114_s10 + $0x159] sm:$0xff]  ;;  %v11262_v39 = vld [vmem:[%s11114_s10 + $0x169] sm:$0xff] }
  0x1e   : > { %9270 = vmatprep.mubr.msk.f32.mxu0 %vm327_vm0, %v11142_v15  ;;  %13506 = vst [vmem:[#allocation7_spill] sm:$0xff] %v11252_v37  ;;  %13507 = vst [vmem:[#allocation8_spill] sm:$0xff] %v11259_v38  ;;  %v11269_v40 = vld [vmem:[%s11114_s10 + $0x171] sm:$0xff]  ;;  %v263_v41 = vld [vmem:[%s11114_s10] sm:$0xff] }
  0x1f   : > { %13508 = vst [vmem:[#allocation9_spill] sm:$0xff] %v11262_v39  ;;  %13509 = vst [vmem:[#allocation10_spill] sm:$0xff] %v11269_v40  ;;  %v264_v44 = vld [vmem:[%s11114_s10 + $0x8] sm:$0xff]  ;;  %v11283_v45 = vld [vmem:[%s11114_s10 + $0x18] sm:$0xff] }
  0x20   : > { %v11292_v47 = vld [vmem:[%s11114_s10 + $0x20] sm:$0xff]  ;;  %v11295_v48 = vld [vmem:[%s11114_s10 + $0x30] sm:$0xff]  ;;  %v11303_v49 = vld [vmem:[%s11114_s10 + $0x38] sm:$0xff] }
  0x21   : > { %9271 = vmatmul.mubr.msk.f32.gmra.mrb[6].mxu0 %vm327_vm0, %v11149_v16  ;;  %v11306_v50 = vld [vmem:[%s11114_s10 + $0x48] sm:$0xff]  ;;  %v11313_v51 = vld [vmem:[%s11114_s10 + $0x50] sm:$0xff]  ;;  %v11316_v52 = vld [vmem:[%s11114_s10 + $0x60] sm:$0xff] }
  0x22   : > { %9273 = vmatprep.mubr.msk.f32.mxu0 %vm327_vm0, %v11152_v17  ;;  %v11323_v53 = vld [vmem:[%s11114_s10 + $0x68] sm:$0xff]  ;;  %v11326_v54 = vld [vmem:[%s11114_s10 + $0x78] sm:$0xff]  ;;  %v11333_v55 = vld [vmem:[%s11114_s10 + $0x80] sm:$0xff] }
  0x23   : > { %v11336_v56 = vld [vmem:[%s11114_s10 + $0x90] sm:$0xff]  ;;  %v11343_v57 = vld [vmem:[%s11114_s10 + $0x98] sm:$0xff]  ;;  %v11346_v58 = vld [vmem:[%s11114_s10 + $0xa8] sm:$0xff] }
  0x24   : > { %v11353_v59 = vld [vmem:[%s11114_s10 + $0xb0] sm:$0xff]  ;;  %v11356_v60 = vld [vmem:[%s11114_s10 + $0xc0] sm:$0xff]  ;;  %v11363_v61 = vld [vmem:[%s11114_s10 + $0xc8] sm:$0xff] }
  0x25   : > { %9274 = vmatmul.mubr.msk.f32.gmra.mrb[8].mxu0 %vm327_vm0, %v11159_v18  ;;  %v11366_v62 = vld [vmem:[%s11114_s10 + $0xd8] sm:$0xff]  ;;  %v11373_v63 = vld [vmem:[%s11114_s10 + $0xe0] sm:$0xff]  ;;  %v11376_v0 = vld [vmem:[%s11114_s10 + $0xf0] sm:$0xff] }
  0x26   : > { %9276 = vmatprep.mubr.msk.f32.mxu0 %vm327_vm0, %v11162_v19  ;;  %v11383_v1 = vld [vmem:[%s11114_s10 + $0xf8] sm:$0xff]  ;;  %v11386_v2 = vld [vmem:[%s11114_s10 + $0x108] sm:$0xff]  ;;  %v11393_v3 = vld [vmem:[%s11114_s10 + $0x110] sm:$0xff] }
  0x27   : > { %v11396_v4 = vld [vmem:[%s11114_s10 + $0x120] sm:$0xff]  ;;  %v11403_v5 = vld [vmem:[%s11114_s10 + $0x128] sm:$0xff]  ;;  %v11406_v6 = vld [vmem:[%s11114_s10 + $0x138] sm:$0xff] }
  0x28   : > { %v11413_v7 = vld [vmem:[%s11114_s10 + $0x140] sm:$0xff]  ;;  %v11416_v8 = vld [vmem:[%s11114_s10 + $0x150] sm:$0xff]  ;;  %v11423_v9 = vld [vmem:[%s11114_s10 + $0x158] sm:$0xff] }
  0x29   : > { %9277 = vmatmul.mubr.msk.f32.gmra.mrb[10].mxu0 %vm327_vm0, %v11169_v20  ;;  %v970_v42 = vld [vmem:[%s11114_s10 + $0x2] sm:$0xff] }
  0x2a   : > { %9279 = vmatprep.mubr.msk.f32.mxu0 %vm327_vm0, %v11172_v21 }
  0x2d   : > { %9280 = vmatmul.mubr.msk.f32.gmra.mrb[12].mxu0 %vm327_vm0, %v11179_v22 }
  0x2e   : > { %9282 = vmatprep.mubr.msk.f32.mxu0 %vm327_vm0, %v11182_v23 }
  0x31   : > { %9283 = vmatmul.mubr.msk.f32.gmra.mrb[14].mxu0 %vm327_vm0, %v11189_v24 }
  0x32   : > { %9285 = vmatprep.mubr.msk.f32.mxu0 %vm327_vm0, %v11192_v25 }
  0x35   : > { %9286 = vmatmul.mubr.msk.f32.gmra.mrb[16].mxu0 %vm327_vm0, %v11199_v26 }
  0x36   : > { %9288 = vmatprep.mubr.msk.f32.mxu0 %vm327_vm0, %v11202_v27 }
  0x39   : > { %9289 = vmatmul.mubr.msk.f32.gmra.mrb[18].mxu0 %vm327_vm0, %v11209_v28 }
  0x3a   : > { %9291 = vmatprep.mubr.msk.f32.mxu0 %vm327_vm0, %v11212_v29 }
  0x3d   : > { %9292 = vmatmul.mubr.msk.f32.gmra.mrb[20].mxu0 %vm327_vm0, %v11219_v30 }
  0x3e   : > { %9294 = vmatprep.mubr.msk.f32.mxu0 %vm327_vm0, %v11222_v31 }
  0x41   : > { %9295 = vmatmul.mubr.msk.f32.gmra.mrb[22].mxu0 %vm327_vm0, %v11229_v32 }
  0x42   : > { %9297 = vmatprep.mubr.msk.f32.mxu0 %vm327_vm0, %v11232_v33 }
  0x45   : > { %9298 = vmatmul.mubr.msk.f32.gmra.mrb[24].mxu0 %vm327_vm0, %v11239_v34 }
  0x46   : > { %9300 = vmatprep.mubr.msk.f32.mxu0 %vm327_vm0, %v11242_v35 }
  0x49   : > { %9301 = vmatmul.mubr.msk.f32.gmra.mrb[26].mxu0 %vm327_vm0, %v11249_v36  ;;  %v11459_v36 = vld [vmem:[%s11114_s10 + $0x32] sm:$0xff] }
  0x4a   : > { %9303 = vmatprep.mubr.msk.f32.mxu0 %vm327_vm0, %v11252_v37  ;;  %v11456_v37 = vld [vmem:[%s11114_s10 + $0x22] sm:$0xff]  ;;  %13510 = vst [vmem:[#allocation11_spill] sm:$0xff] %v11459_v36 }
  0x4d   : > { %9304 = vmatmul.mubr.msk.f32.gmra.mrb[28].mxu0 %vm327_vm0, %v11259_v38 }
  0x4e   : > { %9306 = vmatprep.mubr.msk.f32.mxu0 %vm327_vm0, %v11262_v39  ;;  %v11447_v39 = vld [vmem:[%s11114_s10 + $0x1a] sm:$0xff] }
  0x51   : > { %9307 = vmatmul.mubr.msk.f32.gmra.mrb[30].mxu0 %vm327_vm0, %v11269_v40  ;;  %v971_v40 = vld [vmem:[%s11114_s10 + $0xa] sm:$0xff] }
  0x52   : > { %9313 = vmatprep.mubr.msk.f32.mxu0 %vm327_vm0, %v263_v41  ;;  %v11433_v41 = vld [vmem:[%s11114_s10 + $0x170] sm:$0xff] }
  0x55   : > { %9314 = vmatmul.mubr.msk.f32.vlgmr.msra.gmra.mrb[0].mxu0 %vm327_vm0, %v264_v44  ;;  %v234_v44 = vld [vmem:[%s13368_s1 + $0x48] sm:$0xff] }
  0x56   : > { %10204 = vmatpush3.bf16.msra.mxu0 %v11121_v11  ;;  %9316 = vmatprep.mubr.msk.f32.mxu0 %vm327_vm0, %v11283_v45  ;;  %v11426_v11 = vld [vmem:[%s11114_s10 + $0x168] sm:$0xff]  ;;  %v11449_v38 = vpack.c.bf16 %v234_v44, %v233_v43 }
  0x57   : > { %10206 = vmatprep.subr.bf16.mxu0 %v11285_v46  ;;  %v11480_v43 = vld [vmem:[%s11114_s10 + $0x62] sm:$0xff]  ;;  %v11487_v44 = vld [vmem:[%s11114_s10 + $0x6a] sm:$0xff] }
  0x58   : > { %13514 = vst [vmem:[#allocation15_spill] sm:$0xff] %v11480_v43  ;;  %13515 = vst [vmem:[#allocation16_spill] sm:$0xff] %v11487_v44 }
  0x59   : > { %9317 = vmatmul.mubr.msk.f32.gmra.mrb[2].mxu0 %vm327_vm0, %v11292_v47 }
  0x5a   : > { %9319 = vmatprep.mubr.msk.f32.mxu0 %vm327_vm0, %v11295_v48 }
  0x5d   : > { %9320 = vmatmul.mubr.msk.f32.gmra.mrb[4].mxu0 %vm327_vm0, %v11303_v49 }
  0x5e   : > { %9322 = vmatprep.mubr.msk.f32.mxu0 %vm327_vm0, %v11306_v50 }
  0x61   : > { %9323 = vmatmul.mubr.msk.f32.gmra.mrb[6].mxu0 %vm327_vm0, %v11313_v51 }
  0x62   : > { %9325 = vmatprep.mubr.msk.f32.mxu0 %vm327_vm0, %v11316_v52 }
  0x65   : > { %9326 = vmatmul.mubr.msk.f32.gmra.mrb[8].mxu0 %vm327_vm0, %v11323_v53 }
  0x66   : > { %9328 = vmatprep.mubr.msk.f32.mxu0 %vm327_vm0, %v11326_v54 }
  0x69   : > { %9329 = vmatmul.mubr.msk.f32.gmra.mrb[10].mxu0 %vm327_vm0, %v11333_v55 }
  0x6a   : > { %9331 = vmatprep.mubr.msk.f32.mxu0 %vm327_vm0, %v11336_v56 }
  0x6d   : > { %9332 = vmatmul.mubr.msk.f32.gmra.mrb[12].mxu0 %vm327_vm0, %v11343_v57 }
  0x6e   : > { %9334 = vmatprep.mubr.msk.f32.mxu0 %vm327_vm0, %v11346_v58 }
  0x71   : > { %9335 = vmatmul.mubr.msk.f32.gmra.mrb[14].mxu0 %vm327_vm0, %v11353_v59 }
  0x72   : > { %9337 = vmatprep.mubr.msk.f32.mxu0 %vm327_vm0, %v11356_v60 }
  0x75   : > { %9338 = vmatmul.mubr.msk.f32.gmra.mrb[16].mxu0 %vm327_vm0, %v11363_v61 }
  0x76   : > { %9340 = vmatprep.mubr.msk.f32.mxu0 %vm327_vm0, %v11366_v62 }
  0x79   : > { %9341 = vmatmul.mubr.msk.f32.gmra.mrb[18].mxu0 %vm327_vm0, %v11373_v63 }
  0x7a   : > { %9343 = vmatprep.mubr.msk.f32.mxu0 %vm327_vm0, %v11376_v0 }
  0x7d   : > { %9344 = vmatmul.mubr.msk.f32.gmra.mrb[20].mxu0 %vm327_vm0, %v11383_v1 }
  0x7e   : > { %9346 = vmatprep.mubr.msk.f32.mxu0 %vm327_vm0, %v11386_v2 }
  0x81   : > { %9347 = vmatmul.mubr.msk.f32.gmra.mrb[22].mxu0 %vm327_vm0, %v11393_v3 }
  0x82   : > { %9349 = vmatprep.mubr.msk.f32.mxu0 %vm327_vm0, %v11396_v4 }
  0x85   : > { %9350 = vmatmul.mubr.msk.f32.gmra.mrb[24].mxu0 %vm327_vm0, %v11403_v5 }
  0x86   : > { %9352 = vmatprep.mubr.msk.f32.mxu0 %vm327_vm0, %v11406_v6 }
  0x89   : > { %9353 = vmatmul.mubr.msk.f32.gmra.mrb[26].mxu0 %vm327_vm0, %v11413_v7 }
  0x8a   : > { %9355 = vmatprep.mubr.msk.f32.mxu0 %vm327_vm0, %v11416_v8 }
  0x8d   : > { %9356 = vmatmul.mubr.msk.f32.gmra.mrb[28].mxu0 %vm327_vm0, %v11423_v9 }
  0x8e   : > { %9358 = vmatprep.mubr.msk.f32.mxu0 %vm327_vm0, %v11426_v11 }
  0x91   : > { %9359 = vmatmul.mubr.msk.f32.gmra.mrb[30].mxu0 %vm327_vm0, %v11433_v41 }
  0x92   : > { %9365 = vmatprep.mubr.msk.f32.mxu0 %vm327_vm0, %v970_v42  ;;  %v11477_v42 = vld [vmem:[%s11114_s10 + $0x52] sm:$0xff] }
  0x93   : > { %13513 = vst [vmem:[#allocation14_spill] sm:$0xff] %v11477_v42 }
  0x95   : > { %9366 = vmatmul.mubr.msk.f32.vlgmr.msra.gmra.mrb[0].mxu0 %vm327_vm0, %v971_v40  ;;  %v11467_v40 = vld [vmem:[%s11114_s10 + $0x3a] sm:$0xff] }
  0x96   : > { %10208 = vmatpush3.bf16.msra.mxu0 %v11285_v46  ;;  %9368 = vmatprep.mubr.msk.f32.mxu0 %vm327_vm0, %v11447_v39  ;;  %13511 = vst [vmem:[#allocation12_spill] sm:$0xff] %v11467_v40  ;;  %v11470_v46 = vld [vmem:[%s11114_s10 + $0x4a] sm:$0xff] }
  0x97   : > { %10210 = vmatprep.subr.bf16.mxu0 %v11449_v38  ;;  %13512 = vst [vmem:[#allocation13_spill] sm:$0xff] %v11470_v46 }
  0x99   : > { %9369 = vmatmul.mubr.msk.f32.gmra.mrb[2].mxu0 %vm327_vm0, %v11456_v37 }
  0x9a   : > { %9371 = vmatprep.mubr.msk.f32.mxu0 %vm327_vm0, %v11459_v36  ;;  %v11490_v36 = vld [vmem:[%s11114_s10 + $0x7a] sm:$0xff] }
  0x9b   : > { %13516 = vst [vmem:[#allocation17_spill] sm:$0xff] %v11490_v36 }
  0x9d   : > { %9372 = vmatmul.mubr.msk.f32.gmra.mrb[4].mxu0 %vm327_vm0, %v11467_v40  ;;  %v11500_v40 = vld [vmem:[%s11114_s10 + $0x92] sm:$0xff] }
  0x9e   : > { %9374 = vmatprep.mubr.msk.f32.mxu0 %vm327_vm0, %v11470_v46  ;;  %v11497_v46 = vld [vmem:[%s11114_s10 + $0x82] sm:$0xff]  ;;  %13518 = vst [vmem:[#allocation19_spill] sm:$0xff] %v11500_v40 }
  0x9f   : > { %13517 = vst [vmem:[#allocation18_spill] sm:$0xff] %v11497_v46 }
  0xa1   : > { %9375 = vmatmul.mubr.msk.f32.gmra.mrb[6].mxu0 %vm327_vm0, %v11477_v42  ;;  %v11510_v42 = vld [vmem:[%s11114_s10 + $0xaa] sm:$0xff] }
  0xa2   : > { %9377 = vmatprep.mubr.msk.f32.mxu0 %vm327_vm0, %v11480_v43  ;;  %v11507_v43 = vld [vmem:[%s11114_s10 + $0x9a] sm:$0xff]  ;;  %13520 = vst [vmem:[#allocation21_spill] sm:$0xff] %v11510_v42 }
  0xa3   : > { %13519 = vst [vmem:[#allocation20_spill] sm:$0xff] %v11507_v43 }
  0xa5   : > { %9378 = vmatmul.mubr.msk.f32.gmra.mrb[8].mxu0 %vm327_vm0, %v11487_v44  ;;  %v11520_v44 = vld [vmem:[%s11114_s10 + $0xc2] sm:$0xff] }
  0xa6   : > { %9380 = vmatprep.mubr.msk.f32.mxu0 %vm327_vm0, %v11490_v36  ;;  %v11517_v36 = vld [vmem:[%s11114_s10 + $0xb2] sm:$0xff]  ;;  %13522 = vst [vmem:[#allocation23_spill] sm:$0xff] %v11520_v44 }
  0xa7   : > { %13521 = vst [vmem:[#allocation22_spill] sm:$0xff] %v11517_v36 }
  0xa9   : > { %9381 = vmatmul.mubr.msk.f32.gmra.mrb[10].mxu0 %vm327_vm0, %v11497_v46  ;;  %v11530_v46 = vld [vmem:[%s11114_s10 + $0xda] sm:$0xff] }
  0xaa   : > { %9383 = vmatprep.mubr.msk.f32.mxu0 %vm327_vm0, %v11500_v40  ;;  %v11527_v40 = vld [vmem:[%s11114_s10 + $0xca] sm:$0xff]  ;;  %13524 = vst [vmem:[#allocation25_spill] sm:$0xff] %v11530_v46 }
  0xab   : > { %13523 = vst [vmem:[#allocation24_spill] sm:$0xff] %v11527_v40 }
  0xad   : > { %9384 = vmatmul.mubr.msk.f32.gmra.mrb[12].mxu0 %vm327_vm0, %v11507_v43  ;;  %v11540_v43 = vld [vmem:[%s11114_s10 + $0xf2] sm:$0xff] }
  0xae   : > { %9386 = vmatprep.mubr.msk.f32.mxu0 %vm327_vm0, %v11510_v42  ;;  %v11537_v42 = vld [vmem:[%s11114_s10 + $0xe2] sm:$0xff]  ;;  %13526 = vst [vmem:[#allocation27_spill] sm:$0xff] %v11540_v43 }
  0xaf   : > { %13525 = vst [vmem:[#allocation26_spill] sm:$0xff] %v11537_v42 }
  0xb1   : > { %9387 = vmatmul.mubr.msk.f32.gmra.mrb[14].mxu0 %vm327_vm0, %v11517_v36  ;;  %v11550_v36 = vld [vmem:[%s11114_s10 + $0x10a] sm:$0xff] }
  0xb2   : > { %9389 = vmatprep.mubr.msk.f32.mxu0 %vm327_vm0, %v11520_v44  ;;  %v11547_v44 = vld [vmem:[%s11114_s10 + $0xfa] sm:$0xff]  ;;  %13528 = vst [vmem:[#allocation29_spill] sm:$0xff] %v11550_v36 }
  0xb3   : > { %13527 = vst [vmem:[#allocation28_spill] sm:$0xff] %v11547_v44 }
  0xb5   : > { %9390 = vmatmul.mubr.msk.f32.gmra.mrb[16].mxu0 %vm327_vm0, %v11527_v40  ;;  %v11560_v40 = vld [vmem:[%s11114_s10 + $0x122] sm:$0xff] }
  0xb6   : > { %9392 = vmatprep.mubr.msk.f32.mxu0 %vm327_vm0, %v11530_v46  ;;  %v11557_v46 = vld [vmem:[%s11114_s10 + $0x112] sm:$0xff]  ;;  %13530 = vst [vmem:[#allocation31_spill] sm:$0xff] %v11560_v40 }
  0xb7   : > { %13529 = vst [vmem:[#allocation30_spill] sm:$0xff] %v11557_v46 }
  0xb9   : > { %9393 = vmatmul.mubr.msk.f32.gmra.mrb[18].mxu0 %vm327_vm0, %v11537_v42  ;;  %v11570_v42 = vld [vmem:[%s11114_s10 + $0x13a] sm:$0xff] }
  0xba   : > { %9395 = vmatprep.mubr.msk.f32.mxu0 %vm327_vm0, %v11540_v43  ;;  %v11567_v43 = vld [vmem:[%s11114_s10 + $0x12a] sm:$0xff]  ;;  %13532 = vst [vmem:[#allocation33_spill] sm:$0xff] %v11570_v42 }
  0xbb   : > { %13531 = vst [vmem:[#allocation32_spill] sm:$0xff] %v11567_v43 }
  0xbd   : > { %9396 = vmatmul.mubr.msk.f32.gmra.mrb[20].mxu0 %vm327_vm0, %v11547_v44  ;;  %v11580_v44 = vld [vmem:[%s11114_s10 + $0x152] sm:$0xff] }
  0xbe   : > { %9398 = vmatprep.mubr.msk.f32.mxu0 %vm327_vm0, %v11550_v36  ;;  %v11577_v36 = vld [vmem:[%s11114_s10 + $0x142] sm:$0xff]  ;;  %13533 = vst [vmem:[#allocation34_spill] sm:$0xff] %v11580_v44 }
  0xc1   : > { %9399 = vmatmul.mubr.msk.f32.gmra.mrb[22].mxu0 %vm327_vm0, %v11557_v46  ;;  %v11590_v46 = vld [vmem:[%s11114_s10 + $0x16a] sm:$0xff] }
  0xc2   : > { %9401 = vmatprep.mubr.msk.f32.mxu0 %vm327_vm0, %v11560_v40  ;;  %v11587_v40 = vld [vmem:[%s11114_s10 + $0x15a] sm:$0xff] }
  0xc3   : > { %13534 = vst [vmem:[#allocation35_spill] sm:$0xff] %v11587_v40 }
  0xc5   : > { %9402 = vmatmul.mubr.msk.f32.gmra.mrb[24].mxu0 %vm327_vm0, %v11567_v43  ;;  %v235_v43 = vld [vmem:[%s13368_s1 + $0x50] sm:$0xff] }
  0xc6   : > { %9404 = vmatprep.mubr.msk.f32.mxu0 %vm327_vm0, %v11570_v42  ;;  %v11597_v42 = vld [vmem:[%s11114_s10 + $0x172] sm:$0xff] }
  0xc7   : > { %13535 = vst [vmem:[#allocation36_spill] sm:$0xff] %v11597_v42 }
  0xc9   : > { %9405 = vmatmul.mubr.msk.f32.gmra.mrb[26].mxu0 %vm327_vm0, %v11577_v36 }
  0xca   : > { %9407 = vmatprep.mubr.msk.f32.mxu0 %vm327_vm0, %v11580_v44  ;;  %v236_v44 = vld [vmem:[%s13368_s1 + $0x58] sm:$0xff] }
  0xcd   : > { %9408 = vmatmul.mubr.msk.f32.gmra.mrb[28].mxu0 %vm327_vm0, %v11587_v40  ;;  %v10213_v40 = vpack.c.bf16 %v236_v44, %v235_v43  ;;  %v238_v43 = vld [vmem:[%s13368_s1 + $0x68] sm:$0xff] }
  0xce   : > { %9410 = vmatprep.mubr.msk.f32.mxu0 %vm327_vm0, %v11590_v46 }
  0xd1   : > { %9411 = vmatmul.mubr.msk.f32.gmra.mrb[30].mxu0 %vm327_vm0, %v11597_v42 }
  0xd2   : > { %9417 = vmatprep.mubr.msk.f32.mxu0 %vm327_vm0, %v11283_v45  ;;  %v11674_v45 = vld [vmem:[%s11114_s10 + $0x188] sm:$0xff] }
  0xd5   : > { %9418 = vmatmul.mubr.msk.f32.vlgmr.msra.gmra.mrb[0].mxu0 %vm327_vm0, %v11292_v47  ;;  %v237_v47 = vld [vmem:[%s13368_s1 + $0x60] sm:$0xff] }
  0xd6   : > { %10212 = vmatpush3.bf16.msra.mxu0 %v11449_v38  ;;  %9420 = vmatprep.mubr.msk.f32.mxu0 %vm327_vm0, %v11295_v48  ;;  %v11667_v38 = vld [vmem:[%s11114_s10 + $0x180] sm:$0xff]  ;;  %v10217_v44 = vpack.c.bf16 %v238_v43, %v237_v47 }
  0xd7   : > { %10214 = vmatprep.subr.bf16.mxu0 %v10213_v40  ;;  %v13539_v47 = vld [vmem:[#allocation9_spill] sm:$0xff] }
  0xd8   : > { %v11743_v43 = vld [vmem:[%s11114_s10 + $0x181] sm:$0xff] }
  0xd9   : > { %9421 = vmatmul.mubr.msk.f32.gmra.mrb[2].mxu0 %vm327_vm0, %v11303_v49  ;;  %13540 = vst [vmem:[#allocation37_spill] sm:$0xff] %v11743_v43 }
  0xda   : > { %9423 = vmatprep.mubr.msk.f32.mxu0 %vm327_vm0, %v11306_v50 }
  0xdd   : > { %9424 = vmatmul.mubr.msk.f32.gmra.mrb[4].mxu0 %vm327_vm0, %v11313_v51 }
  0xde   : > { %9426 = vmatprep.mubr.msk.f32.mxu0 %vm327_vm0, %v11316_v52 }
  0xe1   : > { %9427 = vmatmul.mubr.msk.f32.gmra.mrb[6].mxu0 %vm327_vm0, %v11323_v53 }
  0xe2   : > { %9429 = vmatprep.mubr.msk.f32.mxu0 %vm327_vm0, %v11326_v54 }
  0xe5   : > { %9430 = vmatmul.mubr.msk.f32.gmra.mrb[8].mxu0 %vm327_vm0, %v11333_v55 }
  0xe6   : > { %9432 = vmatprep.mubr.msk.f32.mxu0 %vm327_vm0, %v11336_v56 }
  0xe9   : > { %9433 = vmatmul.mubr.msk.f32.gmra.mrb[10].mxu0 %vm327_vm0, %v11343_v57 }
  0xea   : > { %9435 = vmatprep.mubr.msk.f32.mxu0 %vm327_vm0, %v11346_v58 }
  0xed   : > { %9436 = vmatmul.mubr.msk.f32.gmra.mrb[12].mxu0 %vm327_vm0, %v11353_v59 }
  0xee   : > { %9438 = vmatprep.mubr.msk.f32.mxu0 %vm327_vm0, %v11356_v60 }
  0xf1   : > { %9439 = vmatmul.mubr.msk.f32.gmra.mrb[14].mxu0 %vm327_vm0, %v11363_v61 }
  0xf2   : > { %9441 = vmatprep.mubr.msk.f32.mxu0 %vm327_vm0, %v11366_v62 }
  0xf5   : > { %9442 = vmatmul.mubr.msk.f32.gmra.mrb[16].mxu0 %vm327_vm0, %v11373_v63 }
  0xf6   : > { %9444 = vmatprep.mubr.msk.f32.mxu0 %vm327_vm0, %v11376_v0 }
  0xf9   : > { %9445 = vmatmul.mubr.msk.f32.gmra.mrb[18].mxu0 %vm327_vm0, %v11383_v1 }
  0xfa   : > { %9447 = vmatprep.mubr.msk.f32.mxu0 %vm327_vm0, %v11386_v2 }
  0xfd   : > { %9448 = vmatmul.mubr.msk.f32.gmra.mrb[20].mxu0 %vm327_vm0, %v11393_v3 }
  0xfe   : > { %9450 = vmatprep.mubr.msk.f32.mxu0 %vm327_vm0, %v11396_v4 }
 0x101   : > { %9451 = vmatmul.mubr.msk.f32.gmra.mrb[22].mxu0 %vm327_vm0, %v11403_v5 }
 0x102   : > { %9453 = vmatprep.mubr.msk.f32.mxu0 %vm327_vm0, %v11406_v6 }
 0x105   : > { %9454 = vmatmul.mubr.msk.f32.gmra.mrb[24].mxu0 %vm327_vm0, %v11413_v7 }
 0x106   : > { %9456 = vmatprep.mubr.msk.f32.mxu0 %vm327_vm0, %v11416_v8 }
 0x109   : > { %9457 = vmatmul.mubr.msk.f32.gmra.mrb[26].mxu0 %vm327_vm0, %v11423_v9 }
 0x10a   : > { %9459 = vmatprep.mubr.msk.f32.mxu0 %vm327_vm0, %v11426_v11 }
 0x10d   : > { %9460 = vmatmul.mubr.msk.f32.gmra.mrb[28].mxu0 %vm327_vm0, %v11433_v41 }
 0x10e   : > { %9462 = vmatprep.mubr.msk.f32.mxu0 %vm327_vm0, %v11667_v38 }
 0x111   : > { %9463 = vmatmul.mubr.msk.f32.gmra.mrb[30].mxu0 %vm327_vm0, %v11674_v45 }
 0x112   : > { %9469 = vmatprep.mubr.msk.f32.mxu0 %vm327_vm0, %v11119_v10  ;;  %v13536_v10 = vld [vmem:[#allocation6_spill] sm:$0xff] }
 0x115   : > { %9470 = vmatmul.mubr.msk.f32.vlgmr.msra.gmra.mrb[0].mxu0 %vm327_vm0, %v11128_v12  ;;  %v13537_v12 = vld [vmem:[#allocation7_spill] sm:$0xff] }
 0x116   : > { %10216 = vmatpush3.bf16.msra.mxu0 %v10213_v40  ;;  %9472 = vmatprep.mubr.msk.f32.mxu0 %vm327_vm0, %v11131_v13  ;;  %v13538_v40 = vld [vmem:[#allocation8_spill] sm:$0xff] }
 0x117   : > { %10218 = vmatprep.subr.bf16.mxu0 %v10217_v44 }
 0x119   : > { %9473 = vmatmul.mubr.msk.f32.gmra.mrb[2].mxu0 %vm327_vm0, %v11139_v14 }
 0x11a   : > { %9475 = vmatprep.mubr.msk.f32.mxu0 %vm327_vm0, %v11142_v15 }
 0x11d   : > { %9476 = vmatmul.mubr.msk.f32.gmra.mrb[4].mxu0 %vm327_vm0, %v11149_v16 }
 0x11e   : > { %9478 = vmatprep.mubr.msk.f32.mxu0 %vm327_vm0, %v11152_v17 }
 0x121   : > { %9479 = vmatmul.mubr.msk.f32.gmra.mrb[6].mxu0 %vm327_vm0, %v11159_v18 }
 0x122   : > { %9481 = vmatprep.mubr.msk.f32.mxu0 %vm327_vm0, %v11162_v19 }
 0x125   : > { %9482 = vmatmul.mubr.msk.f32.gmra.mrb[8].mxu0 %vm327_vm0, %v11169_v20 }
 0x126   : > { %9484 = vmatprep.mubr.msk.f32.mxu0 %vm327_vm0, %v11172_v21 }
 0x129   : > { %9485 = vmatmul.mubr.msk.f32.gmra.mrb[10].mxu0 %vm327_vm0, %v11179_v22 }
 0x12a   : > { %9487 = vmatprep.mubr.msk.f32.mxu0 %vm327_vm0, %v11182_v23 }
 0x12d   : > { %9488 = vmatmul.mubr.msk.f32.gmra.mrb[12].mxu0 %vm327_vm0, %v11189_v24 }
 0x12e   : > { %9490 = vmatprep.mubr.msk.f32.mxu0 %vm327_vm0, %v11192_v25 }
 0x131   : > { %9491 = vmatmul.mubr.msk.f32.gmra.mrb[14].mxu0 %vm327_vm0, %v11199_v26 }
 0x132   : > { %9493 = vmatprep.mubr.msk.f32.mxu0 %vm327_vm0, %v11202_v27 }
 0x135   : > { %9494 = vmatmul.mubr.msk.f32.gmra.mrb[16].mxu0 %vm327_vm0, %v11209_v28 }
 0x136   : > { %9496 = vmatprep.mubr.msk.f32.mxu0 %vm327_vm0, %v11212_v29 }
 0x139   : > { %9497 = vmatmul.mubr.msk.f32.gmra.mrb[18].mxu0 %vm327_vm0, %v11219_v30 }
 0x13a   : > { %9499 = vmatprep.mubr.msk.f32.mxu0 %vm327_vm0, %v11222_v31 }
 0x13d   : > { %9500 = vmatmul.mubr.msk.f32.gmra.mrb[20].mxu0 %vm327_vm0, %v11229_v32 }
 0x13e   : > { %9502 = vmatprep.mubr.msk.f32.mxu0 %vm327_vm0, %v11232_v33  ;;  %v13541_v33 = vld [vmem:[#allocation10_spill] sm:$0xff] }
 0x141   : > { %9503 = vmatmul.mubr.msk.f32.gmra.mrb[22].mxu0 %vm327_vm0, %v11239_v34  ;;  %v13546_v34 = vld [vmem:[#allocation14_spill] sm:$0xff] }
 0x142   : > { %9505 = vmatprep.mubr.msk.f32.mxu0 %vm327_vm0, %v11242_v35  ;;  %v11750_v35 = vld [vmem:[%s11114_s10 + $0x189] sm:$0xff] }
 0x143   : > { %13542 = vst [vmem:[#allocation38_spill] sm:$0xff] %v11750_v35 }
 0x145   : > { %9506 = vmatmul.mubr.msk.f32.gmra.mrb[24].mxu0 %vm327_vm0, %v13536_v10  ;;  %v13545_v10 = vld [vmem:[#allocation13_spill] sm:$0xff] }
 0x146   : > { %9508 = vmatprep.mubr.msk.f32.mxu0 %vm327_vm0, %v13537_v12  ;;  %v239_v12 = vld [vmem:[%s13368_s1 + $0x70] sm:$0xff] }
 0x149   : > { %9509 = vmatmul.mubr.msk.f32.gmra.mrb[26].mxu0 %vm327_vm0, %v13538_v40  ;;  %v240_v40 = vld [vmem:[%s13368_s1 + $0x78] sm:$0xff] }
 0x14a   : > { %9511 = vmatprep.mubr.msk.f32.mxu0 %vm327_vm0, %v13539_v47  ;;  %v13544_v47 = vld [vmem:[#allocation12_spill] sm:$0xff] }
 0x14d   : > { %9512 = vmatmul.mubr.msk.f32.gmra.mrb[28].mxu0 %vm327_vm0, %v13541_v33  ;;  %v10221_v33 = vpack.c.bf16 %v240_v40, %v239_v12  ;;  %v13551_v12 = vld [vmem:[#allocation19_spill] sm:$0xff]  ;;  %v13552_v40 = vld [vmem:[#allocation20_spill] sm:$0xff] }
 0x14e   : > { %9514 = vmatprep.mubr.msk.f32.mxu0 %vm327_vm0, %v11743_v43  ;;  %v13543_v43 = vld [vmem:[#allocation11_spill] sm:$0xff] }
 0x151   : > { %9515 = vmatmul.mubr.msk.f32.gmra.mrb[30].mxu0 %vm327_vm0, %v11750_v35  ;;  %v13547_v35 = vld [vmem:[#allocation15_spill] sm:$0xff] }
 0x152   : > { %9521 = vmatprep.mubr.msk.f32.mxu0 %vm327_vm0, %v11447_v39  ;;  %v13548_v39 = vld [vmem:[#allocation16_spill] sm:$0xff] }
 0x155   : > { %9522 = vmatmul.mubr.msk.f32.vlgmr.msra.gmra.mrb[0].mxu0 %vm327_vm0, %v11456_v37  ;;  %v13549_v37 = vld [vmem:[#allocation17_spill] sm:$0xff] }
 0x156   : > { %10220 = vmatpush3.bf16.msra.mxu0 %v10217_v44  ;;  %9524 = vmatprep.mubr.msk.f32.mxu0 %vm327_vm0, %v13543_v43  ;;  %v13550_v44 = vld [vmem:[#allocation18_spill] sm:$0xff] }
 0x157   : > { %10222 = vmatprep.subr.bf16.mxu0 %v10221_v33 }
 0x159   : > { %9525 = vmatmul.mubr.msk.f32.gmra.mrb[2].mxu0 %vm327_vm0, %v13544_v47 }
 0x15a   : > { %9527 = vmatprep.mubr.msk.f32.mxu0 %vm327_vm0, %v13545_v10  ;;  %v13553_v10 = vld [vmem:[#allocation21_spill] sm:$0xff] }
 0x15d   : > { %9528 = vmatmul.mubr.msk.f32.gmra.mrb[4].mxu0 %vm327_vm0, %v13546_v34  ;;  %v13554_v34 = vld [vmem:[#allocation22_spill] sm:$0xff] }
 0x15e   : > { %9530 = vmatprep.mubr.msk.f32.mxu0 %vm327_vm0, %v13547_v35  ;;  %v13555_v35 = vld [vmem:[#allocation23_spill] sm:$0xff] }
 0x161   : > { %9531 = vmatmul.mubr.msk.f32.gmra.mrb[6].mxu0 %vm327_vm0, %v13548_v39  ;;  %v13565_v39 = vld [vmem:[#allocation33_spill] sm:$0xff] }
 0x162   : > { %9533 = vmatprep.mubr.msk.f32.mxu0 %vm327_vm0, %v13549_v37  ;;  %v13556_v37 = vld [vmem:[#allocation24_spill] sm:$0xff] }
 0x165   : > { %9534 = vmatmul.mubr.msk.f32.gmra.mrb[8].mxu0 %vm327_vm0, %v13550_v44  ;;  %v13557_v44 = vld [vmem:[#allocation25_spill] sm:$0xff] }
 0x166   : > { %9536 = vmatprep.mubr.msk.f32.mxu0 %vm327_vm0, %v13551_v12  ;;  %v13558_v12 = vld [vmem:[#allocation26_spill] sm:$0xff] }
 0x169   : > { %9537 = vmatmul.mubr.msk.f32.gmra.mrb[10].mxu0 %vm327_vm0, %v13552_v40  ;;  %v13559_v40 = vld [vmem:[#allocation27_spill] sm:$0xff] }
 0x16a   : > { %9539 = vmatprep.mubr.msk.f32.mxu0 %vm327_vm0, %v13553_v10  ;;  %v13560_v10 = vld [vmem:[#allocation28_spill] sm:$0xff] }
 0x16d   : > { %9540 = vmatmul.mubr.msk.f32.gmra.mrb[12].mxu0 %vm327_vm0, %v13554_v34  ;;  %v13561_v34 = vld [vmem:[#allocation29_spill] sm:$0xff] }
 0x16e   : > { %9542 = vmatprep.mubr.msk.f32.mxu0 %vm327_vm0, %v13555_v35  ;;  %v13562_v35 = vld [vmem:[#allocation30_spill] sm:$0xff] }
 0x171   : > { %9543 = vmatmul.mubr.msk.f32.gmra.mrb[14].mxu0 %vm327_vm0, %v13556_v37  ;;  %v13563_v37 = vld [vmem:[#allocation31_spill] sm:$0xff] }
 0x172   : > { %9545 = vmatprep.mubr.msk.f32.mxu0 %vm327_vm0, %v13557_v44  ;;  %v13564_v44 = vld [vmem:[#allocation32_spill] sm:$0xff] }
 0x175   : > { %9546 = vmatmul.mubr.msk.f32.gmra.mrb[16].mxu0 %vm327_vm0, %v13558_v12 }
 0x176   : > { %9548 = vmatprep.mubr.msk.f32.mxu0 %vm327_vm0, %v13559_v40  ;;  %v13566_v40 = vld [vmem:[#allocation34_spill] sm:$0xff] }
 0x179   : > { %9549 = vmatmul.mubr.msk.f32.gmra.mrb[18].mxu0 %vm327_vm0, %v13560_v10  ;;  %v13567_v10 = vld [vmem:[#allocation35_spill] sm:$0xff] }
 0x17a   : > { %9551 = vmatprep.mubr.msk.f32.mxu0 %vm327_vm0, %v13561_v34 }
 0x17d   : > { %9552 = vmatmul.mubr.msk.f32.gmra.mrb[20].mxu0 %vm327_vm0, %v13562_v35  ;;  %v11819_v35 = vld [vmem:[%s11114_s10 + $0x182] sm:$0xff] }
 0x17e   : > { %9554 = vmatprep.mubr.msk.f32.mxu0 %vm327_vm0, %v13563_v37 }
 0x181   : > { %9555 = vmatmul.mubr.msk.f32.gmra.mrb[22].mxu0 %vm327_vm0, %v13564_v44 }
 0x182   : > { %9557 = vmatprep.mubr.msk.f32.mxu0 %vm327_vm0, %v13565_v39  ;;  %v11826_v39 = vld [vmem:[%s11114_s10 + $0x18a] sm:$0xff] }
 0x185   : > { %9558 = vmatmul.mubr.msk.f32.gmra.mrb[24].mxu0 %vm327_vm0, %v11577_v36 }
 0x186   : > { %9560 = vmatprep.mubr.msk.f32.mxu0 %vm327_vm0, %v13566_v40  ;;  %v241_v40 = vld [vmem:[%s13368_s1 + $0x80] sm:$0xff] }
 0x189   : > { %9561 = vmatmul.mubr.msk.f32.gmra.mrb[26].mxu0 %vm327_vm0, %v13567_v10  ;;  %v242_v10 = vld [vmem:[%s13368_s1 + $0x88] sm:$0xff] }
 0x18a   : > { %9563 = vmatprep.mubr.msk.f32.mxu0 %vm327_vm0, %v11590_v46 }
 0x18d   : > { %9564 = vmatmul.mubr.msk.f32.gmra.mrb[28].mxu0 %vm327_vm0, %v11597_v42  ;;  %v10225_v42 = vpack.c.bf16 %v242_v10, %v241_v40 }
 0x18e   : > { %9566 = vmatprep.mubr.msk.f32.mxu0 %vm327_vm0, %v11819_v35 }
 0x191   : > { %9567 = vmatmul.mubr.msk.f32.gmra.mrb[30].mxu0 %vm327_vm0, %v11826_v39 }
 0x192   : > { %9573 = vmatprep.mubr.msk.f32.mxu0 %vm327_vm0, %v11295_v48  ;;  %v8159_v48 = vld [vmem:[%s11114_s10 + $0x1a0] sm:$0xff] }
 0x195   : > { %9574 = vmatmul.mubr.msk.f32.vlgmr.msra.gmra.mrb[0].mxu0 %vm327_vm0, %v11303_v49  ;;  %v13586_v49 = vld [vmem:[#allocation21_spill] sm:$0xff] }
 0x196   : > { %10224 = vmatpush3.bf16.msra.mxu0 %v10221_v33  ;;  %9576 = vmatprep.mubr.msk.f32.mxu0 %vm327_vm0, %v11306_v50  ;;  %v8158_v33 = vld [vmem:[%s11114_s10 + $0x198] sm:$0xff]  ;;  %v13587_v50 = vld [vmem:[#allocation22_spill] sm:$0xff] }
 0x197   : > { %10226 = vmatprep.subr.bf16.mxu0 %v10225_v42 }
 0x199   : > { %9577 = vmatmul.mubr.msk.f32.gmra.mrb[2].mxu0 %vm327_vm0, %v11313_v51  ;;  %v13588_v51 = vld [vmem:[#allocation23_spill] sm:$0xff] }
 0x19a   : > { %9579 = vmatprep.mubr.msk.f32.mxu0 %vm327_vm0, %v11316_v52  ;;  %v13589_v52 = vld [vmem:[#allocation24_spill] sm:$0xff] }
 0x19d   : > { %9580 = vmatmul.mubr.msk.f32.gmra.mrb[4].mxu0 %vm327_vm0, %v11323_v53  ;;  %v13590_v53 = vld [vmem:[#allocation25_spill] sm:$0xff] }
 0x19e   : > { %9582 = vmatprep.mubr.msk.f32.mxu0 %vm327_vm0, %v11326_v54  ;;  %v13591_v54 = vld [vmem:[#allocation27_spill] sm:$0xff] }
 0x1a1   : > { %9583 = vmatmul.mubr.msk.f32.gmra.mrb[6].mxu0 %vm327_vm0, %v11333_v55  ;;  %v13592_v55 = vld [vmem:[#allocation28_spill] sm:$0xff] }
 0x1a2   : > { %9585 = vmatprep.mubr.msk.f32.mxu0 %vm327_vm0, %v11336_v56  ;;  %v13593_v56 = vld [vmem:[#allocation30_spill] sm:$0xff] }
 0x1a5   : > { %9586 = vmatmul.mubr.msk.f32.gmra.mrb[8].mxu0 %vm327_vm0, %v11343_v57  ;;  %v13594_v57 = vld [vmem:[#allocation33_spill] sm:$0xff] }
 0x1a6   : > { %9588 = vmatprep.mubr.msk.f32.mxu0 %vm327_vm0, %v11346_v58  ;;  %v13595_v58 = vld [vmem:[#allocation34_spill] sm:$0xff] }
 0x1a9   : > { %9589 = vmatmul.mubr.msk.f32.gmra.mrb[10].mxu0 %vm327_vm0, %v11353_v59  ;;  %v13596_v59 = vld [vmem:[#allocation35_spill] sm:$0xff] }
 0x1aa   : > { %9591 = vmatprep.mubr.msk.f32.mxu0 %vm327_vm0, %v11356_v60  ;;  %v8286_v60 = vld [vmem:[%s11114_s10 + $0x19a] sm:$0xff] }
 0x1ad   : > { %9592 = vmatmul.mubr.msk.f32.gmra.mrb[12].mxu0 %vm327_vm0, %v11363_v61  ;;  %v11051_v61 = vmov 0.0  }
 0x1ae   : > { %9594 = vmatprep.mubr.msk.f32.mxu0 %vm327_vm0, %v11366_v62  ;;  %3934 = vst.msk [vmem:[#allocation2 + $0x20] sm:$0xff] %vm327_vm0, %v11051_v61  ;;  %3929 = vst.msk [vmem:[#allocation2] sm:$0xff] %vm327_vm0, %v11051_v61  ;;  %v246_v62 = vld [vmem:[%s13370_s3 + $0x18] sm:$0xff] }
 0x1af   : > { %3930 = vst.msk [vmem:[#allocation2 + $0x8] sm:$0xff] %vm327_vm0, %v11051_v61  ;;  %3933 = vst.msk [vmem:[#allocation2 + $0x18] sm:$0xff] %vm327_vm0, %v11051_v61 }
 0x1b0   : > { %3936 = vst.msk [vmem:[#allocation2 + $0x30] sm:$0xff] %vm327_vm0, %v11051_v61  ;;  %3937 = vst.msk [vmem:[#allocation2 + $0x38] sm:$0xff] %vm327_vm0, %v11051_v61 }
 0x1b1   : > { %9595 = vmatmul.mubr.msk.f32.gmra.mrb[14].mxu0 %vm327_vm0, %v11373_v63  ;;  %3939 = vst.msk [vmem:[#allocation2 + $0x48] sm:$0xff] %vm327_vm0, %v11051_v61  ;;  %3940 = vst.msk [vmem:[#allocation2 + $0x50] sm:$0xff] %vm327_vm0, %v11051_v61 }
 0x1b2   : > { %9597 = vmatprep.mubr.msk.f32.mxu0 %vm327_vm0, %v11376_v0  ;;  %3942 = vst.msk [vmem:[#allocation2 + $0x60] sm:$0xff] %vm327_vm0, %v11051_v61  ;;  %3943 = vst.msk [vmem:[#allocation2 + $0x68] sm:$0xff] %vm327_vm0, %v11051_v61 }
 0x1b3   : > { %3945 = vst.msk [vmem:[#allocation2 + $0x78] sm:$0xff] %vm327_vm0, %v11051_v61  ;;  %3946 = vst.msk [vmem:[#allocation2 + $0x80] sm:$0xff] %vm327_vm0, %v11051_v61 }
 0x1b4   : > { %3948 = vst.msk [vmem:[#allocation2 + $0x90] sm:$0xff] %vm327_vm0, %v11051_v61  ;;  %3949 = vst.msk [vmem:[#allocation2 + $0x98] sm:$0xff] %vm327_vm0, %v11051_v61 }
 0x1b5   : > { %9598 = vmatmul.mubr.msk.f32.gmra.mrb[16].mxu0 %vm327_vm0, %v11383_v1  ;;  %3951 = vst.msk [vmem:[#allocation2 + $0xa8] sm:$0xff] %vm327_vm0, %v11051_v61  ;;  %3952 = vst.msk [vmem:[#allocation2 + $0xb0] sm:$0xff] %vm327_vm0, %v11051_v61 }
 0x1b6   : > { %9600 = vmatprep.mubr.msk.f32.mxu0 %vm327_vm0, %v11386_v2  ;;  %3954 = vst.msk [vmem:[#allocation2 + $0xc0] sm:$0xff] %vm327_vm0, %v11051_v61  ;;  %3955 = vst.msk [vmem:[#allocation2 + $0xc8] sm:$0xff] %vm327_vm0, %v11051_v61  ;;  %v4049_v0 = vld [vmem:[#allocation2 + $0x1] sm:$0xff] }
 0x1b7   : > { %3957 = vst.msk [vmem:[#allocation2 + $0xd8] sm:$0xff] %vm327_vm0, %v11051_v61  ;;  %3958 = vst.msk [vmem:[#allocation2 + $0xe0] sm:$0xff] %vm327_vm0, %v11051_v61  ;;  %9729 = vmatprep.mubr.msk.f32.mxu1 %vm327_vm0, %v4049_v0  ;;  %v243_v2 = vld [vmem:[%s13370_s3] sm:$0xff] }
 0x1b8   : > { %3960 = vst.msk [vmem:[#allocation2 + $0xf0] sm:$0xff] %vm327_vm0, %v11051_v61  ;;  %3961 = vst.msk [vmem:[#allocation2 + $0xf8] sm:$0xff] %vm327_vm0, %v11051_v61 }
 0x1b9   : > { %9601 = vmatmul.mubr.msk.f32.gmra.mrb[18].mxu0 %vm327_vm0, %v11393_v3  ;;  %3963 = vst.msk [vmem:[#allocation2 + $0x108] sm:$0xff] %vm327_vm0, %v11051_v61  ;;  %3964 = vst.msk [vmem:[#allocation2 + $0x110] sm:$0xff] %vm327_vm0, %v11051_v61  ;;  %v244_v3 = vld [vmem:[%s13370_s3 + $0x8] sm:$0xff] }
 0x1ba   : > { %9603 = vmatprep.mubr.msk.f32.mxu0 %vm327_vm0, %v11396_v4  ;;  %3966 = vst.msk [vmem:[#allocation2 + $0x120] sm:$0xff] %vm327_vm0, %v11051_v61  ;;  %3967 = vst.msk [vmem:[#allocation2 + $0x128] sm:$0xff] %vm327_vm0, %v11051_v61  ;;  %v10233_v4 = vpack.c.bf16 %v244_v3, %v243_v2 }
 0x1bb   : > { %3969 = vst.msk [vmem:[#allocation2 + $0x138] sm:$0xff] %vm327_vm0, %v11051_v61  ;;  %3970 = vst.msk [vmem:[#allocation2 + $0x140] sm:$0xff] %vm327_vm0, %v11051_v61 }
 0x1bc   : > { %3972 = vst.msk [vmem:[#allocation2 + $0x150] sm:$0xff] %vm327_vm0, %v11051_v61  ;;  %3973 = vst.msk [vmem:[#allocation2 + $0x158] sm:$0xff] %vm327_vm0, %v11051_v61 }
 0x1bd   : > { %9604 = vmatmul.mubr.msk.f32.gmra.mrb[20].mxu0 %vm327_vm0, %v11403_v5  ;;  %3975 = vst.msk [vmem:[#allocation2 + $0x168] sm:$0xff] %vm327_vm0, %v11051_v61  ;;  %3976 = vst.msk [vmem:[#allocation2 + $0x170] sm:$0xff] %vm327_vm0, %v11051_v61  ;;  %v247_v5 = vld [vmem:[%s13370_s3 + $0x20] sm:$0xff] }
 0x1be   : > { %9606 = vmatprep.mubr.msk.f32.mxu0 %vm327_vm0, %v11406_v6  ;;  %3978 = vst.msk [vmem:[#allocation2 + $0x180] sm:$0xff] %vm327_vm0, %v11051_v61  ;;  %3979 = vst.msk [vmem:[#allocation2 + $0x188] sm:$0xff] %vm327_vm0, %v11051_v61  ;;  %v248_v6 = vld [vmem:[%s13370_s3 + $0x28] sm:$0xff] }
 0x1bf   : > { %3981 = vst.msk [vmem:[#allocation2 + $0x198] sm:$0xff] %vm327_vm0, %v11051_v61  ;;  %3982 = vst.msk [vmem:[#allocation2 + $0x1a0] sm:$0xff] %vm327_vm0, %v11051_v61 }
 0x1c0   : > { %3935 = vst.msk [vmem:[#allocation2 + $0x28] sm:$0x3] %vm3931_vm1, %v11051_v61  ;;  %3932 = vst.msk [vmem:[#allocation2 + $0x10] sm:$0x3] %vm3931_vm1, %v11051_v61 }
 0x1c1   : > { %9607 = vmatmul.mubr.msk.f32.gmra.mrb[22].mxu0 %vm327_vm0, %v11413_v7  ;;  %3938 = vst.msk [vmem:[#allocation2 + $0x40] sm:$0x3] %vm3931_vm1, %v11051_v61  ;;  %3941 = vst.msk [vmem:[#allocation2 + $0x58] sm:$0x3] %vm3931_vm1, %v11051_v61  ;;  %v12102_v7 = vpack.c.bf16 %v248_v6, %v247_v5 }
 0x1c2   : > { %9609 = vmatprep.mubr.msk.f32.mxu0 %vm327_vm0, %v11416_v8  ;;  %3944 = vst.msk [vmem:[#allocation2 + $0x70] sm:$0x3] %vm3931_vm1, %v11051_v61  ;;  %3947 = vst.msk [vmem:[#allocation2 + $0x88] sm:$0x3] %vm3931_vm1, %v11051_v61  ;;  %v12108_v8 = vld [vmem:[%s13369_s2] ss:$0 sm:$0xff] }
 0x1c3   : > { %3950 = vst.msk [vmem:[#allocation2 + $0xa0] sm:$0x3] %vm3931_vm1, %v11051_v61  ;;  %3953 = vst.msk [vmem:[#allocation2 + $0xb8] sm:$0x3] %vm3931_vm1, %v11051_v61 }
 0x1c4   : > { %3956 = vst.msk [vmem:[#allocation2 + $0xd0] sm:$0x3] %vm3931_vm1, %v11051_v61  ;;  %3959 = vst.msk [vmem:[#allocation2 + $0xe8] sm:$0x3] %vm3931_vm1, %v11051_v61 }
 0x1c5   : > { %9610 = vmatmul.mubr.msk.f32.gmra.mrb[24].mxu0 %vm327_vm0, %v11423_v9  ;;  %3962 = vst.msk [vmem:[#allocation2 + $0x100] sm:$0x3] %vm3931_vm1, %v11051_v61  ;;  %3965 = vst.msk [vmem:[#allocation2 + $0x118] sm:$0x3] %vm3931_vm1, %v11051_v61 }
 0x1c6   : > { %9612 = vmatprep.mubr.msk.f32.mxu0 %vm327_vm0, %v11426_v11  ;;  %3968 = vst.msk [vmem:[#allocation2 + $0x130] sm:$0x3] %vm3931_vm1, %v11051_v61  ;;  %3971 = vst.msk [vmem:[#allocation2 + $0x148] sm:$0x3] %vm3931_vm1, %v11051_v61 }
 0x1c7   : > { %3974 = vst.msk [vmem:[#allocation2 + $0x160] sm:$0x3] %vm3931_vm1, %v11051_v61  ;;  %3977 = vst.msk [vmem:[#allocation2 + $0x178] sm:$0x3] %vm3931_vm1, %v11051_v61  ;;  %v4050_v1 = vld [vmem:[#allocation2 + $0x9] sm:$0xff] }
 0x1c8   : > { %3980 = vst.msk [vmem:[#allocation2 + $0x190] sm:$0x3] %vm3931_vm1, %v11051_v61  ;;  %3983 = vst.msk [vmem:[#allocation2 + $0x1a8] sm:$0x3] %vm3931_vm1, %v11051_v61 }
 0x1c9   : > { %9613 = vmatmul.mubr.msk.f32.gmra.mrb[26].mxu0 %vm327_vm0, %v11433_v41 }
 0x1ca   : > { %9615 = vmatprep.mubr.msk.f32.mxu0 %vm327_vm0, %v11667_v38 }
 0x1cd   : > { %9616 = vmatmul.mubr.msk.f32.gmra.mrb[28].mxu0 %vm327_vm0, %v11674_v45 }
 0x1ce   : > { %9618 = vmatprep.mubr.msk.f32.mxu0 %vm327_vm0, %v8158_v33 }
 0x1d1   : > { %9619 = vmatmul.mubr.msk.f32.gmra.mrb[30].mxu0 %vm327_vm0, %v8159_v48 }
 0x1d2   : > { %9625 = vmatprep.mubr.msk.f32.mxu0 %vm327_vm0, %v11131_v13  ;;  %v13568_v13 = vld [vmem:[#allocation3_spill] sm:$0xff] }
 0x1d5   : > { %9626 = vmatmul.mubr.msk.f32.vlgmr.msra.gmra.mrb[0].mxu0 %vm327_vm0, %v11139_v14  ;;  %v13569_v14 = vld [vmem:[#allocation4_spill] sm:$0xff] }
 0x1d6   : > { %10228 = vmatpush3.bf16.msra.mxu0 %v10225_v42  ;;  %9628 = vmatprep.mubr.msk.f32.mxu0 %vm327_vm0, %v11142_v15  ;;  %v13570_v15 = vld [vmem:[#allocation5_spill] sm:$0xff] }
 0x1d9   : > { %9629 = vmatmul.mubr.msk.f32.gmra.mrb[2].mxu0 %vm327_vm0, %v11149_v16  ;;  %v13571_v16 = vld [vmem:[#allocation6_spill] sm:$0xff] }
 0x1da   : > { %9631 = vmatprep.mubr.msk.f32.mxu0 %vm327_vm0, %v11152_v17  ;;  %v13572_v17 = vld [vmem:[#allocation7_spill] sm:$0xff] }
 0x1dd   : > { %9632 = vmatmul.mubr.msk.f32.gmra.mrb[4].mxu0 %vm327_vm0, %v11159_v18  ;;  %v13573_v18 = vld [vmem:[#allocation8_spill] sm:$0xff] }
 0x1de   : > { %9634 = vmatprep.mubr.msk.f32.mxu0 %vm327_vm0, %v11162_v19  ;;  %v13574_v19 = vld [vmem:[#allocation9_spill] sm:$0xff] }
 0x1e1   : > { %9635 = vmatmul.mubr.msk.f32.gmra.mrb[6].mxu0 %vm327_vm0, %v11169_v20  ;;  %v13575_v20 = vld [vmem:[#allocation10_spill] sm:$0xff] }
 0x1e2   : > { %9637 = vmatprep.mubr.msk.f32.mxu0 %vm327_vm0, %v11172_v21  ;;  %v13576_v21 = vld [vmem:[#allocation37_spill] sm:$0xff] }
 0x1e5   : > { %9638 = vmatmul.mubr.msk.f32.gmra.mrb[8].mxu0 %vm327_vm0, %v11179_v22  ;;  %v8222_v22 = vld [vmem:[%s11114_s10 + $0x199] sm:$0xff] }
 0x1e6   : > { %9640 = vmatprep.mubr.msk.f32.mxu0 %vm327_vm0, %v11182_v23  ;;  %v13577_v23 = vld [vmem:[#allocation38_spill] sm:$0xff] }
 0x1e9   : > { %9641 = vmatmul.mubr.msk.f32.gmra.mrb[10].mxu0 %vm327_vm0, %v11189_v24  ;;  %v8223_v24 = vld [vmem:[%s11114_s10 + $0x1a1] sm:$0xff] }
 0x1ea   : > { %9643 = vmatprep.mubr.msk.f32.mxu0 %vm327_vm0, %v11192_v25  ;;  %v13578_v25 = vld [vmem:[#allocation13_spill] sm:$0xff] }
 0x1ed   : > { %9644 = vmatmul.mubr.msk.f32.gmra.mrb[12].mxu0 %vm327_vm0, %v11199_v26  ;;  %v13579_v26 = vld [vmem:[#allocation14_spill] sm:$0xff] }
 0x1ee   : > { %9646 = vmatprep.mubr.msk.f32.mxu0 %vm327_vm0, %v11202_v27  ;;  %v13580_v27 = vld [vmem:[#allocation15_spill] sm:$0xff] }
 0x1f1   : > { %9647 = vmatmul.mubr.msk.f32.gmra.mrb[14].mxu0 %vm327_vm0, %v11209_v28  ;;  %v13581_v28 = vld [vmem:[#allocation16_spill] sm:$0xff] }
 0x1f2   : > { %9649 = vmatprep.mubr.msk.f32.mxu0 %vm327_vm0, %v11212_v29  ;;  %v13582_v29 = vld [vmem:[#allocation17_spill] sm:$0xff] }
 0x1f5   : > { %9650 = vmatmul.mubr.msk.f32.gmra.mrb[16].mxu0 %vm327_vm0, %v11219_v30  ;;  %v13583_v30 = vld [vmem:[#allocation18_spill] sm:$0xff] }
 0x1f6   : > { %9652 = vmatprep.mubr.msk.f32.mxu0 %vm327_vm0, %v11222_v31  ;;  %v13584_v31 = vld [vmem:[#allocation19_spill] sm:$0xff] }
 0x1f9   : > { %9653 = vmatmul.mubr.msk.f32.gmra.mrb[18].mxu0 %vm327_vm0, %v11229_v32  ;;  %v13585_v32 = vld [vmem:[#allocation20_spill] sm:$0xff] }
 0x1fa   : > { %9655 = vmatprep.mubr.msk.f32.mxu0 %vm327_vm0, %v13568_v13 }
 0x1fd   : > { %9656 = vmatmul.mubr.msk.f32.gmra.mrb[20].mxu0 %vm327_vm0, %v13569_v14 }
 0x1fe   : > { %9658 = vmatprep.mubr.msk.f32.mxu0 %vm327_vm0, %v13570_v15 }
 0x201   : > { %9659 = vmatmul.mubr.msk.f32.gmra.mrb[22].mxu0 %vm327_vm0, %v13571_v16 }
 0x202   : > { %9661 = vmatprep.mubr.msk.f32.mxu0 %vm327_vm0, %v13572_v17 }
 0x205   : > { %9662 = vmatmul.mubr.msk.f32.gmra.mrb[24].mxu0 %vm327_vm0, %v13573_v18 }
 0x206   : > { %9664 = vmatprep.mubr.msk.f32.mxu0 %vm327_vm0, %v13574_v19 }
 0x209   : > { %9665 = vmatmul.mubr.msk.f32.gmra.mrb[26].mxu0 %vm327_vm0, %v13575_v20 }
 0x20a   : > { %9667 = vmatprep.mubr.msk.f32.mxu0 %vm327_vm0, %v13576_v21 }
 0x20d   : > { %9668 = vmatmul.mubr.msk.f32.gmra.mrb[28].mxu0 %vm327_vm0, %v13577_v23 }
 0x20e   : > { %9670 = vmatprep.mubr.msk.f32.mxu0 %vm327_vm0, %v8222_v22 }
 0x211   : > { %9671 = vmatmul.mubr.msk.f32.gmra.mrb[30].mxu0 %vm327_vm0, %v8223_v24 }
 0x212   : > { %9677 = vmatprep.mubr.msk.f32.mxu0 %vm327_vm0, %v13543_v43 }
 0x215   : > { %9678 = vmatmul.mubr.msk.f32.vlgmr.msra.gmra.mrb[0].mxu0 %vm327_vm0, %v13544_v47 }
 0x216   : > { %9680 = vmatprep.mubr.msk.f32.mxu0 %vm327_vm0, %v13578_v25 }
 0x219   : > { %9681 = vmatmul.mubr.msk.f32.gmra.mrb[2].mxu0 %vm327_vm0, %v13579_v26 }
 0x21a   : > { %9683 = vmatprep.mubr.msk.f32.mxu0 %vm327_vm0, %v13580_v27 }
 0x21d   : > { %9684 = vmatmul.mubr.msk.f32.gmra.mrb[4].mxu0 %vm327_vm0, %v13581_v28 }
 0x21e   : > { %9686 = vmatprep.mubr.msk.f32.mxu0 %vm327_vm0, %v13582_v29 }
 0x221   : > { %9687 = vmatmul.mubr.msk.f32.gmra.mrb[6].mxu0 %vm327_vm0, %v13583_v30 }
 0x222   : > { %9689 = vmatprep.mubr.msk.f32.mxu0 %vm327_vm0, %v13584_v31 }
 0x225   : > { %9690 = vmatmul.mubr.msk.f32.gmra.mrb[8].mxu0 %vm327_vm0, %v13585_v32 }
 0x226   : > { %9692 = vmatprep.mubr.msk.f32.mxu0 %vm327_vm0, %v13586_v49 }
 0x229   : > { %9693 = vmatmul.mubr.msk.f32.gmra.mrb[10].mxu0 %vm327_vm0, %v13587_v50 }
 0x22a   : > { %9695 = vmatprep.mubr.msk.f32.mxu0 %vm327_vm0, %v13588_v51 }
 0x22d   : > { %9696 = vmatmul.mubr.msk.f32.gmra.mrb[12].mxu0 %vm327_vm0, %v13589_v52 }
 0x22e   : > { %9698 = vmatprep.mubr.msk.f32.mxu0 %vm327_vm0, %v13590_v53 }
 0x231   : > { %9699 = vmatmul.mubr.msk.f32.gmra.mrb[14].mxu0 %vm327_vm0, %v13558_v12 }
 0x232   : > { %9701 = vmatprep.mubr.msk.f32.mxu0 %vm327_vm0, %v13591_v54 }
 0x235   : > { %9702 = vmatmul.mubr.msk.f32.gmra.mrb[16].mxu0 %vm327_vm0, %v13592_v55 }
 0x236   : > { %9704 = vmatprep.mubr.msk.f32.mxu0 %vm327_vm0, %v13561_v34  ;;  %v13597_v34 = vld [vmem:[#allocation36_spill] sm:$0xff] }
 0x239   : > { %9705 = vmatmul.mubr.msk.f32.gmra.mrb[18].mxu0 %vm327_vm0, %v13593_v56 }
 0x23a   : > { %9707 = vmatprep.mubr.msk.f32.mxu0 %vm327_vm0, %v13563_v37 }
 0x23d   : > { %9708 = vmatmul.mubr.msk.f32.gmra.mrb[20].mxu0 %vm327_vm0, %v13564_v44 }
 0x23e   : > { %9710 = vmatprep.mubr.msk.f32.mxu0 %vm327_vm0, %v13594_v57 }
 0x241   : > { %9711 = vmatmul.mubr.msk.f32.gmra.mrb[22].mxu0 %vm327_vm0, %v11577_v36  ;;  %v8287_v36 = vld [vmem:[%s11114_s10 + $0x1a2] sm:$0xff] }
 0x242   : > { %9713 = vmatprep.mubr.msk.f32.mxu0 %vm327_vm0, %v13595_v58 }
 0x245   : > { %9714 = vmatmul.mubr.msk.f32.gmra.mrb[24].mxu0 %vm327_vm0, %v13596_v59 }
 0x246   : > { %9716 = vmatprep.mubr.msk.f32.mxu0 %vm327_vm0, %v11590_v46 }
 0x249   : > { %9717 = vmatmul.mubr.msk.f32.gmra.mrb[26].mxu0 %vm327_vm0, %v13597_v34 }
 0x24a   : > { %9719 = vmatprep.mubr.msk.f32.mxu0 %vm327_vm0, %v11819_v35  ;;  %v245_v35 = vld [vmem:[%s13370_s3 + $0x10] sm:$0xff] }
 0x24b   : > { %v10229_v63 = vpack.c.bf16 %v246_v62, %v245_v35 }
 0x24d   : > { %9720 = vmatmul.mubr.msk.f32.gmra.mrb[28].mxu0 %vm327_vm0, %v11826_v39  ;;  %10230 = vmatprep.subr.bf16.mxu1 %v10229_v63 }
 0x24e   : > { %9722 = vmatprep.mubr.msk.f32.mxu0 %vm327_vm0, %v8286_v60  ;;  %10232 = vmatpush3.bf16.msra.mxu1 %v10229_v63 }
 0x24f   : > { %10234 = vmatprep.subr.bf16.mxu1 %v10233_v4 }
 0x251   : > { %9723 = vmatmul.mubr.msk.f32.gmra.mrb[30].mxu0 %vm327_vm0, %v8287_v36  ;;  %9730 = vmatmul.mubr.msk.f32.vlgmr.msra.gmra.mrb[0].mxu1 %vm327_vm0, %v4050_v1 }
 0x252   : > { %10236 = vmatpush3.bf16.msra.mxu1 %v10233_v4 }
 0x253   : > { %10238 = vmatprep.subr.bf16.mxu1 %v12102_v7 }
 0x2e8   : > { %v9679_v9 = vpop.f32.mrb[0].mxu0 }
 0x2e9   : > { %v12111_v11 = vadd.f32 %v9679_v9, %v12108_v8  ;;  %v3476_v41 = vpop.f32.mrb[1].mxu0 }
 0x2ea   : > { %v12114_v46 = vadd.f32 %v12108_v8, %v3476_v41 }
 0x2eb   : > { %v3706_v42 = vsub.f32 0.0, %v12111_v11 }
 0x2ec   : > { %v3705_v38 = vsub.f32 0.0, %v12114_v46  ;;  %v9682_v45 = vpop.f32.mrb[2].mxu0 }
 0x2ed   : > { %v3739_v10 = vmul.f32 1.442695, %v3706_v42  ;;  %v12119_v47 = vadd.f32 %v9682_v45, %v12108_v8  ;;  %v3486_v43 = vpop.f32.mrb[3].mxu0 }
 0x2ee   : > { %v3737_v39 = vmul.f32 1.442695, %v3705_v38  ;;  %v12122_v37 = vadd.f32 %v12108_v8, %v3486_v43 }
 0x2ef   : > { %10787 = vpow2.f32 %v3739_v10  ;;  %v3708_v44 = vsub.f32 0.0, %v12119_v47 }
 0x2f0   : > { %10789 = vpow2.f32 %v3737_v39  ;;  %v3707_v12 = vsub.f32 0.0, %v12122_v37  ;;  %v9685_v40 = vpop.f32.mrb[4].mxu0 }
 0x2f1   : > { %v3743_v33 = vmul.f32 1.442695, %v3708_v44  ;;  %v12127_v48 = vadd.f32 %v9685_v40, %v12108_v8  ;;  %v3496_v13 = vpop.f32.mrb[5].mxu0 }
 0x2f2   : > { %v3741_v14 = vmul.f32 1.442695, %v3707_v12  ;;  %v12130_v15 = vadd.f32 %v12108_v8, %v3496_v13 }
 0x2f3   : > { %10791 = vpow2.f32 %v3743_v33  ;;  %v3710_v16 = vsub.f32 0.0, %v12127_v48 }
 0x2f4   : > { %10793 = vpow2.f32 %v3741_v14  ;;  %v3709_v17 = vsub.f32 0.0, %v12130_v15  ;;  %v9688_v18 = vpop.f32.mrb[6].mxu0 }
 0x2f5   : > { %v3747_v19 = vmul.f32 1.442695, %v3710_v16  ;;  %v12135_v20 = vadd.f32 %v9688_v18, %v12108_v8  ;;  %v3506_v21 = vpop.f32.mrb[7].mxu0 }
 0x2f6   : > { %v3745_v22 = vmul.f32 1.442695, %v3709_v17  ;;  %v12138_v23 = vadd.f32 %v12108_v8, %v3506_v21 }
 0x2f7   : > { %10795 = vpow2.f32 %v3747_v19  ;;  %v3712_v24 = vsub.f32 0.0, %v12135_v20 }
 0x2f8   : > { %10797 = vpow2.f32 %v3745_v22  ;;  %v3711_v25 = vsub.f32 0.0, %v12138_v23  ;;  %v9691_v26 = vpop.f32.mrb[8].mxu0 }
 0x2f9   : > { %v10788_v27 = vpop.eup %10787  ;;  %v3751_v28 = vmul.f32 1.442695, %v3712_v24  ;;  %v12143_v29 = vadd.f32 %v9691_v26, %v12108_v8  ;;  %v3516_v30 = vpop.f32.mrb[9].mxu0 }
 0x2fa   : > { %v10790_v31 = vpop.eup %10789  ;;  %v3802_v32 = vadd.f32 1.0, %v10788_v27  ;;  %v3749_v49 = vmul.f32 1.442695, %v3711_v25  ;;  %v12146_v50 = vadd.f32 %v12108_v8, %v3516_v30 }
 0x2fb   : > { %v3801_v51 = vadd.f32 1.0, %v10790_v31  ;;  %10799 = vpow2.f32 %v3751_v28  ;;  %v3714_v52 = vsub.f32 0.0, %v12143_v29 }
 0x2fc   : > { %10801 = vrcp.f32 %v3802_v32  ;;  %v3713_v53 = vsub.f32 0.0, %v12146_v50  ;;  %v9694_v54 = vpop.f32.mrb[10].mxu0 }
 0x2fd   : > { %v10792_v55 = vpop.eup %10791  ;;  %10803 = vrcp.f32 %v3801_v51  ;;  %v3755_v56 = vmul.f32 1.442695, %v3714_v52  ;;  %v12151_v57 = vadd.f32 %v9694_v54, %v12108_v8  ;;  %v3526_v58 = vpop.f32.mrb[11].mxu0 }
 0x2fe   : > { %v10794_v59 = vpop.eup %10793  ;;  %v3804_v34 = vadd.f32 1.0, %v10792_v55  ;;  %10805 = vpow2.f32 %v3749_v49  ;;  %v3753_v60 = vmul.f32 1.442695, %v3713_v53  ;;  %v12154_v36 = vadd.f32 %v12108_v8, %v3526_v58 }
 0x2ff   : > { %v3803_v61 = vadd.f32 1.0, %v10794_v59  ;;  %10807 = vpow2.f32 %v3755_v56  ;;  %v3716_v35 = vsub.f32 0.0, %v12151_v57 }
 0x300   : > { %10809 = vrcp.f32 %v3804_v34  ;;  %v3715_v62 = vsub.f32 0.0, %v12154_v36  ;;  %v9697_v63 = vpop.f32.mrb[12].mxu0 }
 0x301   : > { %v10796_v0 = vpop.eup %10795  ;;  %10811 = vrcp.f32 %v3803_v61  ;;  %v3759_v1 = vmul.f32 1.442695, %v3716_v35  ;;  %v12159_v2 = vadd.f32 %v9697_v63, %v12108_v8  ;;  %v3536_v3 = vpop.f32.mrb[13].mxu0 }
 0x302   : > { %v10798_v4 = vpop.eup %10797  ;;  %v3806_v5 = vadd.f32 1.0, %v10796_v0  ;;  %10813 = vpow2.f32 %v3753_v60  ;;  %v3757_v6 = vmul.f32 1.442695, %v3715_v62  ;;  %v12162_v9 = vadd.f32 %v12108_v8, %v3536_v3 }
 0x303   : > { %v3805_v41 = vadd.f32 1.0, %v10798_v4  ;;  %10815 = vpow2.f32 %v3759_v1  ;;  %v3718_v42 = vsub.f32 0.0, %v12159_v2 }
 0x304   : > { %10817 = vrcp.f32 %v3806_v5  ;;  %v3717_v38 = vsub.f32 0.0, %v12162_v9  ;;  %v9700_v45 = vpop.f32.mrb[14].mxu0 }
 0x305   : > { %v10800_v10 = vpop.eup %10799  ;;  %10819 = vrcp.f32 %v3805_v41  ;;  %v3763_v43 = vmul.f32 1.442695, %v3718_v42  ;;  %v12167_v39 = vadd.f32 %v9700_v45, %v12108_v8  ;;  %v3546_v44 = vpop.f32.mrb[15].mxu0 }
 0x306   : > { %v10802_v12 = vpop.eup %10801  ;;  %v3808_v40 = vadd.f32 1.0, %v10800_v10  ;;  %10821 = vpow2.f32 %v3757_v6  ;;  %v3761_v33 = vmul.f32 1.442695, %v3717_v38  ;;  %v12170_v13 = vadd.f32 %v12108_v8, %v3546_v44 }
 0x307   : > { %v10804_v14 = vpop.eup %10803  ;;  %v3898_v16 = vmul.f32 %v10802_v12, %v12111_v11  ;;  %10823 = vpow2.f32 %v3763_v43  ;;  %v3720_v17 = vsub.f32 0.0, %v12167_v39 }
 0x308   : > { %v10806_v18 = vpop.eup %10805  ;;  %v3897_v19 = vmul.f32 %v10804_v14, %v12114_v46  ;;  %10825 = vrcp.f32 %v3808_v40  ;;  %v3719_v21 = vsub.f32 0.0, %v12170_v13  ;;  %v9703_v22 = vpop.f32.mrb[16].mxu0 }
 0x309   : > { %v10808_v24 = vpop.eup %10807  ;;  %3986 = vst.msk [vmem:[#allocation2 + $0x21] sm:$0xff] %vm327_vm0, %v3898_v16  ;;  %v3807_v25 = vadd.f32 1.0, %v10806_v18  ;;  %10827 = vpow2.f32 %v3761_v33  ;;  %v3767_v26 = vmul.f32 1.442695, %v3720_v17  ;;  %v12178_v27 = vadd.f32 %v9703_v22, %v12108_v8  ;;  %v3556_v11 = vpop.f32.mrb[17].mxu0 }
 0x30a   : > { %v10810_v28 = vpop.eup %10809  ;;  %3985 = vst.msk [vmem:[#allocation2 + $0x19] sm:$0xff] %vm327_vm0, %v3897_v19  ;;  %v3810_v30 = vadd.f32 1.0, %v10808_v24  ;;  %v3765_v31 = vmul.f32 1.442695, %v3719_v21  ;;  %v12182_v46 = vadd.f32 %v12108_v8, %v3556_v11 }
 0x30b   : > { %v10812_v32 = vpop.eup %10811  ;;  %v3900_v49 = vmul.f32 %v10810_v28, %v12119_v47  ;;  %10829 = vrcp.f32 %v3807_v25  ;;  %v3722_v51 = vsub.f32 0.0, %v12178_v27 }
 0x30c   : > { %v10814_v52 = vpop.eup %10813  ;;  %v3899_v53 = vmul.f32 %v10812_v32, %v12122_v37  ;;  %10831 = vrcp.f32 %v3810_v30  ;;  %v3721_v54 = vsub.f32 0.0, %v12182_v46  ;;  %v9706_v55 = vpop.f32.mrb[18].mxu0 }
 0x30d   : > { %v10816_v56 = vpop.eup %10815  ;;  %3988 = vst.msk [vmem:[#allocation2 + $0x39] sm:$0xff] %vm327_vm0, %v3900_v49  ;;  %v3809_v58 = vadd.f32 1.0, %v10814_v52  ;;  %10833 = vpow2.f32 %v3767_v26  ;;  %v3771_v59 = vmul.f32 1.442695, %v3722_v51  ;;  %v12190_v34 = vadd.f32 %v9706_v55, %v12108_v8  ;;  %v3566_v47 = vpop.f32.mrb[19].mxu0 }
 0x30e   : > { %v10818_v60 = vpop.eup %10817  ;;  %3987 = vst.msk [vmem:[#allocation2 + $0x31] sm:$0xff] %vm327_vm0, %v3899_v53  ;;  %v3812_v61 = vadd.f32 1.0, %v10816_v56  ;;  %10835 = vpow2.f32 %v3765_v31  ;;  %v3769_v37 = vmul.f32 1.442695, %v3721_v54  ;;  %v12194_v35 = vadd.f32 %v12108_v8, %v3566_v47 }
 0x30f   : > { %v10820_v62 = vpop.eup %10819  ;;  %v3902_v63 = vmul.f32 %v10818_v60, %v12127_v48  ;;  %10837 = vrcp.f32 %v3809_v58  ;;  %v3724_v0 = vsub.f32 0.0, %v12190_v34 }
 0x310   : > { %v10822_v1 = vpop.eup %10821  ;;  %v3901_v3 = vmul.f32 %v10820_v62, %v12130_v15  ;;  %10839 = vrcp.f32 %v3812_v61  ;;  %v3723_v4 = vsub.f32 0.0, %v12194_v35  ;;  %v9709_v5 = vpop.f32.mrb[20].mxu0  ;;  %v12212_v44 = vld [vmem:[#allocation2 + $0x21] sm:$0xff] }
 0x311   : > { %v10824_v6 = vpop.eup %10823  ;;  %3990 = vst.msk [vmem:[#allocation2 + $0x51] sm:$0xff] %vm327_vm0, %v3902_v63  ;;  %v3811_v41 = vadd.f32 1.0, %v10822_v1  ;;  %10841 = vpow2.f32 %v3771_v59  ;;  %v3775_v42 = vmul.f32 1.442695, %v3724_v0  ;;  %v12202_v38 = vadd.f32 %v9709_v5, %v12108_v8  ;;  %v3576_v48 = vpop.f32.mrb[21].mxu0  ;;  %v12204_v45 = vld [vmem:[#allocation2 + $0x19] sm:$0xff] }
 0x312   : > { %v10826_v10 = vpop.eup %10825  ;;  %3989 = vst.msk [vmem:[#allocation2 + $0x49] sm:$0xff] %vm327_vm0, %v3901_v3  ;;  %v3814_v15 = vadd.f32 1.0, %v10824_v6  ;;  %10843 = vpow2.f32 %v3769_v37  ;;  %v12208_v43 = vadd.f32 %v12108_v8, %v3576_v48  ;;  %9732 = vmatprep.mubr.msk.f32.mxu1 %vm327_vm0, %v12204_v45  ;;  %v3773_v33 = vmul.f32 1.442695, %v3723_v4 }
 0x313   : > { %v10828_v12 = vpop.eup %10827  ;;  %v3904_v40 = vmul.f32 %v10826_v10, %v12135_v20  ;;  %10845 = vrcp.f32 %v3811_v41  ;;  %v3726_v14 = vsub.f32 0.0, %v12202_v38  ;;  %9733 = vmatmul.mubr.msk.f32.gmra.mrb[2].mxu1 %vm327_vm0, %v12212_v44 }
 0x314   : > { %10847 = vrcp.f32 %v3814_v15  ;;  %v3813_v16 = vadd.f32 1.0, %v10828_v12  ;;  %v3725_v17 = vsub.f32 0.0, %v12208_v43  ;;  %v9712_v18 = vpop.f32.mrb[22].mxu0  ;;  %v12231_v30 = vld [vmem:[#allocation2 + $0x39] sm:$0xff] }
 0x315   : > { %v10830_v19 = vpop.eup %10829  ;;  %3992 = vst.msk [vmem:[#allocation2 + $0x69] sm:$0xff] %vm327_vm0, %v3904_v40  ;;  %10849 = vpow2.f32 %v3775_v42  ;;  %v3779_v21 = vmul.f32 1.442695, %v3726_v14  ;;  %v12221_v22 = vadd.f32 %v9712_v18, %v12108_v8  ;;  %v3586_v20 = vpop.f32.mrb[23].mxu0  ;;  %v12223_v24 = vld [vmem:[#allocation2 + $0x31] sm:$0xff] }
 0x316   : > { %v10832_v25 = vpop.eup %10831  ;;  %v3903_v26 = vmul.f32 %v10830_v19, %v12138_v23  ;;  %10851 = vrcp.f32 %v3813_v16  ;;  %v3777_v11 = vmul.f32 1.442695, %v3725_v17  ;;  %v12227_v28 = vadd.f32 %v12108_v8, %v3586_v20  ;;  %9735 = vmatprep.mubr.msk.f32.mxu1 %vm327_vm0, %v12223_v24 }
 0x317   : > { %v10834_v31 = vpop.eup %10833  ;;  %v3906_v32 = vmul.f32 %v10832_v25, %v12143_v29  ;;  %10853 = vpow2.f32 %v3773_v33  ;;  %v3728_v49 = vsub.f32 0.0, %v12221_v22  ;;  %9736 = vmatmul.mubr.msk.f32.gmra.mrb[4].mxu1 %vm327_vm0, %v12231_v30 }
 0x318   : > { %v10836_v23 = vpop.eup %10835  ;;  %3991 = vst.msk [vmem:[#allocation2 + $0x61] sm:$0xff] %vm327_vm0, %v3903_v26  ;;  %v3816_v51 = vadd.f32 1.0, %v10834_v31  ;;  %10855 = vpow2.f32 %v3779_v21  ;;  %v3727_v52 = vsub.f32 0.0, %v12227_v28  ;;  %v9715_v53 = vpop.f32.mrb[24].mxu0  ;;  %v12251_v62 = vld [vmem:[#allocation2 + $0x51] sm:$0xff] }
 0x319   : > { %v10838_v54 = vpop.eup %10837  ;;  %3994 = vst.msk [vmem:[#allocation2 + $0x81] sm:$0xff] %vm327_vm0, %v3906_v32  ;;  %v3815_v55 = vadd.f32 1.0, %v10836_v23  ;;  %10857 = vpow2.f32 %v3777_v11  ;;  %v3783_v29 = vmul.f32 1.442695, %v3728_v49  ;;  %v12241_v56 = vadd.f32 %v9715_v53, %v12108_v8  ;;  %v3596_v58 = vpop.f32.mrb[25].mxu0  ;;  %v12243_v59 = vld [vmem:[#allocation2 + $0x49] sm:$0xff] }
 0x31a   : > { %v10840_v47 = vpop.eup %10839  ;;  %v3905_v60 = vmul.f32 %v10838_v54, %v12146_v50  ;;  %10859 = vrcp.f32 %v3816_v51  ;;  %v3781_v61 = vmul.f32 1.442695, %v3727_v52  ;;  %v12247_v37 = vadd.f32 %v12108_v8, %v3596_v58  ;;  %9738 = vmatprep.mubr.msk.f32.mxu1 %vm327_vm0, %v12243_v59 }
 0x31b   : > { %v10842_v63 = vpop.eup %10841  ;;  %v3908_v0 = vmul.f32 %v10840_v47, %v12151_v57  ;;  %10861 = vrcp.f32 %v3815_v55  ;;  %v3730_v1 = vsub.f32 0.0, %v12241_v56  ;;  %9739 = vmatmul.mubr.msk.f32.gmra.mrb[6].mxu1 %vm327_vm0, %v12251_v62 }
 0x31c   : > { %v10844_v50 = vpop.eup %10843  ;;  %3993 = vst.msk [vmem:[#allocation2 + $0x79] sm:$0xff] %vm327_vm0, %v3905_v60  ;;  %v3818_v3 = vadd.f32 1.0, %v10842_v63  ;;  %10863 = vpow2.f32 %v3783_v29  ;;  %v3729_v4 = vsub.f32 0.0, %v12247_v37  ;;  %v9718_v5 = vpop.f32.mrb[26].mxu0  ;;  %v12275_v21 = vld [vmem:[#allocation2 + $0x69] sm:$0xff] }
 0x31d   : > { %v10846_v6 = vpop.eup %10845  ;;  %3996 = vst.msk [vmem:[#allocation2 + $0x99] sm:$0xff] %vm327_vm0, %v3908_v0  ;;  %v3817_v41 = vadd.f32 1.0, %v10844_v50  ;;  %10865 = vpow2.f32 %v3781_v61  ;;  %v3787_v57 = vmul.f32 1.442695, %v3730_v1  ;;  %v12261_v42 = vadd.f32 %v9718_v5, %v12108_v8  ;;  %v3606_v48 = vpop.f32.mrb[27].mxu0 }
 0x31e   : > { %v10848_v10 = vpop.eup %10847  ;;  %v3907_v15 = vmul.f32 %v10846_v6, %v12154_v36  ;;  %10867 = vrcp.f32 %v3818_v3  ;;  %v3785_v12 = vmul.f32 1.442695, %v3729_v4  ;;  %v12265_v40 = vadd.f32 %v12108_v8, %v3606_v48 }
 0x31f   : > { %v10850_v33 = vpop.eup %10849  ;;  %v3910_v14 = vmul.f32 %v10848_v10, %v12159_v2  ;;  %10869 = vrcp.f32 %v3817_v41  ;;  %v3732_v16 = vsub.f32 0.0, %v12261_v42  ;;  %v12269_v17 = vld [vmem:[#allocation2 + $0x61] sm:$0xff] }
 0x320   : > { %v10852_v18 = vpop.eup %10851  ;;  %3995 = vst.msk [vmem:[#allocation2 + $0x91] sm:$0xff] %vm327_vm0, %v3907_v15  ;;  %v3820_v19 = vadd.f32 1.0, %v10850_v33  ;;  %10871 = vpow2.f32 %v3787_v57  ;;  %v3731_v36 = vsub.f32 0.0, %v12265_v40  ;;  %9741 = vmatprep.mubr.msk.f32.mxu1 %vm327_vm0, %v12269_v17  ;;  %v9721_v20 = vpop.f32.mrb[28].mxu0  ;;  %v12294_v47 = vld [vmem:[#allocation2 + $0x81] sm:$0xff] }
 0x321   : > { %v10854_v25 = vpop.eup %10853  ;;  %3998 = vst.msk [vmem:[#allocation2 + $0xb1] sm:$0xff] %vm327_vm0, %v3910_v14  ;;  %v3909_v2 = vmul.f32 %v10852_v18, %v12162_v9  ;;  %10873 = vpow2.f32 %v3785_v12  ;;  %v3791_v26 = vmul.f32 1.442695, %v3732_v16  ;;  %9742 = vmatmul.mubr.msk.f32.gmra.mrb[8].mxu1 %vm327_vm0, %v12275_v21  ;;  %v12282_v11 = vadd.f32 %v9721_v20, %v12108_v8  ;;  %v3616_v31 = vpop.f32.mrb[29].mxu0 }
 0x322   : > { %v10856_v32 = vpop.eup %10855  ;;  %10875 = vrcp.f32 %v3820_v19  ;;  %v3819_v49 = vadd.f32 1.0, %v10854_v25  ;;  %v12285_v23 = vadd.f32 %v12108_v8, %v3616_v31  ;;  %v3789_v9 = vmul.f32 1.442695, %v3731_v36 }
 0x323   : > { %v10858_v51 = vpop.eup %10857  ;;  %3997 = vst.msk [vmem:[#allocation2 + $0xa9] sm:$0xff] %vm327_vm0, %v3909_v2  ;;  %v3822_v52 = vadd.f32 1.0, %v10856_v32  ;;  %10877 = vpow2.f32 %v3791_v26  ;;  %v3734_v53 = vsub.f32 0.0, %v12282_v11  ;;  %v12289_v54 = vld [vmem:[#allocation2 + $0x79] sm:$0xff] }
 0x324   : > { %v10860_v55 = vpop.eup %10859  ;;  %10879 = vrcp.f32 %v3819_v49  ;;  %v3821_v29 = vadd.f32 1.0, %v10858_v51  ;;  %v3733_v58 = vsub.f32 0.0, %v12285_v23  ;;  %9744 = vmatprep.mubr.msk.f32.mxu1 %vm327_vm0, %v12289_v54  ;;  %v9724_v60 = vpop.f32.mrb[30].mxu0 }
 0x325   : > { %v10862_v61 = vpop.eup %10861  ;;  %v3912_v63 = vmul.f32 %v10860_v55, %v12167_v39  ;;  %10881 = vrcp.f32 %v3822_v52  ;;  %v3795_v0 = vmul.f32 1.442695, %v3734_v53  ;;  %9745 = vmatmul.mubr.msk.f32.gmra.mrb[10].mxu1 %vm327_vm0, %v12294_v47  ;;  %v12300_v1 = vadd.f32 %v9724_v60, %v12108_v8  ;;  %v3626_v50 = vpop.f32.mrb[31].mxu0 }
 0x326   : > { %v10864_v3 = vpop.eup %10863  ;;  %v3911_v4 = vmul.f32 %v10862_v61, %v12170_v13  ;;  %10883 = vrcp.f32 %v3821_v29  ;;  %v12304_v5 = vadd.f32 %v12108_v8, %v3626_v50  ;;  %v3793_v41 = vmul.f32 1.442695, %v3733_v58  ;;  %v12314_v8 = vld [vmem:[#allocation2 + $0x99] sm:$0xff] }
 0x327   : > { %v10866_v6 = vpop.eup %10865  ;;  %4000 = vst.msk [vmem:[#allocation2 + $0xc9] sm:$0xff] %vm327_vm0, %v3912_v63  ;;  %v3824_v39 = vadd.f32 1.0, %v10864_v3  ;;  %10885 = vpow2.f32 %v3789_v9  ;;  %v3736_v57 = vsub.f32 0.0, %v12300_v1  ;;  %v12308_v48 = vld [vmem:[#allocation2 + $0x91] sm:$0xff] }
 0x328   : > { %v10868_v10 = vpop.eup %10867  ;;  %3999 = vst.msk [vmem:[#allocation2 + $0xc1] sm:$0xff] %vm327_vm0, %v3911_v4  ;;  %v3823_v15 = vadd.f32 1.0, %v10866_v6  ;;  %10887 = vpow2.f32 %v3795_v0  ;;  %v3735_v13 = vsub.f32 0.0, %v12304_v5  ;;  %9747 = vmatprep.mubr.msk.f32.mxu1 %vm327_vm0, %v12308_v48  ;;  %v12326_v26 = vld [vmem:[#allocation2 + $0xb1] sm:$0xff] }
 0x329   : > { %v10870_v12 = vpop.eup %10869  ;;  %v3914_v33 = vmul.f32 %v10868_v10, %v12178_v27  ;;  %10889 = vrcp.f32 %v3824_v39  ;;  %v3799_v14 = vmul.f32 1.442695, %v3736_v57  ;;  %9748 = vmatmul.mubr.msk.f32.gmra.mrb[12].mxu1 %vm327_vm0, %v12314_v8 }
 0x32a   : > { %v10872_v16 = vpop.eup %10871  ;;  %v3913_v18 = vmul.f32 %v10870_v12, %v12182_v46  ;;  %10891 = vrcp.f32 %v3823_v15  ;;  %v12320_v19 = vld [vmem:[#allocation2 + $0xa9] sm:$0xff]  ;;  %v3797_v25 = vmul.f32 1.442695, %v3735_v13 }
 0x32b   : > { %v10874_v36 = vpop.eup %10873  ;;  %4002 = vst.msk [vmem:[#allocation2 + $0xe1] sm:$0xff] %vm327_vm0, %v3914_v33  ;;  %v3826_v20 = vadd.f32 1.0, %v10872_v16  ;;  %10893 = vpow2.f32 %v3793_v41  ;;  %9750 = vmatprep.mubr.msk.f32.mxu1 %vm327_vm0, %v12320_v19 }
 0x32c   : > { %v10876_v27 = vpop.eup %10875  ;;  %4001 = vst.msk [vmem:[#allocation2 + $0xd9] sm:$0xff] %vm327_vm0, %v3913_v18  ;;  %v3825_v2 = vadd.f32 1.0, %v10874_v36  ;;  %10895 = vpow2.f32 %v3799_v14 }
 0x32d   : > { %v10878_v46 = vpop.eup %10877  ;;  %v3916_v31 = vmul.f32 %v10876_v27, %v12190_v34  ;;  %10897 = vrcp.f32 %v3826_v20  ;;  %9751 = vmatmul.mubr.msk.f32.gmra.mrb[14].mxu1 %vm327_vm0, %v12326_v26 }
 0x32e   : > { %v10880_v32 = vpop.eup %10879  ;;  %10899 = vrcp.f32 %v3825_v2  ;;  %v3828_v49 = vadd.f32 1.0, %v10878_v46  ;;  %v12338_v34 = vld [vmem:[#allocation2 + $0xc9] sm:$0xff] }
 0x32f   : > { %v10882_v51 = vpop.eup %10881  ;;  %4004 = vst.msk [vmem:[#allocation2 + $0xf9] sm:$0xff] %vm327_vm0, %v3916_v31  ;;  %v3915_v52 = vmul.f32 %v10880_v32, %v12194_v35  ;;  %10901 = vpow2.f32 %v3797_v25  ;;  %v12333_v9 = vld [vmem:[#allocation2 + $0xc1] sm:$0xff] }
 0x330   : > { %v10884_v53 = vpop.eup %10883  ;;  %v3918_v55 = vmul.f32 %v10882_v51, %v12202_v38  ;;  %10903 = vrcp.f32 %v3828_v49  ;;  %9753 = vmatprep.mubr.msk.f32.mxu1 %vm327_vm0, %v12333_v9 }
 0x331   : > { %v10886_v29 = vpop.eup %10885  ;;  %4003 = vst.msk [vmem:[#allocation2 + $0xf1] sm:$0xff] %vm327_vm0, %v3915_v52  ;;  %v3917_v58 = vmul.f32 %v10884_v53, %v12208_v43  ;;  %9754 = vmatmul.mubr.msk.f32.gmra.mrb[16].mxu1 %vm327_vm0, %v12338_v34  ;;  %v4017_v53 = vld [vmem:[#allocation2] sm:$0xff] }
 0x332   : > { %v10888_v35 = vpop.eup %10887  ;;  %4006 = vst.msk [vmem:[#allocation2 + $0x111] sm:$0xff] %vm327_vm0, %v3918_v55  ;;  %v3827_v60 = vadd.f32 1.0, %v10886_v29  ;;  %v12351_v43 = vld [vmem:[#allocation2 + $0xe1] sm:$0xff]  ;;  %v250_v29 = vld [vmem:[%s13370_s3 + $0x38] sm:$0xff] }
 0x333   : > { %v10890_v61 = vpop.eup %10889  ;;  %4005 = vst.msk [vmem:[#allocation2 + $0x109] sm:$0xff] %vm327_vm0, %v3917_v58  ;;  %v3830_v38 = vadd.f32 1.0, %v10888_v35  ;;  %v12346_v63 = vld [vmem:[#allocation2 + $0xd9] sm:$0xff]  ;;  %v4018_v58 = vld [vmem:[#allocation2 + $0x8] sm:$0xff] }
 0x334   : > { %v10892_v0 = vpop.eup %10891  ;;  %v3920_v50 = vmul.f32 %v10890_v61, %v12221_v22  ;;  %10905 = vrcp.f32 %v3827_v60  ;;  %9756 = vmatprep.mubr.msk.f32.mxu1 %vm327_vm0, %v12346_v63  ;;  %v12432_v60 = vld [vmem:[#allocation2 + $0x18] sm:$0xff]  ;;  %v12438_v61 = vld [vmem:[#allocation2 + $0x20] sm:$0xff] }
 0x335   : > { %v10894_v3 = vpop.eup %10893  ;;  %v3919_v4 = vmul.f32 %v10892_v0, %v12227_v28  ;;  %10907 = vrcp.f32 %v3830_v38  ;;  %9757 = vmatmul.mubr.msk.f32.gmra.mrb[18].mxu1 %vm327_vm0, %v12351_v43  ;;  %v12442_v38 = vld [vmem:[#allocation2 + $0x30] sm:$0xff]  ;;  %v12446_v0 = vld [vmem:[#allocation2 + $0x38] sm:$0xff] }
 0x336   : > { %v10896_v6 = vpop.eup %10895  ;;  %4008 = vst.msk [vmem:[#allocation2 + $0x129] sm:$0xff] %vm327_vm0, %v3920_v50  ;;  %v3829_v39 = vadd.f32 1.0, %v10894_v3  ;;  %v12364_v12 = vld [vmem:[#allocation2 + $0xf9] sm:$0xff]  ;;  %v12454_v50 = vld [vmem:[#allocation2 + $0x50] sm:$0xff] }
 0x337   : > { %v10898_v41 = vpop.eup %10897  ;;  %4007 = vst.msk [vmem:[#allocation2 + $0x121] sm:$0xff] %vm327_vm0, %v3919_v4  ;;  %v3832_v22 = vadd.f32 1.0, %v10896_v6  ;;  %v12458_v3 = vld [vmem:[#allocation2 + $0x60] sm:$0xff]  ;;  %v12462_v4 = vld [vmem:[#allocation2 + $0x68] sm:$0xff]  ;;  %v12466_v6 = vld [vmem:[#allocation2 + $0x78] sm:$0xff] }
 0x338   : > { %v10900_v57 = vpop.eup %10899  ;;  %v3922_v10 = vmul.f32 %v10898_v41, %v12241_v56  ;;  %10909 = vrcp.f32 %v3829_v39  ;;  %v12359_v15 = vld [vmem:[#allocation2 + $0xf1] sm:$0xff]  ;;  %v12470_v39 = vld [vmem:[#allocation2 + $0x80] sm:$0xff] }
 0x339   : > { %v10902_v13 = vpop.eup %10901  ;;  %v3921_v28 = vmul.f32 %v10900_v57, %v12247_v37  ;;  %10911 = vrcp.f32 %v3832_v22  ;;  %9759 = vmatprep.mubr.msk.f32.mxu1 %vm327_vm0, %v12359_v15  ;;  %v12376_v37 = vld [vmem:[#allocation2 + $0x111] sm:$0xff]  ;;  %v12482_v57 = vld [vmem:[#allocation2 + $0xa8] sm:$0xff] }
 0x33a   : > { %v10904_v33 = vpop.eup %10903  ;;  %4010 = vst.msk [vmem:[#allocation2 + $0x141] sm:$0xff] %vm327_vm0, %v3922_v10  ;;  %v3831_v14 = vadd.f32 1.0, %v10902_v13  ;;  %9760 = vmatmul.mubr.msk.f32.gmra.mrb[20].mxu1 %vm327_vm0, %v12364_v12  ;;  %v12369_v56 = vld [vmem:[#allocation2 + $0x109] sm:$0xff]  ;;  %v12478_v22 = vld [vmem:[#allocation2 + $0x98] sm:$0xff]  ;;  %v12490_v13 = vld [vmem:[#allocation2 + $0xc0] sm:$0xff] }
 0x33b   : > { %4009 = vst.msk [vmem:[#allocation2 + $0x139] sm:$0xff] %vm327_vm0, %v3921_v28  ;;  %v3924_v16 = vmul.f32 %v10904_v33, %v12261_v42  ;;  %9762 = vmatprep.mubr.msk.f32.mxu1 %vm327_vm0, %v12369_v56  ;;  %v12474_v41 = vld [vmem:[#allocation2 + $0x90] sm:$0xff]  ;;  %v12494_v28 = vld [vmem:[#allocation2 + $0xc8] sm:$0xff]  ;;  %v12498_v33 = vld [vmem:[#allocation2 + $0xd8] sm:$0xff] }
 0x33c   : > { %10913 = vrcp.f32 %v3831_v14  ;;  %v12486_v10 = vld [vmem:[#allocation2 + $0xb0] sm:$0xff]  ;;  %v12502_v14 = vld [vmem:[#allocation2 + $0xe0] sm:$0xff] }
 0x33d   : > { %4012 = vst.msk [vmem:[#allocation2 + $0x159] sm:$0xff] %vm327_vm0, %v3924_v16  ;;  %v12387_v27 = vld [vmem:[#allocation2 + $0x129] sm:$0xff] }
 0x33e   : > { %v10906_v18 = vpop.eup %10905  ;;  %9763 = vmatmul.mubr.msk.f32.gmra.mrb[22].mxu1 %vm327_vm0, %v12376_v37  ;;  %v12380_v36 = vld [vmem:[#allocation2 + $0x121] sm:$0xff]  ;;  %v12506_v16 = vld [vmem:[#allocation2 + $0xf0] sm:$0xff] }
 0x33f   : > { %v10908_v20 = vpop.eup %10907  ;;  %v3923_v25 = vmul.f32 %v10906_v18, %v12265_v40  ;;  %9765 = vmatprep.mubr.msk.f32.mxu1 %vm327_vm0, %v12380_v36  ;;  %v12510_v18 = vld [vmem:[#allocation2 + $0xf8] sm:$0xff] }
 0x340   : > { %v3926_v42 = vmul.f32 %v10908_v20, %v12282_v11  ;;  %v12514_v20 = vld [vmem:[#allocation2 + $0x108] sm:$0xff] }
 0x341   : > { %4011 = vst.msk [vmem:[#allocation2 + $0x151] sm:$0xff] %vm327_vm0, %v3923_v25  ;;  %v12399_v32 = vld [vmem:[#allocation2 + $0x141] sm:$0xff]  ;;  %v12518_v25 = vld [vmem:[#allocation2 + $0x110] sm:$0xff] }
 0x342   : > { %v10910_v2 = vpop.eup %10909  ;;  %4014 = vst.msk [vmem:[#allocation2 + $0x171] sm:$0xff] %vm327_vm0, %v3926_v42  ;;  %9766 = vmatmul.mubr.msk.f32.gmra.mrb[24].mxu1 %vm327_vm0, %v12387_v27  ;;  %v12392_v46 = vld [vmem:[#allocation2 + $0x139] sm:$0xff] }
 0x343   : > { %v10912_v31 = vpop.eup %10911  ;;  %v3925_v40 = vmul.f32 %v10910_v2, %v12285_v23  ;;  %9768 = vmatprep.mubr.msk.f32.mxu1 %vm327_vm0, %v12392_v46  ;;  %v12522_v42 = vld [vmem:[#allocation2 + $0x120] sm:$0xff]  ;;  %v12526_v2 = vld [vmem:[#allocation2 + $0x128] sm:$0xff] }
 0x344   : > { %v3928_v11 = vmul.f32 %v10912_v31, %v12300_v1  ;;  %v12410_v23 = vld [vmem:[#allocation2 + $0x159] sm:$0xff] }
 0x345   : > { %4013 = vst.msk [vmem:[#allocation2 + $0x169] sm:$0xff] %vm327_vm0, %v3925_v40  ;;  %13599 = vst [vmem:[#allocation12_spill] sm:$0xff] %v12410_v23  ;;  %v12530_v31 = vld [vmem:[#allocation2 + $0x138] sm:$0xff]  ;;  %v12534_v40 = vld [vmem:[#allocation2 + $0x140] sm:$0xff] }
 0x346   : > { %v10914_v49 = vpop.eup %10913  ;;  %4016 = vst.msk [vmem:[#allocation2 + $0x189] sm:$0xff] %vm327_vm0, %v3928_v11  ;;  %9769 = vmatmul.mubr.msk.f32.gmra.mrb[26].mxu1 %vm327_vm0, %v12399_v32 }
 0x347   : > { %v3927_v51 = vmul.f32 %v10914_v49, %v12304_v5  ;;  %v249_v5 = vld [vmem:[%s13370_s3 + $0x30] sm:$0xff] }
 0x348   : > { %v12405_v52 = vld [vmem:[#allocation2 + $0x151] sm:$0xff]  ;;  %v12429_v35 = vpack.c.bf16 %v250_v29, %v249_v5  ;;  %v251_v29 = vld [vmem:[%s13370_s3 + $0x40] sm:$0xff] }
 0x349   : > { %13598 = vst [vmem:[#allocation11_spill] sm:$0xff] %v12405_v52  ;;  %4015 = vst.msk [vmem:[#allocation2 + $0x181] sm:$0xff] %vm327_vm0, %v3927_v51  ;;  %9771 = vmatprep.mubr.msk.f32.mxu1 %vm327_vm0, %v12405_v52  ;;  %v12418_v55 = vld [vmem:[#allocation2 + $0x171] sm:$0xff]  ;;  %v12570_v52 = vld [vmem:[#allocation2 + $0x22] sm:$0xff] }
 0x34a   : > { %9772 = vmatmul.mubr.msk.f32.gmra.mrb[28].mxu1 %vm327_vm0, %v12410_v23  ;;  %13601 = vst [vmem:[#allocation29_spill] sm:$0xff] %v12418_v55  ;;  %v12538_v11 = vld [vmem:[#allocation2 + $0x150] sm:$0xff]  ;;  %v12542_v49 = vld [vmem:[#allocation2 + $0x158] sm:$0xff] }
 0x34b   : > { %v12564_v23 = vld [vmem:[#allocation2 + $0x1a] sm:$0xff] }
 0x34c   : > { %v12414_v1 = vld [vmem:[#allocation2 + $0x169] sm:$0xff] }
 0x34d   : > { %13600 = vst [vmem:[#allocation26_spill] sm:$0xff] %v12414_v1  ;;  %9774 = vmatprep.mubr.msk.f32.mxu1 %vm327_vm0, %v12414_v1  ;;  %v12546_v51 = vld [vmem:[#allocation2 + $0x168] sm:$0xff]  ;;  %v12550_v5 = vld [vmem:[#allocation2 + $0x170] sm:$0xff] }
 0x34e   : > { %9775 = vmatmul.mubr.msk.f32.gmra.mrb[30].mxu1 %vm327_vm0, %v12418_v55  ;;  %v4724_v55 = vld [vmem:[#allocation2 + $0xa] sm:$0xff] }
 0x34f   : > { %9781 = vmatprep.mubr.msk.f32.mxu1 %vm327_vm0, %v4017_v53  ;;  %v4723_v53 = vld [vmem:[#allocation2 + $0x2] sm:$0xff] }
 0x352   : > { %9782 = vmatmul.mubr.msk.f32.vlgmr.msra.gmra.mrb[0].mxu1 %vm327_vm0, %v4018_v58  ;;  %v252_v58 = vld [vmem:[%s13370_s3 + $0x48] sm:$0xff] }
 0x353   : > { %10240 = vmatpush3.bf16.msra.mxu1 %v12102_v7  ;;  %9784 = vmatprep.mubr.msk.f32.mxu1 %vm327_vm0, %v12432_v60  ;;  %v12450_v7 = vld [vmem:[#allocation2 + $0x48] sm:$0xff]  ;;  %v12561_v1 = vpack.c.bf16 %v252_v58, %v251_v29  ;;  %v12586_v29 = vld [vmem:[#allocation2 + $0x52] sm:$0xff] }
 0x354   : > { %10242 = vmatprep.subr.bf16.mxu1 %v12429_v35  ;;  %13605 = vst [vmem:[#allocation4_spill] sm:$0xff] %v12586_v29  ;;  %v12590_v58 = vld [vmem:[#allocation2 + $0x62] sm:$0xff] }
 0x355   : > { %13606 = vst [vmem:[#allocation5_spill] sm:$0xff] %v12590_v58 }
 0x356   : > { %9785 = vmatmul.mubr.msk.f32.gmra.mrb[2].mxu1 %vm327_vm0, %v12438_v61 }
 0x357   : > { %9787 = vmatprep.mubr.msk.f32.mxu1 %vm327_vm0, %v12442_v38 }
 0x35a   : > { %9788 = vmatmul.mubr.msk.f32.gmra.mrb[4].mxu1 %vm327_vm0, %v12446_v0 }
 0x35b   : > { %9790 = vmatprep.mubr.msk.f32.mxu1 %vm327_vm0, %v12450_v7 }
 0x35e   : > { %9791 = vmatmul.mubr.msk.f32.gmra.mrb[6].mxu1 %vm327_vm0, %v12454_v50 }
 0x35f   : > { %9793 = vmatprep.mubr.msk.f32.mxu1 %vm327_vm0, %v12458_v3 }
 0x362   : > { %9794 = vmatmul.mubr.msk.f32.gmra.mrb[8].mxu1 %vm327_vm0, %v12462_v4 }
 0x363   : > { %9796 = vmatprep.mubr.msk.f32.mxu1 %vm327_vm0, %v12466_v6 }
 0x366   : > { %9797 = vmatmul.mubr.msk.f32.gmra.mrb[10].mxu1 %vm327_vm0, %v12470_v39 }
 0x367   : > { %9799 = vmatprep.mubr.msk.f32.mxu1 %vm327_vm0, %v12474_v41 }
 0x36a   : > { %9800 = vmatmul.mubr.msk.f32.gmra.mrb[12].mxu1 %vm327_vm0, %v12478_v22 }
 0x36b   : > { %9802 = vmatprep.mubr.msk.f32.mxu1 %vm327_vm0, %v12482_v57 }
 0x36e   : > { %9803 = vmatmul.mubr.msk.f32.gmra.mrb[14].mxu1 %vm327_vm0, %v12486_v10 }
 0x36f   : > { %9805 = vmatprep.mubr.msk.f32.mxu1 %vm327_vm0, %v12490_v13 }
 0x372   : > { %9806 = vmatmul.mubr.msk.f32.gmra.mrb[16].mxu1 %vm327_vm0, %v12494_v28 }
 0x373   : > { %9808 = vmatprep.mubr.msk.f32.mxu1 %vm327_vm0, %v12498_v33 }
 0x376   : > { %9809 = vmatmul.mubr.msk.f32.gmra.mrb[18].mxu1 %vm327_vm0, %v12502_v14 }
 0x377   : > { %9811 = vmatprep.mubr.msk.f32.mxu1 %vm327_vm0, %v12506_v16 }
 0x37a   : > { %9812 = vmatmul.mubr.msk.f32.gmra.mrb[20].mxu1 %vm327_vm0, %v12510_v18 }
 0x37b   : > { %9814 = vmatprep.mubr.msk.f32.mxu1 %vm327_vm0, %v12514_v20 }
 0x37e   : > { %9815 = vmatmul.mubr.msk.f32.gmra.mrb[22].mxu1 %vm327_vm0, %v12518_v25 }
 0x37f   : > { %9817 = vmatprep.mubr.msk.f32.mxu1 %vm327_vm0, %v12522_v42 }
 0x382   : > { %9818 = vmatmul.mubr.msk.f32.gmra.mrb[24].mxu1 %vm327_vm0, %v12526_v2 }
 0x383   : > { %9820 = vmatprep.mubr.msk.f32.mxu1 %vm327_vm0, %v12530_v31 }
 0x386   : > { %9821 = vmatmul.mubr.msk.f32.gmra.mrb[26].mxu1 %vm327_vm0, %v12534_v40 }
 0x387   : > { %9823 = vmatprep.mubr.msk.f32.mxu1 %vm327_vm0, %v12538_v11 }
 0x38a   : > { %9824 = vmatmul.mubr.msk.f32.gmra.mrb[28].mxu1 %vm327_vm0, %v12542_v49 }
 0x38b   : > { %9826 = vmatprep.mubr.msk.f32.mxu1 %vm327_vm0, %v12546_v51 }
 0x38e   : > { %9827 = vmatmul.mubr.msk.f32.gmra.mrb[30].mxu1 %vm327_vm0, %v12550_v5 }
 0x38f   : > { %9833 = vmatprep.mubr.msk.f32.mxu1 %vm327_vm0, %v4723_v53  ;;  %v12574_v53 = vld [vmem:[#allocation2 + $0x32] sm:$0xff] }
 0x390   : > { %13602 = vst [vmem:[#allocation31_spill] sm:$0xff] %v12574_v53 }
 0x392   : > { %9834 = vmatmul.mubr.msk.f32.vlgmr.msra.gmra.mrb[0].mxu1 %vm327_vm0, %v4724_v55  ;;  %v12578_v55 = vld [vmem:[#allocation2 + $0x3a] sm:$0xff] }
 0x393   : > { %10244 = vmatpush3.bf16.msra.mxu1 %v12429_v35  ;;  %9836 = vmatprep.mubr.msk.f32.mxu1 %vm327_vm0, %v12564_v23  ;;  %13603 = vst [vmem:[#allocation32_spill] sm:$0xff] %v12578_v55  ;;  %v12582_v35 = vld [vmem:[#allocation2 + $0x4a] sm:$0xff] }
 0x394   : > { %10246 = vmatprep.subr.bf16.mxu1 %v12561_v1  ;;  %13604 = vst [vmem:[#allocation3_spill] sm:$0xff] %v12582_v35 }
 0x396   : > { %9837 = vmatmul.mubr.msk.f32.gmra.mrb[2].mxu1 %vm327_vm0, %v12570_v52 }
 0x397   : > { %9839 = vmatprep.mubr.msk.f32.mxu1 %vm327_vm0, %v12574_v53  ;;  %v12594_v53 = vld [vmem:[#allocation2 + $0x6a] sm:$0xff] }
 0x398   : > { %13607 = vst [vmem:[#allocation6_spill] sm:$0xff] %v12594_v53 }
 0x39a   : > { %9840 = vmatmul.mubr.msk.f32.gmra.mrb[4].mxu1 %vm327_vm0, %v12578_v55  ;;  %v12598_v55 = vld [vmem:[#allocation2 + $0x7a] sm:$0xff] }
 0x39b   : > { %9842 = vmatprep.mubr.msk.f32.mxu1 %vm327_vm0, %v12582_v35  ;;  %13608 = vst [vmem:[#allocation7_spill] sm:$0xff] %v12598_v55  ;;  %v12602_v35 = vld [vmem:[#allocation2 + $0x82] sm:$0xff] }
 0x39c   : > { %13609 = vst [vmem:[#allocation8_spill] sm:$0xff] %v12602_v35 }
 0x39e   : > { %9843 = vmatmul.mubr.msk.f32.gmra.mrb[6].mxu1 %vm327_vm0, %v12586_v29  ;;  %v12606_v29 = vld [vmem:[#allocation2 + $0x92] sm:$0xff] }
 0x39f   : > { %9845 = vmatprep.mubr.msk.f32.mxu1 %vm327_vm0, %v12590_v58  ;;  %13610 = vst [vmem:[#allocation9_spill] sm:$0xff] %v12606_v29  ;;  %v12610_v58 = vld [vmem:[#allocation2 + $0x9a] sm:$0xff] }
 0x3a0   : > { %13611 = vst [vmem:[#allocation10_spill] sm:$0xff] %v12610_v58 }
 0x3a2   : > { %9846 = vmatmul.mubr.msk.f32.gmra.mrb[8].mxu1 %vm327_vm0, %v12594_v53  ;;  %v12614_v53 = vld [vmem:[#allocation2 + $0xaa] sm:$0xff] }
 0x3a3   : > { %9848 = vmatprep.mubr.msk.f32.mxu1 %vm327_vm0, %v12598_v55  ;;  %13612 = vst [vmem:[#allocation37_spill] sm:$0xff] %v12614_v53  ;;  %v12618_v55 = vld [vmem:[#allocation2 + $0xb2] sm:$0xff] }
 0x3a4   : > { %13613 = vst [vmem:[#allocation38_spill] sm:$0xff] %v12618_v55 }
 0x3a6   : > { %9849 = vmatmul.mubr.msk.f32.gmra.mrb[10].mxu1 %vm327_vm0, %v12602_v35  ;;  %v12622_v35 = vld [vmem:[#allocation2 + $0xc2] sm:$0xff] }
 0x3a7   : > { %9851 = vmatprep.mubr.msk.f32.mxu1 %vm327_vm0, %v12606_v29  ;;  %13614 = vst [vmem:[#allocation13_spill] sm:$0xff] %v12622_v35  ;;  %v12626_v29 = vld [vmem:[#allocation2 + $0xca] sm:$0xff] }
 0x3a8   : > { %13615 = vst [vmem:[#allocation14_spill] sm:$0xff] %v12626_v29 }
 0x3aa   : > { %9852 = vmatmul.mubr.msk.f32.gmra.mrb[12].mxu1 %vm327_vm0, %v12610_v58  ;;  %v12630_v58 = vld [vmem:[#allocation2 + $0xda] sm:$0xff] }
 0x3ab   : > { %9854 = vmatprep.mubr.msk.f32.mxu1 %vm327_vm0, %v12614_v53  ;;  %13616 = vst [vmem:[#allocation15_spill] sm:$0xff] %v12630_v58  ;;  %v12634_v53 = vld [vmem:[#allocation2 + $0xe2] sm:$0xff] }
 0x3ac   : > { %13617 = vst [vmem:[#allocation16_spill] sm:$0xff] %v12634_v53 }
 0x3ae   : > { %9855 = vmatmul.mubr.msk.f32.gmra.mrb[14].mxu1 %vm327_vm0, %v12618_v55  ;;  %v12638_v55 = vld [vmem:[#allocation2 + $0xf2] sm:$0xff] }
 0x3af   : > { %9857 = vmatprep.mubr.msk.f32.mxu1 %vm327_vm0, %v12622_v35  ;;  %13618 = vst [vmem:[#allocation17_spill] sm:$0xff] %v12638_v55  ;;  %v12642_v35 = vld [vmem:[#allocation2 + $0xfa] sm:$0xff] }
 0x3b0   : > { %13619 = vst [vmem:[#allocation18_spill] sm:$0xff] %v12642_v35 }
 0x3b2   : > { %9858 = vmatmul.mubr.msk.f32.gmra.mrb[16].mxu1 %vm327_vm0, %v12626_v29  ;;  %v12646_v29 = vld [vmem:[#allocation2 + $0x10a] sm:$0xff] }
 0x3b3   : > { %9860 = vmatprep.mubr.msk.f32.mxu1 %vm327_vm0, %v12630_v58  ;;  %13620 = vst [vmem:[#allocation19_spill] sm:$0xff] %v12646_v29  ;;  %v12650_v58 = vld [vmem:[#allocation2 + $0x112] sm:$0xff] }
 0x3b4   : > { %13621 = vst [vmem:[#allocation20_spill] sm:$0xff] %v12650_v58 }
 0x3b6   : > { %9861 = vmatmul.mubr.msk.f32.gmra.mrb[18].mxu1 %vm327_vm0, %v12634_v53  ;;  %v12654_v53 = vld [vmem:[#allocation2 + $0x122] sm:$0xff] }
 0x3b7   : > { %9863 = vmatprep.mubr.msk.f32.mxu1 %vm327_vm0, %v12638_v55  ;;  %13622 = vst [vmem:[#allocation21_spill] sm:$0xff] %v12654_v53  ;;  %v12658_v55 = vld [vmem:[#allocation2 + $0x12a] sm:$0xff] }
 0x3b8   : > { %13623 = vst [vmem:[#allocation22_spill] sm:$0xff] %v12658_v55 }
 0x3ba   : > { %9864 = vmatmul.mubr.msk.f32.gmra.mrb[20].mxu1 %vm327_vm0, %v12642_v35  ;;  %v12662_v35 = vld [vmem:[#allocation2 + $0x13a] sm:$0xff] }
 0x3bb   : > { %9866 = vmatprep.mubr.msk.f32.mxu1 %vm327_vm0, %v12646_v29  ;;  %13624 = vst [vmem:[#allocation23_spill] sm:$0xff] %v12662_v35  ;;  %v12666_v29 = vld [vmem:[#allocation2 + $0x142] sm:$0xff] }
 0x3bc   : > { %13625 = vst [vmem:[#allocation24_spill] sm:$0xff] %v12666_v29 }
 0x3be   : > { %9867 = vmatmul.mubr.msk.f32.gmra.mrb[22].mxu1 %vm327_vm0, %v12650_v58  ;;  %v12670_v58 = vld [vmem:[#allocation2 + $0x152] sm:$0xff] }
 0x3bf   : > { %9869 = vmatprep.mubr.msk.f32.mxu1 %vm327_vm0, %v12654_v53  ;;  %13626 = vst [vmem:[#allocation25_spill] sm:$0xff] %v12670_v58  ;;  %v12674_v53 = vld [vmem:[#allocation2 + $0x15a] sm:$0xff] }
 0x3c0   : > { %13627 = vst [vmem:[#allocation27_spill] sm:$0xff] %v12674_v53 }
 0x3c2   : > { %9870 = vmatmul.mubr.msk.f32.gmra.mrb[24].mxu1 %vm327_vm0, %v12658_v55  ;;  %v12678_v55 = vld [vmem:[#allocation2 + $0x16a] sm:$0xff] }
 0x3c3   : > { %9872 = vmatprep.mubr.msk.f32.mxu1 %vm327_vm0, %v12662_v35  ;;  %v12682_v35 = vld [vmem:[#allocation2 + $0x172] sm:$0xff] }
 0x3c4   : > { %13628 = vst [vmem:[#allocation28_spill] sm:$0xff] %v12682_v35 }
 0x3c6   : > { %9873 = vmatmul.mubr.msk.f32.gmra.mrb[26].mxu1 %vm327_vm0, %v12666_v29  ;;  %v253_v29 = vld [vmem:[%s13370_s3 + $0x50] sm:$0xff] }
 0x3c7   : > { %9875 = vmatprep.mubr.msk.f32.mxu1 %vm327_vm0, %v12670_v58  ;;  %v254_v58 = vld [vmem:[%s13370_s3 + $0x58] sm:$0xff] }
 0x3ca   : > { %9876 = vmatmul.mubr.msk.f32.gmra.mrb[28].mxu1 %vm327_vm0, %v12674_v53  ;;  %v10249_v53 = vpack.c.bf16 %v254_v58, %v253_v29  ;;  %v256_v29 = vld [vmem:[%s13370_s3 + $0x68] sm:$0xff] }
 0x3cb   : > { %9878 = vmatprep.mubr.msk.f32.mxu1 %vm327_vm0, %v12678_v55 }
 0x3ce   : > { %9879 = vmatmul.mubr.msk.f32.gmra.mrb[30].mxu1 %vm327_vm0, %v12682_v35 }
 0x3cf   : > { %9885 = vmatprep.mubr.msk.f32.mxu1 %vm327_vm0, %v12432_v60  ;;  %v12757_v60 = vld [vmem:[#allocation2 + $0x188] sm:$0xff] }
 0x3d2   : > { %9886 = vmatmul.mubr.msk.f32.vlgmr.msra.gmra.mrb[0].mxu1 %vm327_vm0, %v12438_v61  ;;  %v255_v61 = vld [vmem:[%s13370_s3 + $0x60] sm:$0xff] }
 0x3d3   : > { %10248 = vmatpush3.bf16.msra.mxu1 %v12561_v1  ;;  %9888 = vmatprep.mubr.msk.f32.mxu1 %vm327_vm0, %v12442_v38  ;;  %v12753_v1 = vld [vmem:[#allocation2 + $0x180] sm:$0xff]  ;;  %v10253_v58 = vpack.c.bf16 %v256_v29, %v255_v61  ;;  %v258_v61 = vld [vmem:[%s13370_s3 + $0x78] sm:$0xff] }
 0x3d4   : > { %10250 = vmatprep.subr.bf16.mxu1 %v10249_v53 }
 0x3d6   : > { %9889 = vmatmul.mubr.msk.f32.gmra.mrb[2].mxu1 %vm327_vm0, %v12446_v0 }
 0x3d7   : > { %9891 = vmatprep.mubr.msk.f32.mxu1 %vm327_vm0, %v12450_v7 }
 0x3da   : > { %9892 = vmatmul.mubr.msk.f32.gmra.mrb[4].mxu1 %vm327_vm0, %v12454_v50 }
 0x3db   : > { %9894 = vmatprep.mubr.msk.f32.mxu1 %vm327_vm0, %v12458_v3 }
 0x3de   : > { %9895 = vmatmul.mubr.msk.f32.gmra.mrb[6].mxu1 %vm327_vm0, %v12462_v4 }
 0x3df   : > { %9897 = vmatprep.mubr.msk.f32.mxu1 %vm327_vm0, %v12466_v6 }
 0x3e2   : > { %9898 = vmatmul.mubr.msk.f32.gmra.mrb[8].mxu1 %vm327_vm0, %v12470_v39 }
 0x3e3   : > { %9900 = vmatprep.mubr.msk.f32.mxu1 %vm327_vm0, %v12474_v41 }
 0x3e6   : > { %9901 = vmatmul.mubr.msk.f32.gmra.mrb[10].mxu1 %vm327_vm0, %v12478_v22 }
 0x3e7   : > { %9903 = vmatprep.mubr.msk.f32.mxu1 %vm327_vm0, %v12482_v57 }
 0x3ea   : > { %9904 = vmatmul.mubr.msk.f32.gmra.mrb[12].mxu1 %vm327_vm0, %v12486_v10 }
 0x3eb   : > { %9906 = vmatprep.mubr.msk.f32.mxu1 %vm327_vm0, %v12490_v13 }
 0x3ee   : > { %9907 = vmatmul.mubr.msk.f32.gmra.mrb[14].mxu1 %vm327_vm0, %v12494_v28 }
 0x3ef   : > { %9909 = vmatprep.mubr.msk.f32.mxu1 %vm327_vm0, %v12498_v33 }
 0x3f2   : > { %9910 = vmatmul.mubr.msk.f32.gmra.mrb[16].mxu1 %vm327_vm0, %v12502_v14 }
 0x3f3   : > { %9912 = vmatprep.mubr.msk.f32.mxu1 %vm327_vm0, %v12506_v16 }
 0x3f6   : > { %9913 = vmatmul.mubr.msk.f32.gmra.mrb[18].mxu1 %vm327_vm0, %v12510_v18 }
 0x3f7   : > { %9915 = vmatprep.mubr.msk.f32.mxu1 %vm327_vm0, %v12514_v20 }
 0x3fa   : > { %9916 = vmatmul.mubr.msk.f32.gmra.mrb[20].mxu1 %vm327_vm0, %v12518_v25 }
 0x3fb   : > { %9918 = vmatprep.mubr.msk.f32.mxu1 %vm327_vm0, %v12522_v42 }
 0x3fe   : > { %9919 = vmatmul.mubr.msk.f32.gmra.mrb[22].mxu1 %vm327_vm0, %v12526_v2 }
 0x3ff   : > { %9921 = vmatprep.mubr.msk.f32.mxu1 %vm327_vm0, %v12530_v31 }
 0x402   : > { %9922 = vmatmul.mubr.msk.f32.gmra.mrb[24].mxu1 %vm327_vm0, %v12534_v40 }
 0x403   : > { %9924 = vmatprep.mubr.msk.f32.mxu1 %vm327_vm0, %v12538_v11 }
 0x406   : > { %9925 = vmatmul.mubr.msk.f32.gmra.mrb[26].mxu1 %vm327_vm0, %v12542_v49 }
 0x407   : > { %9927 = vmatprep.mubr.msk.f32.mxu1 %vm327_vm0, %v12546_v51 }
 0x40a   : > { %9928 = vmatmul.mubr.msk.f32.gmra.mrb[28].mxu1 %vm327_vm0, %v12550_v5 }
 0x40b   : > { %9930 = vmatprep.mubr.msk.f32.mxu1 %vm327_vm0, %v12753_v1 }
 0x40e   : > { %9931 = vmatmul.mubr.msk.f32.gmra.mrb[30].mxu1 %vm327_vm0, %v12757_v60 }
 0x40f   : > { %9937 = vmatprep.mubr.msk.f32.mxu1 %vm327_vm0, %v12204_v45  ;;  %v13629_v45 = vld [vmem:[#allocation11_spill] sm:$0xff] }
 0x412   : > { %9938 = vmatmul.mubr.msk.f32.vlgmr.msra.gmra.mrb[0].mxu1 %vm327_vm0, %v12212_v44  ;;  %v13630_v44 = vld [vmem:[#allocation12_spill] sm:$0xff] }
 0x413   : > { %10252 = vmatpush3.bf16.msra.mxu1 %v10249_v53  ;;  %9940 = vmatprep.mubr.msk.f32.mxu1 %vm327_vm0, %v12223_v24  ;;  %v13631_v24 = vld [vmem:[#allocation26_spill] sm:$0xff]  ;;  %v257_v53 = vld [vmem:[%s13370_s3 + $0x70] sm:$0xff] }
 0x414   : > { %10254 = vmatprep.subr.bf16.mxu1 %v10253_v58  ;;  %v10257_v29 = vpack.c.bf16 %v258_v61, %v257_v53  ;;  %v13643_v53 = vld [vmem:[#allocation9_spill] sm:$0xff]  ;;  %v13644_v61 = vld [vmem:[#allocation10_spill] sm:$0xff] }
 0x416   : > { %9941 = vmatmul.mubr.msk.f32.gmra.mrb[2].mxu1 %vm327_vm0, %v12231_v30  ;;  %v13632_v30 = vld [vmem:[#allocation29_spill] sm:$0xff] }
 0x417   : > { %9943 = vmatprep.mubr.msk.f32.mxu1 %vm327_vm0, %v12243_v59  ;;  %v12827_v59 = vld [vmem:[#allocation2 + $0x181] sm:$0xff] }
 0x418   : > { %13633 = vst [vmem:[#allocation30_spill] sm:$0xff] %v12827_v59 }
 0x41a   : > { %9944 = vmatmul.mubr.msk.f32.gmra.mrb[4].mxu1 %vm327_vm0, %v12251_v62  ;;  %v12831_v62 = vld [vmem:[#allocation2 + $0x189] sm:$0xff] }
 0x41b   : > { %9946 = vmatprep.mubr.msk.f32.mxu1 %vm327_vm0, %v12269_v17  ;;  %13634 = vst [vmem:[#allocation33_spill] sm:$0xff] %v12831_v62 }
 0x41e   : > { %9947 = vmatmul.mubr.msk.f32.gmra.mrb[6].mxu1 %vm327_vm0, %v12275_v21 }
 0x41f   : > { %9949 = vmatprep.mubr.msk.f32.mxu1 %vm327_vm0, %v12289_v54 }
 0x422   : > { %9950 = vmatmul.mubr.msk.f32.gmra.mrb[8].mxu1 %vm327_vm0, %v12294_v47 }
 0x423   : > { %9952 = vmatprep.mubr.msk.f32.mxu1 %vm327_vm0, %v12308_v48 }
 0x426   : > { %9953 = vmatmul.mubr.msk.f32.gmra.mrb[10].mxu1 %vm327_vm0, %v12314_v8 }
 0x427   : > { %9955 = vmatprep.mubr.msk.f32.mxu1 %vm327_vm0, %v12320_v19 }
 0x42a   : > { %9956 = vmatmul.mubr.msk.f32.gmra.mrb[12].mxu1 %vm327_vm0, %v12326_v26 }
 0x42b   : > { %9958 = vmatprep.mubr.msk.f32.mxu1 %vm327_vm0, %v12333_v9 }
 0x42e   : > { %9959 = vmatmul.mubr.msk.f32.gmra.mrb[14].mxu1 %vm327_vm0, %v12338_v34 }
 0x42f   : > { %9961 = vmatprep.mubr.msk.f32.mxu1 %vm327_vm0, %v12346_v63 }
 0x432   : > { %9962 = vmatmul.mubr.msk.f32.gmra.mrb[16].mxu1 %vm327_vm0, %v12351_v43 }
 0x433   : > { %9964 = vmatprep.mubr.msk.f32.mxu1 %vm327_vm0, %v12359_v15 }
 0x436   : > { %9965 = vmatmul.mubr.msk.f32.gmra.mrb[18].mxu1 %vm327_vm0, %v12364_v12 }
 0x437   : > { %9967 = vmatprep.mubr.msk.f32.mxu1 %vm327_vm0, %v12369_v56 }
 0x43a   : > { %9968 = vmatmul.mubr.msk.f32.gmra.mrb[20].mxu1 %vm327_vm0, %v12376_v37 }
 0x43b   : > { %9970 = vmatprep.mubr.msk.f32.mxu1 %vm327_vm0, %v12380_v36 }
 0x43e   : > { %9971 = vmatmul.mubr.msk.f32.gmra.mrb[22].mxu1 %vm327_vm0, %v12387_v27 }
 0x43f   : > { %9973 = vmatprep.mubr.msk.f32.mxu1 %vm327_vm0, %v12392_v46 }
 0x442   : > { %9974 = vmatmul.mubr.msk.f32.gmra.mrb[24].mxu1 %vm327_vm0, %v12399_v32 }
 0x443   : > { %9976 = vmatprep.mubr.msk.f32.mxu1 %vm327_vm0, %v13629_v45 }
 0x446   : > { %9977 = vmatmul.mubr.msk.f32.gmra.mrb[26].mxu1 %vm327_vm0, %v13630_v44  ;;  %v13638_v44 = vld [vmem:[#allocation4_spill] sm:$0xff] }
 0x447   : > { %9979 = vmatprep.mubr.msk.f32.mxu1 %vm327_vm0, %v13631_v24  ;;  %v13637_v24 = vld [vmem:[#allocation3_spill] sm:$0xff] }
 0x44a   : > { %9980 = vmatmul.mubr.msk.f32.gmra.mrb[28].mxu1 %vm327_vm0, %v13632_v30  ;;  %v13636_v30 = vld [vmem:[#allocation32_spill] sm:$0xff] }
 0x44b   : > { %9982 = vmatprep.mubr.msk.f32.mxu1 %vm327_vm0, %v12827_v59  ;;  %v13635_v59 = vld [vmem:[#allocation31_spill] sm:$0xff] }
 0x44e   : > { %9983 = vmatmul.mubr.msk.f32.gmra.mrb[30].mxu1 %vm327_vm0, %v12831_v62  ;;  %v13639_v62 = vld [vmem:[#allocation5_spill] sm:$0xff] }
 0x44f   : > { %9989 = vmatprep.mubr.msk.f32.mxu1 %vm327_vm0, %v12564_v23  ;;  %v13640_v23 = vld [vmem:[#allocation6_spill] sm:$0xff] }
 0x452   : > { %9990 = vmatmul.mubr.msk.f32.vlgmr.msra.gmra.mrb[0].mxu1 %vm327_vm0, %v12570_v52  ;;  %v13641_v52 = vld [vmem:[#allocation7_spill] sm:$0xff] }
 0x453   : > { %10256 = vmatpush3.bf16.msra.mxu1 %v10253_v58  ;;  %9992 = vmatprep.mubr.msk.f32.mxu1 %vm327_vm0, %v13635_v59  ;;  %v13642_v58 = vld [vmem:[#allocation8_spill] sm:$0xff] }
 0x454   : > { %10258 = vmatprep.subr.bf16.mxu1 %v10257_v29 }
 0x456   : > { %9993 = vmatmul.mubr.msk.f32.gmra.mrb[2].mxu1 %vm327_vm0, %v13636_v30 }
 0x457   : > { %9995 = vmatprep.mubr.msk.f32.mxu1 %vm327_vm0, %v13637_v24  ;;  %v13645_v24 = vld [vmem:[#allocation37_spill] sm:$0xff] }
 0x45a   : > { %9996 = vmatmul.mubr.msk.f32.gmra.mrb[4].mxu1 %vm327_vm0, %v13638_v44  ;;  %v13646_v44 = vld [vmem:[#allocation38_spill] sm:$0xff] }
 0x45b   : > { %9998 = vmatprep.mubr.msk.f32.mxu1 %vm327_vm0, %v13639_v62  ;;  %v13647_v62 = vld [vmem:[#allocation13_spill] sm:$0xff] }
 0x45e   : > { %9999 = vmatmul.mubr.msk.f32.gmra.mrb[6].mxu1 %vm327_vm0, %v13640_v23  ;;  %v13648_v23 = vld [vmem:[#allocation14_spill] sm:$0xff] }
 0x45f   : > { %10001 = vmatprep.mubr.msk.f32.mxu1 %vm327_vm0, %v13641_v52  ;;  %v13649_v52 = vld [vmem:[#allocation15_spill] sm:$0xff] }
 0x462   : > { %10002 = vmatmul.mubr.msk.f32.gmra.mrb[8].mxu1 %vm327_vm0, %v13642_v58  ;;  %v13650_v58 = vld [vmem:[#allocation16_spill] sm:$0xff] }
 0x463   : > { %10004 = vmatprep.mubr.msk.f32.mxu1 %vm327_vm0, %v13643_v53  ;;  %v13651_v53 = vld [vmem:[#allocation17_spill] sm:$0xff] }
 0x466   : > { %10005 = vmatmul.mubr.msk.f32.gmra.mrb[10].mxu1 %vm327_vm0, %v13644_v61  ;;  %v13652_v61 = vld [vmem:[#allocation18_spill] sm:$0xff] }
 0x467   : > { %10007 = vmatprep.mubr.msk.f32.mxu1 %vm327_vm0, %v13645_v24  ;;  %v13653_v24 = vld [vmem:[#allocation19_spill] sm:$0xff] }
 0x46a   : > { %10008 = vmatmul.mubr.msk.f32.gmra.mrb[12].mxu1 %vm327_vm0, %v13646_v44  ;;  %v13654_v44 = vld [vmem:[#allocation20_spill] sm:$0xff] }
 0x46b   : > { %10010 = vmatprep.mubr.msk.f32.mxu1 %vm327_vm0, %v13647_v62  ;;  %v13655_v62 = vld [vmem:[#allocation21_spill] sm:$0xff] }
 0x46e   : > { %10011 = vmatmul.mubr.msk.f32.gmra.mrb[14].mxu1 %vm327_vm0, %v13648_v23  ;;  %v13656_v23 = vld [vmem:[#allocation22_spill] sm:$0xff] }
 0x46f   : > { %10013 = vmatprep.mubr.msk.f32.mxu1 %vm327_vm0, %v13649_v52  ;;  %v13657_v52 = vld [vmem:[#allocation23_spill] sm:$0xff] }
 0x472   : > { %10014 = vmatmul.mubr.msk.f32.gmra.mrb[16].mxu1 %vm327_vm0, %v13650_v58  ;;  %v13658_v58 = vld [vmem:[#allocation24_spill] sm:$0xff] }
 0x473   : > { %10016 = vmatprep.mubr.msk.f32.mxu1 %vm327_vm0, %v13651_v53  ;;  %v13659_v53 = vld [vmem:[#allocation25_spill] sm:$0xff] }
 0x476   : > { %10017 = vmatmul.mubr.msk.f32.gmra.mrb[18].mxu1 %vm327_vm0, %v13652_v61  ;;  %v13660_v61 = vld [vmem:[#allocation27_spill] sm:$0xff] }
 0x477   : > { %10019 = vmatprep.mubr.msk.f32.mxu1 %vm327_vm0, %v13653_v24 }
 0x47a   : > { %10020 = vmatmul.mubr.msk.f32.gmra.mrb[20].mxu1 %vm327_vm0, %v13654_v44 }
 0x47b   : > { %10022 = vmatprep.mubr.msk.f32.mxu1 %vm327_vm0, %v13655_v62  ;;  %v12901_v62 = vld [vmem:[#allocation2 + $0x182] sm:$0xff] }
 0x47e   : > { %10023 = vmatmul.mubr.msk.f32.gmra.mrb[22].mxu1 %vm327_vm0, %v13656_v23 }
 0x47f   : > { %10025 = vmatprep.mubr.msk.f32.mxu1 %vm327_vm0, %v13657_v52  ;;  %v12905_v52 = vld [vmem:[#allocation2 + $0x18a] sm:$0xff] }
 0x482   : > { %10026 = vmatmul.mubr.msk.f32.gmra.mrb[24].mxu1 %vm327_vm0, %v13658_v58 }
 0x483   : > { %10028 = vmatprep.mubr.msk.f32.mxu1 %vm327_vm0, %v13659_v53  ;;  %v259_v53 = vld [vmem:[%s13370_s3 + $0x80] sm:$0xff] }
 0x486   : > { %10029 = vmatmul.mubr.msk.f32.gmra.mrb[26].mxu1 %vm327_vm0, %v13660_v61  ;;  %v260_v61 = vld [vmem:[%s13370_s3 + $0x88] sm:$0xff] }
 0x487   : > { %10031 = vmatprep.mubr.msk.f32.mxu1 %vm327_vm0, %v12678_v55 }
 0x48a   : > { %10032 = vmatmul.mubr.msk.f32.gmra.mrb[28].mxu1 %vm327_vm0, %v12682_v35  ;;  %v10261_v35 = vpack.c.bf16 %v260_v61, %v259_v53  ;;  %v8613_v53 = vld [vmem:[%s11114_s10 + $0x49] sm:$0xff] }
 0x48b   : > { %10034 = vmatprep.mubr.msk.f32.mxu1 %vm327_vm0, %v12901_v62 }
 0x48e   : > { %10035 = vmatmul.mubr.msk.f32.gmra.mrb[30].mxu1 %vm327_vm0, %v12905_v52 }
 0x48f   : > { %10041 = vmatprep.mubr.msk.f32.mxu1 %vm327_vm0, %v12442_v38  ;;  %v6294_v38 = vld [vmem:[#allocation2 + $0x198] sm:$0xff] }
 0x492   : > { %10042 = vmatmul.mubr.msk.f32.vlgmr.msra.gmra.mrb[0].mxu1 %vm327_vm0, %v12446_v0  ;;  %v6295_v0 = vld [vmem:[#allocation2 + $0x1a0] sm:$0xff] }
 0x493   : > { %10260 = vmatpush3.bf16.msra.mxu1 %v10257_v29  ;;  %10044 = vmatprep.mubr.msk.f32.mxu1 %vm327_vm0, %v12450_v7  ;;  %v6649_v7 = vld [vmem:[#allocation2 + $0x31] sm:$0xff] }
 0x494   : > { %10262 = vmatprep.subr.bf16.mxu1 %v10261_v35  ;;  %v8614_v29 = vld [vmem:[%s11114_s10 + $0x51] sm:$0xff] }
 0x496   : > { %10045 = vmatmul.mubr.msk.f32.gmra.mrb[2].mxu1 %vm327_vm0, %v12454_v50  ;;  %v6650_v50 = vld [vmem:[#allocation2 + $0x39] sm:$0xff] }
 0x497   : > { %10047 = vmatprep.mubr.msk.f32.mxu1 %vm327_vm0, %v12458_v3  ;;  %v6651_v3 = vld [vmem:[#allocation2 + $0x49] sm:$0xff] }
 0x49a   : > { %10048 = vmatmul.mubr.msk.f32.gmra.mrb[4].mxu1 %vm327_vm0, %v12462_v4  ;;  %v6652_v4 = vld [vmem:[#allocation2 + $0x51] sm:$0xff] }
 0x49b   : > { %10050 = vmatprep.mubr.msk.f32.mxu1 %vm327_vm0, %v12466_v6  ;;  %v13679_v6 = vld [vmem:[#allocation16_spill] sm:$0xff] }
 0x49e   : > { %10051 = vmatmul.mubr.msk.f32.gmra.mrb[6].mxu1 %vm327_vm0, %v12470_v39  ;;  %v13680_v39 = vld [vmem:[#allocation17_spill] sm:$0xff] }
 0x49f   : > { %10053 = vmatprep.mubr.msk.f32.mxu1 %vm327_vm0, %v12474_v41  ;;  %v13681_v41 = vld [vmem:[#allocation18_spill] sm:$0xff] }
 0x4a2   : > { %10054 = vmatmul.mubr.msk.f32.gmra.mrb[8].mxu1 %vm327_vm0, %v12478_v22  ;;  %v13682_v22 = vld [vmem:[#allocation21_spill] sm:$0xff] }
 0x4a3   : > { %10056 = vmatprep.mubr.msk.f32.mxu1 %vm327_vm0, %v12482_v57  ;;  %v13683_v57 = vld [vmem:[#allocation23_spill] sm:$0xff] }
 0x4a6   : > { %10057 = vmatmul.mubr.msk.f32.gmra.mrb[10].mxu1 %vm327_vm0, %v12486_v10  ;;  %v13684_v10 = vld [vmem:[#allocation25_spill] sm:$0xff] }
 0x4a7   : > { %10059 = vmatprep.mubr.msk.f32.mxu1 %vm327_vm0, %v12490_v13  ;;  %v13685_v13 = vld [vmem:[#allocation27_spill] sm:$0xff] }
 0x4aa   : > { %10060 = vmatmul.mubr.msk.f32.gmra.mrb[12].mxu1 %vm327_vm0, %v12494_v28  ;;  %v13686_v28 = vld [vmem:[#allocation28_spill] sm:$0xff] }
 0x4ab   : > { %10062 = vmatprep.mubr.msk.f32.mxu1 %vm327_vm0, %v12498_v33  ;;  %v7064_v33 = vld [vmem:[#allocation2 + $0x19a] sm:$0xff] }
 0x4ae   : > { %10063 = vmatmul.mubr.msk.f32.gmra.mrb[14].mxu1 %vm327_vm0, %v12502_v14  ;;  %v7065_v14 = vld [vmem:[#allocation2 + $0x1a2] sm:$0xff] }
 0x4af   : > { %10065 = vmatprep.mubr.msk.f32.mxu1 %vm327_vm0, %v12506_v16  ;;  %v13100_v16 = vld [vmem:[%s13371_s4] ss:$0 sm:$0xff] }
 0x4b2   : > { %10066 = vmatmul.mubr.msk.f32.gmra.mrb[16].mxu1 %vm327_vm0, %v12510_v18 }
 0x4b3   : > { %10068 = vmatprep.mubr.msk.f32.mxu1 %vm327_vm0, %v12514_v20  ;;  %v8610_v20 = vld [vmem:[%s11114_s10 + $0x21] sm:$0xff] }
 0x4b6   : > { %10069 = vmatmul.mubr.msk.f32.gmra.mrb[18].mxu1 %vm327_vm0, %v12518_v25 }
 0x4b7   : > { %10071 = vmatprep.mubr.msk.f32.mxu1 %vm327_vm0, %v12522_v42 }
 0x4ba   : > { %10072 = vmatmul.mubr.msk.f32.gmra.mrb[20].mxu1 %vm327_vm0, %v12526_v2  ;;  %v8609_v2 = vld [vmem:[%s11114_s10 + $0x19] sm:$0xff] }
 0x4bb   : > { %10074 = vmatprep.mubr.msk.f32.mxu1 %vm327_vm0, %v12530_v31 }
 0x4be   : > { %10075 = vmatmul.mubr.msk.f32.gmra.mrb[22].mxu1 %vm327_vm0, %v12534_v40 }
 0x4bf   : > { %10077 = vmatprep.mubr.msk.f32.mxu1 %vm327_vm0, %v12538_v11 }
 0x4c2   : > { %10078 = vmatmul.mubr.msk.f32.gmra.mrb[24].mxu1 %vm327_vm0, %v12542_v49 }
 0x4c3   : > { %10080 = vmatprep.mubr.msk.f32.mxu1 %vm327_vm0, %v12546_v51  ;;  %v8612_v51 = vld [vmem:[%s11114_s10 + $0x39] sm:$0xff] }
 0x4c6   : > { %10081 = vmatmul.mubr.msk.f32.gmra.mrb[26].mxu1 %vm327_vm0, %v12550_v5 }
 0x4c7   : > { %10083 = vmatprep.mubr.msk.f32.mxu1 %vm327_vm0, %v12753_v1  ;;  %v8611_v1 = vld [vmem:[%s11114_s10 + $0x31] sm:$0xff] }
 0x4ca   : > { %10084 = vmatmul.mubr.msk.f32.gmra.mrb[28].mxu1 %vm327_vm0, %v12757_v60 }
 0x4cb   : > { %10086 = vmatprep.mubr.msk.f32.mxu1 %vm327_vm0, %v6294_v38 }
 0x4ce   : > { %10087 = vmatmul.mubr.msk.f32.gmra.mrb[30].mxu1 %vm327_vm0, %v6295_v0 }
 0x4cf   : > { %10093 = vmatprep.mubr.msk.f32.mxu1 %vm327_vm0, %v6649_v7 }
 0x4d2   : > { %10094 = vmatmul.mubr.msk.f32.vlgmr.msra.gmra.mrb[0].mxu1 %vm327_vm0, %v6650_v50 }
 0x4d3   : > { %10264 = vmatpush3.bf16.msra.mxu1 %v10261_v35  ;;  %10096 = vmatprep.mubr.msk.f32.mxu1 %vm327_vm0, %v6651_v3 }
 0x4d6   : > { %10097 = vmatmul.mubr.msk.f32.gmra.mrb[2].mxu1 %vm327_vm0, %v6652_v4 }
 0x4d7   : > { %10099 = vmatprep.mubr.msk.f32.mxu1 %vm327_vm0, %v12269_v17  ;;  %v13661_v17 = vld [vmem:[#allocation12_spill] sm:$0xff] }
 0x4da   : > { %10100 = vmatmul.mubr.msk.f32.gmra.mrb[4].mxu1 %vm327_vm0, %v12275_v21  ;;  %v13662_v21 = vld [vmem:[#allocation26_spill] sm:$0xff] }
 0x4db   : > { %10102 = vmatprep.mubr.msk.f32.mxu1 %vm327_vm0, %v12289_v54  ;;  %v13663_v54 = vld [vmem:[#allocation29_spill] sm:$0xff] }
 0x4de   : > { %10103 = vmatmul.mubr.msk.f32.gmra.mrb[6].mxu1 %vm327_vm0, %v12294_v47  ;;  %v13664_v47 = vld [vmem:[#allocation30_spill] sm:$0xff] }
 0x4df   : > { %10105 = vmatprep.mubr.msk.f32.mxu1 %vm327_vm0, %v12308_v48  ;;  %v6679_v48 = vld [vmem:[#allocation2 + $0x199] sm:$0xff] }
 0x4e2   : > { %10106 = vmatmul.mubr.msk.f32.gmra.mrb[8].mxu1 %vm327_vm0, %v12314_v8  ;;  %v13665_v8 = vld [vmem:[#allocation33_spill] sm:$0xff] }
 0x4e3   : > { %10108 = vmatprep.mubr.msk.f32.mxu1 %vm327_vm0, %v12320_v19  ;;  %v6680_v19 = vld [vmem:[#allocation2 + $0x1a1] sm:$0xff] }
 0x4e6   : > { %10109 = vmatmul.mubr.msk.f32.gmra.mrb[10].mxu1 %vm327_vm0, %v12326_v26  ;;  %v13666_v26 = vld [vmem:[#allocation3_spill] sm:$0xff] }
 0x4e7   : > { %10111 = vmatprep.mubr.msk.f32.mxu1 %vm327_vm0, %v12333_v9  ;;  %v13667_v9 = vld [vmem:[#allocation4_spill] sm:$0xff] }
 0x4ea   : > { %10112 = vmatmul.mubr.msk.f32.gmra.mrb[12].mxu1 %vm327_vm0, %v12338_v34  ;;  %v13668_v34 = vld [vmem:[#allocation5_spill] sm:$0xff] }
 0x4eb   : > { %10114 = vmatprep.mubr.msk.f32.mxu1 %vm327_vm0, %v12346_v63  ;;  %v13669_v63 = vld [vmem:[#allocation6_spill] sm:$0xff] }
 0x4ee   : > { %10115 = vmatmul.mubr.msk.f32.gmra.mrb[14].mxu1 %vm327_vm0, %v12351_v43  ;;  %v13670_v43 = vld [vmem:[#allocation7_spill] sm:$0xff] }
 0x4ef   : > { %10117 = vmatprep.mubr.msk.f32.mxu1 %vm327_vm0, %v12359_v15  ;;  %v13671_v15 = vld [vmem:[#allocation8_spill] sm:$0xff] }
 0x4f2   : > { %10118 = vmatmul.mubr.msk.f32.gmra.mrb[16].mxu1 %vm327_vm0, %v12364_v12  ;;  %v13672_v12 = vld [vmem:[#allocation9_spill] sm:$0xff] }
 0x4f3   : > { %10120 = vmatprep.mubr.msk.f32.mxu1 %vm327_vm0, %v12369_v56  ;;  %v13673_v56 = vld [vmem:[#allocation10_spill] sm:$0xff] }
 0x4f6   : > { %10121 = vmatmul.mubr.msk.f32.gmra.mrb[18].mxu1 %vm327_vm0, %v12376_v37  ;;  %v13674_v37 = vld [vmem:[#allocation37_spill] sm:$0xff] }
 0x4f7   : > { %10123 = vmatprep.mubr.msk.f32.mxu1 %vm327_vm0, %v12380_v36  ;;  %v13675_v36 = vld [vmem:[#allocation38_spill] sm:$0xff] }
 0x4fa   : > { %10124 = vmatmul.mubr.msk.f32.gmra.mrb[20].mxu1 %vm327_vm0, %v12387_v27  ;;  %v13676_v27 = vld [vmem:[#allocation13_spill] sm:$0xff] }
 0x4fb   : > { %10126 = vmatprep.mubr.msk.f32.mxu1 %vm327_vm0, %v12392_v46  ;;  %v13677_v46 = vld [vmem:[#allocation14_spill] sm:$0xff] }
 0x4fe   : > { %10127 = vmatmul.mubr.msk.f32.gmra.mrb[22].mxu1 %vm327_vm0, %v12399_v32  ;;  %v13678_v32 = vld [vmem:[#allocation15_spill] sm:$0xff] }
 0x4ff   : > { %10129 = vmatprep.mubr.msk.f32.mxu1 %vm327_vm0, %v13629_v45 }
 0x502   : > { %10130 = vmatmul.mubr.msk.f32.gmra.mrb[24].mxu1 %vm327_vm0, %v13661_v17  ;;  %v8616_v17 = vld [vmem:[%s11114_s10 + $0x69] sm:$0xff] }
 0x503   : > { %10132 = vmatprep.mubr.msk.f32.mxu1 %vm327_vm0, %v13662_v21 }
 0x506   : > { %10133 = vmatmul.mubr.msk.f32.gmra.mrb[26].mxu1 %vm327_vm0, %v13663_v54 }
 0x507   : > { %10135 = vmatprep.mubr.msk.f32.mxu1 %vm327_vm0, %v13664_v47 }
 0x50a   : > { %10136 = vmatmul.mubr.msk.f32.gmra.mrb[28].mxu1 %vm327_vm0, %v13665_v8 }
 0x50b   : > { %10138 = vmatprep.mubr.msk.f32.mxu1 %vm327_vm0, %v6679_v48  ;;  %v8615_v48 = vld [vmem:[%s11114_s10 + $0x61] sm:$0xff] }
 0x50e   : > { %10139 = vmatmul.mubr.msk.f32.gmra.mrb[30].mxu1 %vm327_vm0, %v6680_v19 }
 0x50f   : > { %10145 = vmatprep.mubr.msk.f32.mxu1 %vm327_vm0, %v13635_v59 }
 0x512   : > { %10146 = vmatmul.mubr.msk.f32.vlgmr.msra.gmra.mrb[0].mxu1 %vm327_vm0, %v13636_v30 }
 0x513   : > { %10148 = vmatprep.mubr.msk.f32.mxu1 %vm327_vm0, %v13666_v26 }
 0x516   : > { %10149 = vmatmul.mubr.msk.f32.gmra.mrb[2].mxu1 %vm327_vm0, %v13667_v9 }
 0x517   : > { %10151 = vmatprep.mubr.msk.f32.mxu1 %vm327_vm0, %v13668_v34 }
 0x51a   : > { %10152 = vmatmul.mubr.msk.f32.gmra.mrb[4].mxu1 %vm327_vm0, %v13669_v63 }
 0x51b   : > { %10154 = vmatprep.mubr.msk.f32.mxu1 %vm327_vm0, %v13670_v43 }
 0x51e   : > { %10155 = vmatmul.mubr.msk.f32.gmra.mrb[6].mxu1 %vm327_vm0, %v13671_v15  ;;  %v8618_v15 = vld [vmem:[%s11114_s10 + $0x81] sm:$0xff] }
 0x51f   : > { %10157 = vmatprep.mubr.msk.f32.mxu1 %vm327_vm0, %v13672_v12 }
 0x522   : > { %10158 = vmatmul.mubr.msk.f32.gmra.mrb[8].mxu1 %vm327_vm0, %v13673_v56 }
 0x523   : > { %10160 = vmatprep.mubr.msk.f32.mxu1 %vm327_vm0, %v13674_v37 }
 0x526   : > { %10161 = vmatmul.mubr.msk.f32.gmra.mrb[10].mxu1 %vm327_vm0, %v13675_v36  ;;  %v8617_v36 = vld [vmem:[%s11114_s10 + $0x79] sm:$0xff] }
 0x527   : > { %10163 = vmatprep.mubr.msk.f32.mxu1 %vm327_vm0, %v13676_v27 }
 0x52a   : > { %10164 = vmatmul.mubr.msk.f32.gmra.mrb[12].mxu1 %vm327_vm0, %v13677_v46 }
 0x52b   : > { %10166 = vmatprep.mubr.msk.f32.mxu1 %vm327_vm0, %v13678_v32 }
 0x52e   : > { %10167 = vmatmul.mubr.msk.f32.gmra.mrb[14].mxu1 %vm327_vm0, %v13679_v6 }
 0x52f   : > { %10169 = vmatprep.mubr.msk.f32.mxu1 %vm327_vm0, %v13680_v39 }
 0x532   : > { %10170 = vmatmul.mubr.msk.f32.gmra.mrb[16].mxu1 %vm327_vm0, %v13681_v41 }
 0x533   : > { %10172 = vmatprep.mubr.msk.f32.mxu1 %vm327_vm0, %v13653_v24 }
 0x536   : > { %10173 = vmatmul.mubr.msk.f32.gmra.mrb[18].mxu1 %vm327_vm0, %v13654_v44 }
 0x537   : > { %10175 = vmatprep.mubr.msk.f32.mxu1 %vm327_vm0, %v13682_v22 }
 0x53a   : > { %10176 = vmatmul.mubr.msk.f32.gmra.mrb[20].mxu1 %vm327_vm0, %v13656_v23 }
 0x53b   : > { %10178 = vmatprep.mubr.msk.f32.mxu1 %vm327_vm0, %v13683_v57 }
 0x53e   : > { %10179 = vmatmul.mubr.msk.f32.gmra.mrb[22].mxu1 %vm327_vm0, %v13658_v58 }
 0x53f   : > { %10181 = vmatprep.mubr.msk.f32.mxu1 %vm327_vm0, %v13684_v10 }
 0x542   : > { %10182 = vmatmul.mubr.msk.f32.gmra.mrb[24].mxu1 %vm327_vm0, %v13685_v13 }
 0x543   : > { %10184 = vmatprep.mubr.msk.f32.mxu1 %vm327_vm0, %v12678_v55 }
 0x546   : > { %10185 = vmatmul.mubr.msk.f32.gmra.mrb[26].mxu1 %vm327_vm0, %v13686_v28  ;;  %v8620_v28 = vld [vmem:[%s11114_s10 + $0x99] sm:$0xff] }
 0x547   : > { %10187 = vmatprep.mubr.msk.f32.mxu1 %vm327_vm0, %v12901_v62 }
 0x54a   : > { %10188 = vmatmul.mubr.msk.f32.gmra.mrb[28].mxu1 %vm327_vm0, %v12905_v52 }
 0x54b   : > { %10190 = vmatprep.mubr.msk.f32.mxu1 %vm327_vm0, %v7064_v33 }
 0x54e   : > { %10191 = vmatmul.mubr.msk.f32.gmra.mrb[30].mxu1 %vm327_vm0, %v7065_v14 }
 0x5e5   : > { %v10147_v18 = vpop.f32.mrb[0].mxu1 }
 0x5e6   : > { %v7458_v25 = vadd.f32 %v10147_v18, %v13100_v16  ;;  %v7228_v42 = vpop.f32.mrb[1].mxu1 }
 0x5e7   : > { %v7457_v31 = vadd.f32 %v13100_v16, %v7228_v42 }
 0x5e8   : > { %v13106_v40 = vadd.f32 %v8610_v20, %v7458_v25  ;;  %v8619_v25 = vld [vmem:[%s11114_s10 + $0x91] sm:$0xff] }
 0x5e9   : > { %v13108_v11 = vadd.f32 %v8609_v2, %v7457_v31  ;;  %v10150_v49 = vpop.f32.mrb[2].mxu1 }
 0x5ea   : > { %v7522_v5 = vsub.f32 0.0, %v13106_v40  ;;  %v7460_v55 = vadd.f32 %v10150_v49, %v13100_v16  ;;  %v7238_v35 = vpop.f32.mrb[3].mxu1 }
 0x5eb   : > { %v7521_v60 = vsub.f32 0.0, %v13108_v11  ;;  %v7459_v45 = vadd.f32 %v13100_v16, %v7238_v35 }
 0x5ec   : > { %v7555_v44 = vmul.f32 1.442695, %v7522_v5  ;;  %v13116_v24 = vadd.f32 %v8612_v51, %v7460_v55 }
 0x5ed   : > { %v7553_v30 = vmul.f32 1.442695, %v7521_v60  ;;  %v13118_v59 = vadd.f32 %v8611_v1, %v7459_v45  ;;  %v10153_v62 = vpop.f32.mrb[4].mxu1  ;;  %v8622_v45 = vld [vmem:[%s11114_s10 + $0xb1] sm:$0xff] }
 0x5ee   : > { %10915 = vpow2.f32 %v7555_v44  ;;  %v7524_v23 = vsub.f32 0.0, %v13116_v24  ;;  %v7462_v52 = vadd.f32 %v10153_v62, %v13100_v16  ;;  %v7248_v58 = vpop.f32.mrb[5].mxu1 }
 0x5ef   : > { %10917 = vpow2.f32 %v7553_v30  ;;  %v7523_v61 = vsub.f32 0.0, %v13118_v59  ;;  %v7461_v38 = vadd.f32 %v13100_v16, %v7248_v58 }
 0x5f0   : > { %v7559_v0 = vmul.f32 1.442695, %v7524_v23  ;;  %v13126_v7 = vadd.f32 %v8614_v29, %v7462_v52  ;;  %v8621_v23 = vld [vmem:[%s11114_s10 + $0xa9] sm:$0xff] }
 0x5f1   : > { %v7557_v50 = vmul.f32 1.442695, %v7523_v61  ;;  %v13128_v3 = vadd.f32 %v8613_v53, %v7461_v38  ;;  %v10156_v4 = vpop.f32.mrb[6].mxu1 }
 0x5f2   : > { %10919 = vpow2.f32 %v7559_v0  ;;  %v7526_v21 = vsub.f32 0.0, %v13126_v7  ;;  %v7464_v54 = vadd.f32 %v10156_v4, %v13100_v16  ;;  %v7258_v47 = vpop.f32.mrb[7].mxu1 }
 0x5f3   : > { %10921 = vpow2.f32 %v7557_v50  ;;  %v7525_v8 = vsub.f32 0.0, %v13128_v3  ;;  %v7463_v19 = vadd.f32 %v13100_v16, %v7258_v47 }
 0x5f4   : > { %v7563_v26 = vmul.f32 1.442695, %v7526_v21  ;;  %v13136_v9 = vadd.f32 %v8616_v17, %v7464_v54  ;;  %v8624_v54 = vld [vmem:[%s11114_s10 + $0xc9] sm:$0xff] }
 0x5f5   : > { %v7561_v34 = vmul.f32 1.442695, %v7525_v8  ;;  %v13138_v63 = vadd.f32 %v8615_v48, %v7463_v19  ;;  %v10159_v43 = vpop.f32.mrb[8].mxu1 }
 0x5f6   : > { %10923 = vpow2.f32 %v7563_v26  ;;  %v7528_v12 = vsub.f32 0.0, %v13136_v9  ;;  %v7466_v56 = vadd.f32 %v10159_v43, %v13100_v16  ;;  %v7268_v37 = vpop.f32.mrb[9].mxu1  ;;  %v8623_v26 = vld [vmem:[%s11114_s10 + $0xc1] sm:$0xff] }
 0x5f7   : > { %10925 = vpow2.f32 %v7561_v34  ;;  %v7527_v27 = vsub.f32 0.0, %v13138_v63  ;;  %v7465_v46 = vadd.f32 %v13100_v16, %v7268_v37 }
 0x5f8   : > { %v10916_v32 = vpop.eup %10915  ;;  %v7567_v6 = vmul.f32 1.442695, %v7528_v12  ;;  %v13146_v39 = vadd.f32 %v8618_v15, %v7466_v56 }
 0x5f9   : > { %v10918_v41 = vpop.eup %10917  ;;  %v7618_v22 = vadd.f32 1.0, %v10916_v32  ;;  %v7565_v57 = vmul.f32 1.442695, %v7527_v27  ;;  %v13148_v10 = vadd.f32 %v8617_v36, %v7465_v46  ;;  %v10162_v13 = vpop.f32.mrb[10].mxu1 }
 0x5fa   : > { %v7617_v33 = vadd.f32 1.0, %v10918_v41  ;;  %10927 = vpow2.f32 %v7567_v6  ;;  %v7530_v14 = vsub.f32 0.0, %v13146_v39  ;;  %v7468_v18 = vadd.f32 %v10162_v13, %v13100_v16  ;;  %v7278_v20 = vpop.f32.mrb[11].mxu1  ;;  %v8626_v6 = vld [vmem:[%s11114_s10 + $0xe1] sm:$0xff] }
 0x5fb   : > { %10929 = vrcp.f32 %v7618_v22  ;;  %v7529_v42 = vsub.f32 0.0, %v13148_v10  ;;  %v7467_v2 = vadd.f32 %v13100_v16, %v7278_v20 }
 0x5fc   : > { %v10920_v31 = vpop.eup %10919  ;;  %10931 = vrcp.f32 %v7617_v33  ;;  %v7571_v49 = vmul.f32 1.442695, %v7530_v14  ;;  %v13156_v51 = vadd.f32 %v8620_v28, %v7468_v18  ;;  %v8625_v33 = vld [vmem:[%s11114_s10 + $0xd9] sm:$0xff] }
 0x5fd   : > { %v10922_v5 = vpop.eup %10921  ;;  %v7620_v55 = vadd.f32 1.0, %v10920_v31  ;;  %10933 = vpow2.f32 %v7565_v57  ;;  %v7569_v35 = vmul.f32 1.442695, %v7529_v42  ;;  %v13158_v1 = vadd.f32 %v8619_v25, %v7467_v2  ;;  %v10165_v60 = vpop.f32.mrb[12].mxu1 }
 0x5fe   : > { %v7619_v44 = vadd.f32 1.0, %v10922_v5  ;;  %10935 = vpow2.f32 %v7571_v49  ;;  %v7532_v30 = vsub.f32 0.0, %v13156_v51  ;;  %v7470_v62 = vadd.f32 %v10165_v60, %v13100_v16  ;;  %v7288_v29 = vpop.f32.mrb[13].mxu1  ;;  %v8628_v60 = vld [vmem:[%s11114_s10 + $0xf9] sm:$0xff] }
 0x5ff   : > { %10937 = vrcp.f32 %v7620_v55  ;;  %v7531_v52 = vsub.f32 0.0, %v13158_v1  ;;  %v7469_v58 = vadd.f32 %v13100_v16, %v7288_v29 }
 0x600   : > { %v10924_v53 = vpop.eup %10923  ;;  %10939 = vrcp.f32 %v7619_v44  ;;  %v7575_v61 = vmul.f32 1.442695, %v7532_v30  ;;  %v13166_v38 = vadd.f32 %v8622_v45, %v7470_v62 }
 0x601   : > { %v10926_v0 = vpop.eup %10925  ;;  %v7622_v50 = vadd.f32 1.0, %v10924_v53  ;;  %10941 = vpow2.f32 %v7569_v35  ;;  %v7573_v4 = vmul.f32 1.442695, %v7531_v52  ;;  %v13168_v17 = vadd.f32 %v8621_v23, %v7469_v58  ;;  %v10168_v21 = vpop.f32.mrb[14].mxu1  ;;  %v8627_v23 = vld [vmem:[%s11114_s10 + $0xf1] sm:$0xff] }
 0x602   : > { %v7621_v47 = vadd.f32 1.0, %v10926_v0  ;;  %10943 = vpow2.f32 %v7575_v61  ;;  %v7534_v48 = vsub.f32 0.0, %v13166_v38  ;;  %v7472_v8 = vadd.f32 %v10168_v21, %v13100_v16  ;;  %v7298_v19 = vpop.f32.mrb[15].mxu1 }
 0x603   : > { %10945 = vrcp.f32 %v7622_v50  ;;  %v7533_v34 = vsub.f32 0.0, %v13168_v17  ;;  %v7471_v43 = vadd.f32 %v13100_v16, %v7298_v19 }
 0x604   : > { %v10928_v15 = vpop.eup %10927  ;;  %10947 = vrcp.f32 %v7621_v47  ;;  %v7579_v12 = vmul.f32 1.442695, %v7534_v48  ;;  %v13177_v56 = vadd.f32 %v8624_v54, %v7472_v8  ;;  %v8630_v8 = vld [vmem:[%s11114_s10 + $0x111] sm:$0xff] }
 0x605   : > { %v10930_v37 = vpop.eup %10929  ;;  %v7624_v36 = vadd.f32 1.0, %v10928_v15  ;;  %10949 = vpow2.f32 %v7573_v4  ;;  %v7577_v27 = vmul.f32 1.442695, %v7533_v34  ;;  %v13184_v46 = vadd.f32 %v8623_v26, %v7471_v43  ;;  %v10171_v32 = vpop.f32.mrb[16].mxu1 }
 0x606   : > { %v10932_v41 = vpop.eup %10931  ;;  %v7714_v22 = vmul.f32 %v10930_v37, %v13106_v40  ;;  %10951 = vpow2.f32 %v7579_v12  ;;  %v7536_v57 = vsub.f32 0.0, %v13177_v56  ;;  %v7474_v13 = vadd.f32 %v10171_v32, %v13100_v16  ;;  %v7308_v28 = vpop.f32.mrb[17].mxu1  ;;  %v8629_v12 = vld [vmem:[%s11114_s10 + $0x109] sm:$0xff] }
 0x607   : > { %v10934_v14 = vpop.eup %10933  ;;  %v7713_v18 = vmul.f32 %v10932_v41, %v13108_v11  ;;  %10953 = vrcp.f32 %v7624_v36  ;;  %v7535_v20 = vsub.f32 0.0, %v13184_v46  ;;  %v7473_v25 = vadd.f32 %v13100_v16, %v7308_v28 }
 0x608   : > { %v10936_v42 = vpop.eup %10935  ;;  %7746 = vst.msk [vmem:[%s13182_s11 + $0x8] sm:$0xff] %vm327_vm0, %v7714_v22  ;;  %v7623_v40 = vadd.f32 1.0, %v10934_v14  ;;  %10955 = vpow2.f32 %v7577_v27  ;;  %v7583_v2 = vmul.f32 1.442695, %v7536_v57  ;;  %v13196_v31 = vadd.f32 %v8626_v6, %v7474_v13  ;;  %v8632_v14 = vld [vmem:[%s11114_s10 + $0x129] sm:$0xff] }
 0x609   : > { %v10938_v49 = vpop.eup %10937  ;;  %7745 = vst.msk [vmem:[%s13182_s11] sm:$0xff] %vm327_vm0, %v7713_v18  ;;  %v7626_v5 = vadd.f32 1.0, %v10936_v42  ;;  %v7581_v11 = vmul.f32 1.442695, %v7535_v20  ;;  %v13200_v55 = vadd.f32 %v8625_v33, %v7473_v25  ;;  %v10174_v35 = vpop.f32.mrb[18].mxu1 }
 0x60a   : > { %v10940_v45 = vpop.eup %10939  ;;  %v7716_v44 = vmul.f32 %v10938_v49, %v13116_v24  ;;  %10957 = vrcp.f32 %v7623_v40  ;;  %v7538_v30 = vsub.f32 0.0, %v13196_v31  ;;  %v7476_v62 = vadd.f32 %v10174_v35, %v13100_v16  ;;  %v7318_v29 = vpop.f32.mrb[19].mxu1 }
 0x60b   : > { %v10942_v52 = vpop.eup %10941  ;;  %v7715_v58 = vmul.f32 %v10940_v45, %v13118_v59  ;;  %10959 = vrcp.f32 %v7626_v5  ;;  %v7537_v53 = vsub.f32 0.0, %v13200_v55  ;;  %v7475_v61 = vadd.f32 %v13100_v16, %v7318_v29 }
 0x60c   : > { %v10944_v0 = vpop.eup %10943  ;;  %7748 = vst.msk [vmem:[%s13182_s11 + $0x18] sm:$0xff] %vm327_vm0, %v7716_v44  ;;  %v7625_v24 = vadd.f32 1.0, %v10942_v52  ;;  %10961 = vpow2.f32 %v7583_v2  ;;  %v7587_v50 = vmul.f32 1.442695, %v7538_v30  ;;  %v13212_v4 = vadd.f32 %v8628_v60, %v7476_v62  ;;  %v8631_v2 = vld [vmem:[%s11114_s10 + $0x121] sm:$0xff] }
 0x60d   : > { %v10946_v21 = vpop.eup %10945  ;;  %7747 = vst.msk [vmem:[%s13182_s11 + $0x10] sm:$0xff] %vm327_vm0, %v7715_v58  ;;  %v7628_v54 = vadd.f32 1.0, %v10944_v0  ;;  %10963 = vpow2.f32 %v7581_v11  ;;  %v7585_v59 = vmul.f32 1.442695, %v7537_v53  ;;  %v13216_v47 = vadd.f32 %v8627_v23, %v7475_v61  ;;  %v10177_v48 = vpop.f32.mrb[20].mxu1  ;;  %v8634_v23 = vld [vmem:[%s11114_s10 + $0x141] sm:$0xff] }
 0x60e   : > { %v10948_v19 = vpop.eup %10947  ;;  %v7718_v26 = vmul.f32 %v10946_v21, %v13126_v7  ;;  %10965 = vrcp.f32 %v7625_v24  ;;  %v7540_v34 = vsub.f32 0.0, %v13212_v4  ;;  %v7478_v43 = vadd.f32 %v10177_v48, %v13100_v16  ;;  %v7328_v15 = vpop.f32.mrb[21].mxu1  ;;  %v8633_v24 = vld [vmem:[%s11114_s10 + $0x139] sm:$0xff] }
 0x60f   : > { %v10950_v37 = vpop.eup %10949  ;;  %v7717_v36 = vmul.f32 %v10948_v19, %v13128_v3  ;;  %10967 = vrcp.f32 %v7628_v54  ;;  %v7539_v27 = vsub.f32 0.0, %v13216_v47  ;;  %v7477_v32 = vadd.f32 %v13100_v16, %v7328_v15 }
 0x610   : > { %v10952_v6 = vpop.eup %10951  ;;  %7750 = vst.msk [vmem:[%s13182_s11 + $0x28] sm:$0xff] %vm327_vm0, %v7718_v26  ;;  %v7627_v7 = vadd.f32 1.0, %v10950_v37  ;;  %10969 = vpow2.f32 %v7587_v50  ;;  %v7591_v41 = vmul.f32 1.442695, %v7540_v34  ;;  %v13228_v22 = vadd.f32 %v8630_v8, %v7478_v43 }
 0x611   : > { %v10954_v57 = vpop.eup %10953  ;;  %7749 = vst.msk [vmem:[%s13182_s11 + $0x20] sm:$0xff] %vm327_vm0, %v7717_v36  ;;  %v7630_v13 = vadd.f32 1.0, %v10952_v6  ;;  %10971 = vpow2.f32 %v7585_v59  ;;  %v7589_v3 = vmul.f32 1.442695, %v7539_v27  ;;  %v13232_v28 = vadd.f32 %v8629_v12, %v7477_v32  ;;  %v10180_v33 = vpop.f32.mrb[22].mxu1  ;;  %v8636_v12 = vld [vmem:[%s11114_s10 + $0x159] sm:$0xff] }
 0x612   : > { %v10956_v18 = vpop.eup %10955  ;;  %v7720_v20 = vmul.f32 %v10954_v57, %v13136_v9  ;;  %10973 = vrcp.f32 %v7627_v7  ;;  %v7542_v25 = vsub.f32 0.0, %v13228_v22  ;;  %v7480_v42 = vadd.f32 %v10180_v33, %v13100_v16  ;;  %v7338_v40 = vpop.f32.mrb[23].mxu1  ;;  %v8635_v7 = vld [vmem:[%s11114_s10 + $0x151] sm:$0xff] }
 0x613   : > { %10975 = vrcp.f32 %v7630_v13  ;;  %v7629_v49 = vadd.f32 1.0, %v10956_v18  ;;  %v7541_v5 = vsub.f32 0.0, %v13232_v28  ;;  %v7479_v11 = vadd.f32 %v13100_v16, %v7338_v40 }
 0x614   : > { %v10958_v35 = vpop.eup %10957  ;;  %7752 = vst.msk [vmem:[%s13182_s11 + $0x38] sm:$0xff] %vm327_vm0, %v7720_v20  ;;  %10977 = vpow2.f32 %v7591_v41  ;;  %v7595_v9 = vmul.f32 1.442695, %v7542_v25  ;;  %v13243_v60 = vadd.f32 %v8632_v14, %v7480_v42 }
 0x615   : > { %v10960_v45 = vpop.eup %10959  ;;  %v7719_v44 = vmul.f32 %v10958_v35, %v13138_v63  ;;  %10979 = vrcp.f32 %v7629_v49  ;;  %v7593_v30 = vmul.f32 1.442695, %v7541_v5  ;;  %v13246_v62 = vadd.f32 %v8631_v2, %v7479_v11  ;;  %v10183_v29 = vpop.f32.mrb[24].mxu1  ;;  %v8638_v2 = vld [vmem:[%s11114_s10 + $0x171] sm:$0xff] }
 0x616   : > { %v10962_v52 = vpop.eup %10961  ;;  %v7722_v58 = vmul.f32 %v10960_v45, %v13146_v39  ;;  %10981 = vpow2.f32 %v7589_v3  ;;  %v7544_v53 = vsub.f32 0.0, %v13243_v60  ;;  %v7482_v61 = vadd.f32 %v10183_v29, %v13100_v16  ;;  %v7348_v0 = vpop.f32.mrb[25].mxu1  ;;  %v8637_v45 = vld [vmem:[%s11114_s10 + $0x169] sm:$0xff] }
 0x617   : > { %v10964_v50 = vpop.eup %10963  ;;  %7751 = vst.msk [vmem:[%s13182_s11 + $0x30] sm:$0xff] %vm327_vm0, %v7719_v44  ;;  %v7632_v63 = vadd.f32 1.0, %v10962_v52  ;;  %10983 = vpow2.f32 %v7595_v9  ;;  %v7543_v21 = vsub.f32 0.0, %v13246_v62  ;;  %v7481_v54 = vadd.f32 %v13100_v16, %v7348_v0 }
 0x618   : > { %v10966_v59 = vpop.eup %10965  ;;  %7754 = vst.msk [vmem:[%s13182_s11 + $0x48] sm:$0xff] %vm327_vm0, %v7722_v58  ;;  %v7631_v39 = vadd.f32 1.0, %v10964_v50  ;;  %10985 = vpow2.f32 %v7593_v30  ;;  %v7599_v48 = vmul.f32 1.442695, %v7544_v53  ;;  %v13259_v8 = vadd.f32 %v8634_v23, %v7482_v61 }
 0x619   : > { %v10968_v19 = vpop.eup %10967  ;;  %v7721_v26 = vmul.f32 %v10966_v59, %v13148_v10  ;;  %10987 = vrcp.f32 %v7632_v63  ;;  %v7597_v34 = vmul.f32 1.442695, %v7543_v21  ;;  %v13262_v43 = vadd.f32 %v8633_v24, %v7481_v54  ;;  %v10186_v15 = vpop.f32.mrb[26].mxu1  ;;  %v8640_v63 = vld [vmem:[%s11114_s10 + $0x189] sm:$0xff] }
 0x61a   : > { %v10970_v37 = vpop.eup %10969  ;;  %v7724_v36 = vmul.f32 %v10968_v19, %v13156_v51  ;;  %10989 = vrcp.f32 %v7631_v39  ;;  %v7546_v27 = vsub.f32 0.0, %v13259_v8  ;;  %v7484_v32 = vadd.f32 %v10186_v15, %v13100_v16  ;;  %v7358_v6 = vpop.f32.mrb[27].mxu1 }
 0x61b   : > { %v10972_v41 = vpop.eup %10971  ;;  %7753 = vst.msk [vmem:[%s13182_s11 + $0x40] sm:$0xff] %vm327_vm0, %v7721_v26  ;;  %v7634_v10 = vadd.f32 1.0, %v10970_v37  ;;  %10991 = vpow2.f32 %v7599_v48  ;;  %v7545_v57 = vsub.f32 0.0, %v13262_v43  ;;  %v7483_v13 = vadd.f32 %v13100_v16, %v7358_v6  ;;  %v8639_v48 = vld [vmem:[%s11114_s10 + $0x181] sm:$0xff] }
 0x61c   : > { %v10974_v3 = vpop.eup %10973  ;;  %7756 = vst.msk [vmem:[%s13182_s11 + $0x58] sm:$0xff] %vm327_vm0, %v7724_v36  ;;  %v7633_v51 = vadd.f32 1.0, %v10972_v41  ;;  %10993 = vpow2.f32 %v7597_v34  ;;  %v7603_v33 = vmul.f32 1.442695, %v7546_v27  ;;  %v13275_v14 = vadd.f32 %v8636_v12, %v7484_v32 }
 0x61d   : > { %v10976_v18 = vpop.eup %10975  ;;  %v7723_v20 = vmul.f32 %v10974_v3, %v13158_v1  ;;  %10995 = vrcp.f32 %v7634_v10  ;;  %v7601_v25 = vmul.f32 1.442695, %v7545_v57  ;;  %v13278_v42 = vadd.f32 %v8635_v7, %v7483_v13  ;;  %v10189_v40 = vpop.f32.mrb[28].mxu1 }
 0x61e   : > { %v10978_v49 = vpop.eup %10977  ;;  %v7726_v5 = vmul.f32 %v10976_v18, %v13166_v38  ;;  %10997 = vrcp.f32 %v7633_v51  ;;  %v7548_v11 = vsub.f32 0.0, %v13275_v14  ;;  %v7486_v35 = vadd.f32 %v10189_v40, %v13100_v16  ;;  %v7368_v9 = vpop.f32.mrb[29].mxu1 }
 0x61f   : > { %v10980_v44 = vpop.eup %10979  ;;  %7755 = vst.msk [vmem:[%s13182_s11 + $0x50] sm:$0xff] %vm327_vm0, %v7723_v20  ;;  %v7636_v1 = vadd.f32 1.0, %v10978_v49  ;;  %10999 = vpow2.f32 %v7603_v33  ;;  %v7547_v30 = vsub.f32 0.0, %v13278_v42  ;;  %v7485_v29 = vadd.f32 %v13100_v16, %v7368_v9 }
 0x620   : > { %v10982_v23 = vpop.eup %10981  ;;  %7758 = vst.msk [vmem:[%s13182_s11 + $0x68] sm:$0xff] %vm327_vm0, %v7726_v5  ;;  %v7725_v38 = vmul.f32 %v10980_v44, %v13168_v17  ;;  %11001 = vpow2.f32 %v7601_v25  ;;  %v7607_v52 = vmul.f32 1.442695, %v7548_v11  ;;  %v13292_v58 = vadd.f32 %v8638_v2, %v7486_v35 }
 0x621   : > { %v10984_v53 = vpop.eup %10983  ;;  %11003 = vrcp.f32 %v7636_v1  ;;  %v7635_v61 = vadd.f32 1.0, %v10982_v23  ;;  %v7605_v0 = vmul.f32 1.442695, %v7547_v30  ;;  %v13294_v24 = vadd.f32 %v8637_v45, %v7485_v29  ;;  %v10192_v50 = vpop.f32.mrb[30].mxu1 }
 0x622   : > { %v10986_v21 = vpop.eup %10985  ;;  %7757 = vst.msk [vmem:[%s13182_s11 + $0x60] sm:$0xff] %vm327_vm0, %v7725_v38  ;;  %v7638_v54 = vadd.f32 1.0, %v10984_v53  ;;  %11005 = vpow2.f32 %v7607_v52  ;;  %v7550_v17 = vsub.f32 0.0, %v13292_v58  ;;  %v7488_v59 = vadd.f32 %v10192_v50, %v13100_v16  ;;  %v7378_v39 = vpop.f32.mrb[31].mxu1 }
 0x623   : > { %v10988_v19 = vpop.eup %10987  ;;  %11007 = vrcp.f32 %v7635_v61  ;;  %v7637_v26 = vadd.f32 1.0, %v10986_v21  ;;  %v7549_v34 = vsub.f32 0.0, %v13294_v24  ;;  %v7487_v15 = vadd.f32 %v13100_v16, %v7378_v39 }
 0x624   : > { %v10990_v12 = vpop.eup %10989  ;;  %v7728_v37 = vmul.f32 %v10988_v19, %v13177_v56  ;;  %11009 = vrcp.f32 %v7638_v54  ;;  %v7611_v36 = vmul.f32 1.442695, %v7550_v17  ;;  %v13305_v27 = vadd.f32 %v8640_v63, %v7488_v59 }
 0x625   : > { %v10992_v32 = vpop.eup %10991  ;;  %v7727_v6 = vmul.f32 %v10990_v12, %v13184_v46  ;;  %11011 = vrcp.f32 %v7637_v26  ;;  %v13308_v7 = vadd.f32 %v8639_v48, %v7487_v15  ;;  %v7609_v16 = vmul.f32 1.442695, %v7549_v34 }
 0x626   : > { %v10994_v41 = vpop.eup %10993  ;;  %7760 = vst.msk [vmem:[%s13182_s11 + $0x78] sm:$0xff] %vm327_vm0, %v7728_v37  ;;  %v7640_v10 = vadd.f32 1.0, %v10992_v32  ;;  %11013 = vpow2.f32 %v7605_v0  ;;  %v7552_v57 = vsub.f32 0.0, %v13305_v27 }
 0x627   : > { %v10996_v56 = vpop.eup %10995  ;;  %7759 = vst.msk [vmem:[%s13182_s11 + $0x70] sm:$0xff] %vm327_vm0, %v7727_v6  ;;  %v7639_v13 = vadd.f32 1.0, %v10994_v41  ;;  %11015 = vpow2.f32 %v7611_v36  ;;  %v7551_v46 = vsub.f32 0.0, %v13308_v7 }
 0x628   : > { %v10998_v3 = vpop.eup %10997  ;;  %v7730_v51 = vmul.f32 %v10996_v56, %v13196_v31  ;;  %11017 = vrcp.f32 %v7640_v10  ;;  %v7615_v33 = vmul.f32 1.442695, %v7552_v57 }
 0x629   : > { %v11000_v18 = vpop.eup %10999  ;;  %v7729_v20 = vmul.f32 %v10998_v3, %v13200_v55  ;;  %11019 = vrcp.f32 %v7639_v13  ;;  %v7613_v2 = vmul.f32 1.442695, %v7551_v46 }
 0x62a   : > { %v11002_v25 = vpop.eup %11001  ;;  %7762 = vst.msk [vmem:[%s13182_s11 + $0x88] sm:$0xff] %vm327_vm0, %v7730_v51  ;;  %v7642_v40 = vadd.f32 1.0, %v11000_v18  ;;  %11021 = vpow2.f32 %v7609_v16 }
 0x62b   : > { %v11004_v49 = vpop.eup %11003  ;;  %7761 = vst.msk [vmem:[%s13182_s11 + $0x80] sm:$0xff] %vm327_vm0, %v7729_v20  ;;  %v7641_v5 = vadd.f32 1.0, %v11002_v25  ;;  %11023 = vpow2.f32 %v7615_v33 }
 0x62c   : > { %v11006_v31 = vpop.eup %11005  ;;  %v7732_v11 = vmul.f32 %v11004_v49, %v13212_v4  ;;  %11025 = vrcp.f32 %v7642_v40 }
 0x62d   : > { %v11008_v55 = vpop.eup %11007  ;;  %11027 = vrcp.f32 %v7641_v5  ;;  %v7644_v35 = vadd.f32 1.0, %v11006_v31 }
 0x62e   : > { %v11010_v9 = vpop.eup %11009  ;;  %7764 = vst.msk [vmem:[%s13182_s11 + $0x98] sm:$0xff] %vm327_vm0, %v7732_v11  ;;  %v7731_v45 = vmul.f32 %v11008_v55, %v13216_v47  ;;  %11029 = vpow2.f32 %v7613_v2 }
 0x62f   : > { %v11012_v44 = vpop.eup %11011  ;;  %v7734_v1 = vmul.f32 %v11010_v9, %v13228_v22  ;;  %11031 = vrcp.f32 %v7644_v35 }
 0x630   : > { %v11014_v30 = vpop.eup %11013  ;;  %7763 = vst.msk [vmem:[%s13182_s11 + $0x90] sm:$0xff] %vm327_vm0, %v7731_v45  ;;  %v7733_v4 = vmul.f32 %v11012_v44, %v13232_v28 }
 0x631   : > { %v11016_v29 = vpop.eup %11015  ;;  %7766 = vst.msk [vmem:[%s13182_s11 + $0xa8] sm:$0xff] %vm327_vm0, %v7734_v1  ;;  %v7643_v23 = vadd.f32 1.0, %v11014_v30 }
 0x632   : > { %v11018_v38 = vpop.eup %11017  ;;  %7765 = vst.msk [vmem:[%s13182_s11 + $0xa0] sm:$0xff] %vm327_vm0, %v7733_v4  ;;  %v7646_v47 = vadd.f32 1.0, %v11016_v29 }
 0x633   : > { %v11020_v52 = vpop.eup %11019  ;;  %v7736_v53 = vmul.f32 %v11018_v38, %v13243_v60  ;;  %11033 = vrcp.f32 %v7643_v23 }
 0x634   : > { %v11022_v22 = vpop.eup %11021  ;;  %v7735_v61 = vmul.f32 %v11020_v52, %v13246_v62  ;;  %11035 = vrcp.f32 %v7646_v47 }
 0x635   : > { %v11024_v28 = vpop.eup %11023  ;;  %7768 = vst.msk [vmem:[%s13182_s11 + $0xb8] sm:$0xff] %vm327_vm0, %v7736_v53  ;;  %v7645_v0 = vadd.f32 1.0, %v11022_v22 }
 0x636   : > { %v11026_v50 = vpop.eup %11025  ;;  %7767 = vst.msk [vmem:[%s13182_s11 + $0xb0] sm:$0xff] %vm327_vm0, %v7735_v61  ;;  %v7648_v63 = vadd.f32 1.0, %v11024_v28 }
 0x637   : > { %v11028_v21 = vpop.eup %11027  ;;  %v7738_v54 = vmul.f32 %v11026_v50, %v13259_v8  ;;  %11037 = vrcp.f32 %v7645_v0 }
 0x638   : > { %v11030_v60 = vpop.eup %11029  ;;  %v7737_v62 = vmul.f32 %v11028_v21, %v13262_v43  ;;  %11039 = vrcp.f32 %v7648_v63 }
 0x639   : > { %v11032_v17 = vpop.eup %11031  ;;  %7770 = vst.msk [vmem:[%s13182_s11 + $0xc8] sm:$0xff] %vm327_vm0, %v7738_v54  ;;  %v7647_v59 = vadd.f32 1.0, %v11030_v60 }
 0x63a   : > { %7769 = vst.msk [vmem:[%s13182_s11 + $0xc0] sm:$0xff] %vm327_vm0, %v7737_v62  ;;  %v7740_v39 = vmul.f32 %v11032_v17, %v13275_v14 }
 0x63b   : > { %11041 = vrcp.f32 %v7647_v59 }
 0x63c   : > { %7772 = vst.msk [vmem:[%s13182_s11 + $0xd8] sm:$0xff] %vm327_vm0, %v7740_v39 }
 0x63d   : > { %v11034_v8 = vpop.eup %11033 }
 0x63e   : > { %v11036_v48 = vpop.eup %11035  ;;  %v7739_v19 = vmul.f32 %v11034_v8, %v13278_v42 }
 0x63f   : > { %v7742_v43 = vmul.f32 %v11036_v48, %v13292_v58 }
 0x640   : > { %7771 = vst.msk [vmem:[%s13182_s11 + $0xd0] sm:$0xff] %vm327_vm0, %v7739_v19 }
 0x641   : > { %v11038_v26 = vpop.eup %11037  ;;  %7774 = vst.msk [vmem:[%s13182_s11 + $0xe8] sm:$0xff] %vm327_vm0, %v7742_v43 }
 0x642   : > { %v11040_v34 = vpop.eup %11039  ;;  %v7741_v15 = vmul.f32 %v11038_v26, %v13294_v24 }
 0x643   : > { %v7744_v14 = vmul.f32 %v11040_v34, %v13305_v27 }
 0x644   : > { %7773 = vst.msk [vmem:[%s13182_s11 + $0xe0] sm:$0xff] %vm327_vm0, %v7741_v15 }
 0x645   : > { %v11042_v12 = vpop.eup %11041  ;;  %7776 = vst.msk [vmem:[%s13182_s11 + $0xf8] sm:$0xff] %vm327_vm0, %v7744_v14 }
 0x646   : > { %v7743_v37 = vmul.f32 %v11042_v12, %v13308_v7 }
 0x648   : > { %7775 = vst.msk [vmem:[%s13182_s11 + $0xf0] sm:$0xff] %vm327_vm0, %v7743_v37 }
 0x649 PF: > { %s15_s18 = sadd.s32 1, %s11049_s18  }
 0x64a   : > { %p12_p4 = scmp.ge.s32.totalorder %s15_s18, 4  }
 0x64c   :  { %14 = sbr.rel (!%p12_p4) target bundleno = 1 (0x1), region = 74 }

</bundles_post_ra>
